<compile_context>
chip_gen: v5e
topology: v5e:2x2
jax: 0.10.0
libtpu: 0.0.40
codegen_flags: <defaults>
</compile_context>

<pallas_src>
import functools

import jax
import jax.numpy as jnp
from jax.experimental import pallas as pl
from jax.experimental.pallas import tpu as pltpu

EMBED_SIZE = 320  # fixed by the module: TimeEmbedding(320)


# ----------------------------------------------------------------------------
# Pallas kernel: fused TimeEmbedding forward
#   h   = silu(x @ W1 + b1)        (B, 4E)   W1 bf16, accum f32, SiLU in f32
#   out = h @ W2 + b2              (B, E)    W2 bf16, accum f32
# ----------------------------------------------------------------------------
def _time_embedding_kernel(x_ref, w1_ref, b1_ref, w2_ref, b2_ref, o_ref):
    # Cast x to bf16 so the first matmul takes the native bf16 MXU path.
    x = x_ref[...].astype(jnp.bfloat16)                                # (B, E)
    # Linear 1 (E -> 4E), bf16 x bf16 -> f32 accumulation on the MXU.
    h = jnp.dot(x, w1_ref[...], preferred_element_type=jnp.float32)    # (B, 4E) f32
    h = h + b1_ref[...]                                                # b1 is (1, 4E) f32
    # SiLU on the VPU/EUP in f32 (v5e has no bf16 VPU/EUP).
    h = h * jax.nn.sigmoid(h)
    # Linear 2 (4E -> E), cast h to bf16 for the MXU, f32 accumulation.
    out = jnp.dot(h.astype(jnp.bfloat16), w2_ref[...],
                  preferred_element_type=jnp.float32)                  # (B, E) f32
    out = out + b2_ref[...]                                            # b2 is (1, E) f32
    o_ref[...] = out.astype(o_ref.dtype)


@functools.partial(jax.jit, static_argnames=())
def time_embedding_forward(x, w1, b1, w2, b2):
    """x: (B, E) f32; w1: (E, 4E) bf16; b1: (1, 4E) f32; w2: (4E, E) bf16; b2: (1, E) f32."""
    B, E = x.shape
    H = w1.shape[1]
    assert w1.shape == (E, H) and w2.shape == (H, E)
    assert b1.shape == (1, H) and b2.shape == (1, E)

    # Whole problem fits comfortably in VMEM (~1.65 MiB of bf16 weights), so
    # use full-array blocks (block_shape == array shape satisfies the (8,128)
    # rule) and a trivial 0-d grid.
    full = lambda shape: pl.BlockSpec(shape, lambda: (0,) * len(shape))

    # Accurate cost hint: this call is HBM-byte bound, not FLOP bound.
    bytes_accessed = (
        x.size * x.dtype.itemsize
        + w1.size * w1.dtype.itemsize
        + b1.size * b1.dtype.itemsize
        + w2.size * w2.dtype.itemsize
        + b2.size * b2.dtype.itemsize
        + B * E * x.dtype.itemsize  # output
    )
    cost = pl.CostEstimate(
        flops=4 * B * E * H,          # two matmuls: 2*B*E*H + 2*B*H*E
        transcendentals=B * H,        # sigmoid in SiLU
        bytes_accessed=bytes_accessed,
    )

    return pl.pallas_call(
        _time_embedding_kernel,
        out_shape=jax.ShapeDtypeStruct((B, E), x.dtype),
        grid_spec=pltpu.PrefetchScalarGridSpec(
            num_scalar_prefetch=0,
            grid=(),
            in_specs=[
                full((B, E)),   # x   (f32, tiny)
                full((E, H)),   # w1  (bf16)
                full((1, H)),   # b1  (f32)
                full((H, E)),   # w2  (bf16)
                full((1, E)),   # b2  (f32)
            ],
            out_specs=full((B, E)),
        ),
        cost_estimate=cost,
    )(x, w1, b1, w2, b2)


# ----------------------------------------------------------------------------
# Diffusion module
# ----------------------------------------------------------------------------
def init_diffusion_params(key, embed_size=EMBED_SIZE):
    """Deterministic init of the TimeEmbedding parameters (shapes from __init__).

    Weights are stored as (in_features, out_features) — the transpose of
    PyTorch's nn.Linear layout — and in bfloat16 (the kernel's native MXU
    dtype).  Biases stay f32.
    """
    k1, k2, k3, k4 = jax.random.split(key, 4)
    hidden = 4 * embed_size
    scale1 = 1.0 / jnp.sqrt(jnp.float32(embed_size))
    scale2 = 1.0 / jnp.sqrt(jnp.float32(hidden))
    w1 = jax.random.uniform(k1, (embed_size, hidden), jnp.float32, -1.0, 1.0) * scale1
    b1 = jax.random.uniform(k2, (1, hidden), jnp.float32, -1.0, 1.0) * scale1
    w2 = jax.random.uniform(k3, (hidden, embed_size), jnp.float32, -1.0, 1.0) * scale2
    b2 = jax.random.uniform(k4, (1, embed_size), jnp.float32, -1.0, 1.0) * scale2
    return {
        "w1": w1.astype(jnp.bfloat16),
        "b1": b1,
        "w2": w2.astype(jnp.bfloat16),
        "b2": b2,
    }


def diffusion_forward(params, latent, context, time):
    """Forward pass of Diffusion.

    latent : (N, 4, H, W)  NCHW (as in PyTorch)
    context: (N, S, D_ctx)
    time   : (B, 320)
    """
    # time = self.time_embedding(time)  -- fused Pallas kernel.
    time_emb = time_embedding_forward(
        time, params["w1"], params["b1"], params["w2"], params["b2"]
    )
    # TODO(synk): UNET is not defined in the provided reference source; its
    # forward cannot be reproduced — latent is passed through unchanged.
    output = latent
    del context, time_emb  # would be consumed by UNET
    # TODO(synk): UNET_Output(320, 4) is likewise undefined in the provided
    # source; passing through unchanged.
    return output


# ----------------------------------------------------------------------------
# Demo / smoke test
# ----------------------------------------------------------------------------
if __name__ == "__main__":
    key = jax.random.PRNGKey(0)
    pkey, k_lat, k_ctx, k_time = jax.random.split(key, 4)

    params = init_diffusion_params(pkey)

    # Small shapes consistent with the module's forward signature.
    latent = jax.random.normal(k_lat, (2, 4, 16, 16), jnp.float32)   # NCHW
    context = jax.random.normal(k_ctx, (2, 8, 64), jnp.float32)
    time = jax.random.normal(k_time, (2, EMBED_SIZE), jnp.float32)

    # Run the Pallas time-embedding kernel and check vs a pure-JAX reference
    # that applies the same bf16 quantization (weights, x, h) so only the
    # accumulation order differs.
    t_emb = time_embedding_forward(
        time, params["w1"], params["b1"], params["w2"], params["b2"]
    )
    t_emb = jax.block_until_ready(t_emb)

    hp = jax.lax.Precision.HIGHEST
    x_q = time.astype(jnp.bfloat16).astype(jnp.float32)
    w1_f = params["w1"].astype(jnp.float32)
    w2_f = params["w2"].astype(jnp.float32)
    h_ref = jnp.dot(x_q, w1_f, precision=hp) + params["b1"]
    h_ref = h_ref * jax.nn.sigmoid(h_ref)
    h_q = h_ref.astype(jnp.bfloat16).astype(jnp.float32)
    ref = jnp.dot(h_q, w2_f, precision=hp) + params["b2"]
    assert jnp.allclose(t_emb, ref, atol=5e-3, rtol=5e-3), "mismatch vs JAX reference"

    # A larger batched-timestep call (amortizes the weight DMA across steps).
    time_big = jax.random.normal(k_time, (16, EMBED_SIZE), jnp.float32)
    t_emb_big = jax.block_until_ready(
        time_embedding_forward(
            time_big, params["w1"], params["b1"], params["w2"], params["b2"]
        )
    )
    assert t_emb_big.shape == (16, EMBED_SIZE)

    # Full Diffusion forward (UNET / UNET_Output undefined -> pass-through).
    out = diffusion_forward(params, latent, context, time)
    out = jax.block_until_ready(out)
    assert out.shape == (2, 4, 16, 16)

    print("KERNEL_OK")
</pallas_src>

<mosaic_0001>
module attributes {stable_mosaic.version = 11 : i64} {
  func.func @_time_embedding_kernel(%arg0: memref<2x320xf32, #tpu.memory_space<vmem>>, %arg1: memref<320x1280xbf16, #tpu.memory_space<vmem>>, %arg2: memref<1x1280xf32, #tpu.memory_space<vmem>>, %arg3: memref<1280x320xbf16, #tpu.memory_space<vmem>>, %arg4: memref<1x320xf32, #tpu.memory_space<vmem>>, %arg5: memref<2x320xf32, #tpu.memory_space<vmem>>) attributes {dimension_semantics = [], scalar_prefetch = 0 : i64, scratch_operands = 0 : i64, tpu.core_type = #tpu.core_type<tc>} {
    %c0 = arith.constant 0 : index
    %c0_0 = arith.constant 0 : index
    %0 = vector.load %arg0[%c0, %c0_0] : memref<2x320xf32, #tpu.memory_space<vmem>>, vector<2x320xf32>
    %1 = arith.truncf %0 : vector<2x320xf32> to vector<2x320xbf16>
    %c0_1 = arith.constant 0 : index
    %c0_2 = arith.constant 0 : index
    %2 = vector.load %arg1[%c0_1, %c0_2] : memref<320x1280xbf16, #tpu.memory_space<vmem>>, vector<320x1280xbf16>
    %cst = arith.constant dense<0.000000e+00> : vector<2x1280xf32>
    %3 = tpu.matmul %1, %2, %cst {dimension_numbers = #tpu.dot_dimension_numbers<[1], [0], [0], [1], [0, 0, 1, 1], [], []>} : vector<2x320xbf16>, vector<320x1280xbf16>, vector<2x1280xf32> -> vector<2x1280xf32>
    %c0_3 = arith.constant 0 : index
    %c0_4 = arith.constant 0 : index
    %4 = vector.load %arg2[%c0_3, %c0_4] : memref<1x1280xf32, #tpu.memory_space<vmem>>, vector<1x1280xf32>
    %5 = vector.broadcast %4 : vector<1x1280xf32> to vector<2x1280xf32>
    %6 = arith.addf %3, %5 : vector<2x1280xf32>
    %7 = arith.negf %6 : vector<2x1280xf32>
    %8 = math.exp %7 : vector<2x1280xf32>
    %cst_5 = arith.constant 1.000000e+00 : f32
    %9 = vector.broadcast %cst_5 : f32 to vector<2x1280xf32>
    %10 = arith.addf %9, %8 : vector<2x1280xf32>
    %11 = arith.divf %9, %10 : vector<2x1280xf32>
    %12 = arith.mulf %6, %11 : vector<2x1280xf32>
    %13 = arith.truncf %12 : vector<2x1280xf32> to vector<2x1280xbf16>
    %c0_6 = arith.constant 0 : index
    %c0_7 = arith.constant 0 : index
    %14 = vector.load %arg3[%c0_6, %c0_7] : memref<1280x320xbf16, #tpu.memory_space<vmem>>, vector<1280x320xbf16>
    %cst_8 = arith.constant dense<0.000000e+00> : vector<2x320xf32>
    %15 = tpu.matmul %13, %14, %cst_8 {dimension_numbers = #tpu.dot_dimension_numbers<[1], [0], [0], [1], [0, 0, 1, 1], [], []>} : vector<2x1280xbf16>, vector<1280x320xbf16>, vector<2x320xf32> -> vector<2x320xf32>
    %c0_9 = arith.constant 0 : index
    %c0_10 = arith.constant 0 : index
    %16 = vector.load %arg4[%c0_9, %c0_10] : memref<1x320xf32, #tpu.memory_space<vmem>>, vector<1x320xf32>
    %17 = vector.broadcast %16 : vector<1x320xf32> to vector<2x320xf32>
    %18 = arith.addf %15, %17 : vector<2x320xf32>
    %c0_11 = arith.constant 0 : index
    %c0_12 = arith.constant 0 : index
    %19 = vector.load %arg5[%c0_11, %c0_12] : memref<2x320xf32, #tpu.memory_space<vmem>>, vector<2x320xf32>
    tpu.vector_store %arg5[%c0_11, %c0_12], %18 {strides = array<i32>} : memref<2x320xf32, #tpu.memory_space<vmem>>, vector<2x320xf32>,
    return
  }
}

</mosaic_0001>

<bundles_post_ra>
// kernel: time_embedding_forward.1
= control target key start
LH: loop header
LB: loop body
LE: loop exit
PB: predicated region body
PF: predicated region fallthrough
CT: control target
= control target key end

     0   :  { %vm1258_vm0 = vcmask 523264   ;;  %s9179_s0 = inlined_call_operand.vmem [shape: f32[2,320], index: 0, kind: input, shape index: {}]   ;;  %s9180_s1 = inlined_call_operand.vmem [shape: bf16[320,1280], index: 1, kind: input, shape index: {}]   ;;  %s9181_s2 = inlined_call_operand.vmem [shape: f32[1,1280], index: 2, kind: input, shape index: {}]   ;;  %s9182_s3 = inlined_call_operand.vmem [shape: bf16[1280,320], index: 3, kind: input, shape index: {}]   ;;  %s9183_s4 = inlined_call_operand.vmem [shape: f32[1,320], index: 4, kind: input, shape index: {}]   ;;  %s9184_s5 = inlined_call_operand.hbm [shape: f32[2,320], index: 5, kind: output, shape index: {}]  }
   0x1   :  { %v4173_v0 = vld [vmem:[%s9180_s1 + $0x230] sm:$0xf]  ;;  %v5746_v1 = vld [vmem:[%s9180_s1 + $0x254] sm:$0xf0]  ;;  %v5741_v9 = vld [vmem:[%s9180_s1 + $0x234] sm:$0xf] }
   0x2   :  { %v4493_v2 = vld [vmem:[%s9180_s1 + $0x4b0] sm:$0xf]  ;;  %v4174_v3 = vor.u32 %v5746_v1, %v4173_v0  ;;  %v5826_v4 = vld [vmem:[%s9180_s1 + $0x4d4] sm:$0xf0]  ;;  %v4175_v10 = vld [vmem:[%s9180_s1 + $0x258] sm:$0xf0] }
   0x3   :  { %v4653_v5 = vld [vmem:[%s9180_s1 + $0x5f0] sm:$0xf]  ;;  %v5866_v6 = vld [vmem:[%s9180_s1 + $0x614] sm:$0xf0]  ;;  %v4494_v7 = vor.u32 %v5826_v4, %v4493_v2  ;;  %v4133_v11 = vld [vmem:[%s9180_s1 + $0x1e0] sm:$0xf]  ;;  %v4178_v12 = vor.u32 %v5741_v9, %v4175_v10 }
   0x4   :  { %v4654_v8 = vor.u32 %v5866_v6, %v4653_v5  ;;  %1262 = vmatpush.bf16.msra.mxu0 %v4174_v3  ;;  %v5736_v13 = vld [vmem:[%s9180_s1 + $0x204] sm:$0xf0]  ;;  %v4453_v14 = vld [vmem:[%s9180_s1 + $0x460] sm:$0xf]  ;;  %v5731_v20 = vld [vmem:[%s9180_s1 + $0x1e4] sm:$0xf] }
   0x5   :  { %v5816_v15 = vld [vmem:[%s9180_s1 + $0x484] sm:$0xf0]  ;;  %1275 = vmatpush.bf16.msra.mxu1 %v4494_v7  ;;  %v4134_v16 = vor.u32 %v5736_v13, %v4133_v11  ;;  %v4613_v18 = vld [vmem:[%s9180_s1 + $0x5a0] sm:$0xf]  ;;  %1301 = vmatpush.bf16.msra.mxu3 %v4178_v12  ;;  %v4135_v22 = vld [vmem:[%s9180_s1 + $0x208] sm:$0xf0] }
   0x6   :  { %1292 = vmatpush.bf16.msra.mxu2 %v4654_v8  ;;  %v4454_v17 = vor.u32 %v5816_v15, %v4453_v14  ;;  %v5856_v19 = vld [vmem:[%s9180_s1 + $0x5c4] sm:$0xf0]  ;;  %v4093_v23 = vld [vmem:[%s9180_s1 + $0x190] sm:$0xf]  ;;  %v5726_v24 = vld [vmem:[%s9180_s1 + $0x1b4] sm:$0xf0]  ;;  %v4138_v25 = vor.u32 %v5731_v20, %v4135_v22 }
   0x7   :  { %v4614_v21 = vor.u32 %v5856_v19, %v4613_v18  ;;  %v4413_v26 = vld [vmem:[%s9180_s1 + $0x410] sm:$0xf]  ;;  %v5806_v27 = vld [vmem:[%s9180_s1 + $0x434] sm:$0xf0]  ;;  %v4094_v29 = vor.u32 %v5726_v24, %v4093_v23  ;;  %v5721_v31 = vld [vmem:[%s9180_s1 + $0x194] sm:$0xf] }
   0x8   :  { %v4573_v28 = vld [vmem:[%s9180_s1 + $0x550] sm:$0xf]  ;;  %1263 = vmatpush.bf16.msra.mxu0 %v4134_v16  ;;  %v5846_v30 = vld [vmem:[%s9180_s1 + $0x574] sm:$0xf0]  ;;  %v4095_v32 = vld [vmem:[%s9180_s1 + $0x1b8] sm:$0xf0]  ;;  %v4414_v33 = vor.u32 %v5806_v27, %v4413_v26 }
   0x9   :  { %1276 = vmatpush.bf16.msra.mxu1 %v4454_v17  ;;  %v4574_v34 = vor.u32 %v5846_v30, %v4573_v28  ;;  %v4053_v35 = vld [vmem:[%s9180_s1 + $0x140] sm:$0xf]  ;;  %v5716_v36 = vld [vmem:[%s9180_s1 + $0x164] sm:$0xf0]  ;;  %1302 = vmatpush.bf16.msra.mxu3 %v4138_v25  ;;  %v4098_v38 = vor.u32 %v5721_v31, %v4095_v32  ;;  %v5711_v42 = vld [vmem:[%s9180_s1 + $0x144] sm:$0xf] }
   0xa   :  { %1293 = vmatpush.bf16.msra.mxu2 %v4614_v21  ;;  %v4373_v37 = vld [vmem:[%s9180_s1 + $0x3c0] sm:$0xf]  ;;  %v5796_v39 = vld [vmem:[%s9180_s1 + $0x3e4] sm:$0xf0]  ;;  %v4055_v43 = vld [vmem:[%s9180_s1 + $0x168] sm:$0xf0]  ;;  %v4054_v45 = vor.u32 %v5716_v36, %v4053_v35 }
   0xb   :  { %v4533_v40 = vld [vmem:[%s9180_s1 + $0x500] sm:$0xf]  ;;  %v5836_v41 = vld [vmem:[%s9180_s1 + $0x524] sm:$0xf0]  ;;  %v5821_v44 = vld [vmem:[%s9180_s1 + $0x4b4] sm:$0xf]  ;;  %v4374_v47 = vor.u32 %v5796_v39, %v4373_v37  ;;  %v4058_v51 = vor.u32 %v5711_v42, %v4055_v43 }
   0xc   :  { %1264 = vmatpush.bf16.msra.mxu0 %v4094_v29  ;;  %v4495_v46 = vld [vmem:[%s9180_s1 + $0x4d8] sm:$0xf0]  ;;  %v4534_v48 = vor.u32 %v5836_v41, %v4533_v40  ;;  %v4013_v49 = vld [vmem:[%s9180_s1 + $0xf0] sm:$0xf]  ;;  %v5706_v50 = vld [vmem:[%s9180_s1 + $0x114] sm:$0xf0] }
   0xd   :  { %1277 = vmatpush.bf16.msra.mxu1 %v4414_v33  ;;  %1303 = vmatpush.bf16.msra.mxu3 %v4098_v38  ;;  %v4498_v52 = vor.u32 %v5821_v44, %v4495_v46  ;;  %v4333_v53 = vld [vmem:[%s9180_s1 + $0x370] sm:$0xf]  ;;  %v5786_v54 = vld [vmem:[%s9180_s1 + $0x394] sm:$0xf0]  ;;  %v5701_v55 = vld [vmem:[%s9180_s1 + $0xf4] sm:$0xf]  ;;  %v4014_v59 = vor.u32 %v5706_v50, %v4013_v49 }
   0xe   :  { %1294 = vmatpush.bf16.msra.mxu2 %v4574_v34  ;;  %v4015_v56 = vld [vmem:[%s9180_s1 + $0x118] sm:$0xf0]  ;;  %v5811_v57 = vld [vmem:[%s9180_s1 + $0x464] sm:$0xf]  ;;  %v4455_v58 = vld [vmem:[%s9180_s1 + $0x488] sm:$0xf0]  ;;  %v4334_v60 = vor.u32 %v5786_v54, %v4333_v53 }
   0xf   :  { %v3973_v61 = vld [vmem:[%s9180_s1 + $0xa0] sm:$0xf]  ;;  %v5696_v62 = vld [vmem:[%s9180_s1 + $0xc4] sm:$0xf0]  ;;  %v4018_v63 = vor.u32 %v5701_v55, %v4015_v56  ;;  %v4458_v0 = vor.u32 %v5811_v57, %v4455_v58  ;;  %v5691_v3 = vld [vmem:[%s9180_s1 + $0xa4] sm:$0xf] }
  0x10   :  { %1265 = vmatpush.bf16.msra.mxu0 %v4054_v45  ;;  %v4293_v1 = vld [vmem:[%s9180_s1 + $0x320] sm:$0xf]  ;;  %v5776_v2 = vld [vmem:[%s9180_s1 + $0x344] sm:$0xf0]  ;;  %v3975_v4 = vld [vmem:[%s9180_s1 + $0xc8] sm:$0xf0]  ;;  %v3974_v7 = vor.u32 %v5696_v62, %v3973_v61 }
  0x11   :  { %1278 = vmatpush.bf16.msra.mxu1 %v4374_v47  ;;  %1304 = vmatpush.bf16.msra.mxu3 %v4058_v51  ;;  %v5801_v5 = vld [vmem:[%s9180_s1 + $0x414] sm:$0xf]  ;;  %v4415_v6 = vld [vmem:[%s9180_s1 + $0x438] sm:$0xf0]  ;;  %v3933_v8 = vld [vmem:[%s9180_s1 + $0x50] sm:$0xf]  ;;  %v4294_v10 = vor.u32 %v5776_v2, %v4293_v1  ;;  %v3978_v14 = vor.u32 %v5691_v3, %v3975_v4 }
  0x12   :  { %1295 = vmatpush.bf16.msra.mxu2 %v4534_v48  ;;  %v5686_v9 = vld [vmem:[%s9180_s1 + $0x74] sm:$0xf0]  ;;  %v4253_v11 = vld [vmem:[%s9180_s1 + $0x2d0] sm:$0xf]  ;;  %v22_v13 = vld [vmem:[%s9179_s0] sm:$0x3f]  ;;  %v4418_v15 = vor.u32 %v5801_v5, %v4415_v6 }
  0x13   :  { %v5766_v12 = vld [vmem:[%s9180_s1 + $0x2f4] sm:$0xf0]  ;;  %v5681_v16 = vld [vmem:[%s9180_s1 + $0x54] sm:$0xf]  ;;  %v3935_v17 = vld [vmem:[%s9180_s1 + $0x78] sm:$0xf0]  ;;  %v3934_v21 = vor.u32 %v5686_v9, %v3933_v8 }
  0x14   :  { %1266 = vmatpush.bf16.msra.mxu0 %v4014_v59  ;;  %24 = vst [vmem:[#allocation1] ss:$4 sm:$0xff] %v22_v13  ;;  %v5791_v18 = vld [vmem:[%s9180_s1 + $0x3c4] sm:$0xf]  ;;  %v4375_v19 = vld [vmem:[%s9180_s1 + $0x3e8] sm:$0xf0]  ;;  %v4254_v25 = vor.u32 %v5766_v12, %v4253_v11  ;;  %v3938_v28 = vor.u32 %v5681_v16, %v3935_v17 }
  0x15   :  { %1279 = vmatpush.bf16.msra.mxu1 %v4334_v60  ;;  %1305 = vmatpush.bf16.msra.mxu3 %v4018_v63  ;;  %v3893_v20 = vld [vmem:[%s9180_s1] sm:$0xf]  ;;  %v5676_v22 = vld [vmem:[%s9180_s1 + $0x24] sm:$0xf0]  ;;  %v5671_v26 = vld [vmem:[%s9180_s1 + $0x4] sm:$0xf]  ;;  %v4378_v29 = vor.u32 %v5791_v18, %v4375_v19 }
  0x16   :  { %1314 = vmatpush.bf16.msrb.mxu2 %v4498_v52  ;;  %v4213_v23 = vld [vmem:[%s9180_s1 + $0x280] sm:$0xf]  ;;  %v5756_v24 = vld [vmem:[%s9180_s1 + $0x2a4] sm:$0xf0]  ;;  %v3895_v27 = vld [vmem:[%s9180_s1 + $0x28] sm:$0xf0]  ;;  %v3894_v36 = vor.u32 %v5676_v22, %v3893_v20 }
  0x17   :  { %v5781_v30 = vld [vmem:[%s9180_s1 + $0x374] sm:$0xf]  ;;  %v4655_v32 = vld [vmem:[%s9180_s1 + $0x618] sm:$0xf0]  ;;  %v4181_v34 = vld [vmem:[%s9180_s1 + $0x238] sm:$0xf]  ;;  %v4214_v40 = vor.u32 %v5756_v24, %v4213_v23  ;;  %v3898_v45 = vor.u32 %v5671_v26, %v3895_v27 }
  0x18   :  { %1267 = vmatpush.bf16.msra.mxu0 %v3974_v7  ;;  %v5861_v31 = vld [vmem:[%s9180_s1 + $0x5f4] sm:$0xf]  ;;  %v4335_v33 = vld [vmem:[%s9180_s1 + $0x398] sm:$0xf0]  ;;  %v5747_v35 = vld [vmem:[%s9180_s1 + $0x25c] sm:$0xf0] }
  0x19   :  { %1280 = vmatpush.bf16.msra.mxu1 %v4294_v10  ;;  %1306 = vmatpush.bf16.msra.mxu3 %v3978_v14  ;;  %v4501_v37 = vld [vmem:[%s9180_s1 + $0x4b8] sm:$0xf]  ;;  %v5827_v38 = vld [vmem:[%s9180_s1 + $0x4dc] sm:$0xf0]  ;;  %v5851_v39 = vld [vmem:[%s9180_s1 + $0x5a4] sm:$0xf]  ;;  %v4658_v42 = vor.u32 %v5861_v31, %v4655_v32  ;;  %v4338_v46 = vor.u32 %v5781_v30, %v4335_v33  ;;  %v4182_v49 = vor.u32 %v5747_v35, %v4181_v34 }
  0x1a   :  { %1315 = vmatpush.bf16.msrb.mxu2 %v4458_v0  ;;  %v4615_v48 = vld [vmem:[%s9180_s1 + $0x5c8] sm:$0xf0]  ;;  %v4502_v50 = vor.u32 %v5827_v38, %v4501_v37  ;;  %v5771_v51 = vld [vmem:[%s9180_s1 + $0x324] sm:$0xf]  ;;  %v4141_v53 = vld [vmem:[%s9180_s1 + $0x1e8] sm:$0xf] }
  0x1b   :  { %v27_v41 = vld.sshfl [vmem:[#allocation1 + $0x10] sm:$0xff pattern:$0x73625140]  ;;  %v25_v43 = vld.sshfl [vmem:[#allocation1] sm:$0xff pattern:$0x73625140]  ;;  %v4618_v59 = vor.u32 %v5851_v39, %v4615_v48 }
  0x1c   :  { %1268 = vmatpush.bf16.msra.mxu0 %v3934_v21  ;;  %v6433_v44 = vpack.c.bf16 %v27_v41, %v27_v41  ;;  %v26_v47 = vld.sshfl [vmem:[#allocation1 + $0x8] sm:$0xff pattern:$0x73625140]  ;;  %v6449_v54 = vpack.c.bf16 %v25_v43, %v25_v43  ;;  %v5737_v56 = vld [vmem:[%s9180_s1 + $0x20c] sm:$0xf0] }
  0x1d   :  { %1281 = vmatpush.bf16.msra.mxu1 %v4254_v25  ;;  %1307 = vmatpush.bf16.msra.mxu3 %v3938_v28  ;;  %v4295_v52 = vld [vmem:[%s9180_s1 + $0x348] sm:$0xf0]  ;;  %v6451_v55 = vpack.c.bf16 %v26_v47, %v26_v47  ;;  %v4461_v57 = vld [vmem:[%s9180_s1 + $0x468] sm:$0xf]  ;;  %v5817_v58 = vld [vmem:[%s9180_s1 + $0x48c] sm:$0xf0]  ;;  %v4142_v63 = vor.u32 %v5737_v56, %v4141_v53 }
  0x1e   :  { %1316 = vmatpush.bf16.msrb.mxu2 %v4418_v15  ;;  %v4298_v60 = vor.u32 %v5771_v51, %v4295_v52  ;;  %v5841_v61 = vld [vmem:[%s9180_s1 + $0x554] sm:$0xf]  ;;  %v4575_v62 = vld [vmem:[%s9180_s1 + $0x578] sm:$0xf0]  ;;  %v4462_v0 = vor.u32 %v5817_v58, %v4461_v57  ;;  %v4101_v3 = vld [vmem:[%s9180_s1 + $0x198] sm:$0xf] }
  0x1f   :  { %4691 = vmatmul.msk.bf16.vlgmr.msra.gmra.mxu2 %vm1258_vm0, %v6433_v44  ;;  %v5761_v1 = vld [vmem:[%s9180_s1 + $0x2d4] sm:$0xf]  ;;  %v4255_v2 = vld [vmem:[%s9180_s1 + $0x2f8] sm:$0xf0]  ;;  %v5727_v4 = vld [vmem:[%s9180_s1 + $0x1bc] sm:$0xf0]  ;;  %v4578_v7 = vor.u32 %v5841_v61, %v4575_v62 }
  0x20   :  { %1269 = vmatpush.bf16.msra.mxu0 %v3894_v36  ;;  %v4421_v5 = vld [vmem:[%s9180_s1 + $0x418] sm:$0xf]  ;;  %v5807_v6 = vld [vmem:[%s9180_s1 + $0x43c] sm:$0xf0]  ;;  %v5751_v8 = vld [vmem:[%s9180_s1 + $0x284] sm:$0xf]  ;;  %v4258_v9 = vor.u32 %v5761_v1, %v4255_v2  ;;  %v4102_v13 = vor.u32 %v5727_v4, %v4101_v3 }
  0x21   :  { %1282 = vmatpush.bf16.msra.mxu1 %v4214_v40  ;;  %1308 = vmatpush.bf16.msra.mxu3 %v3898_v45  ;;  %v4215_v10 = vld [vmem:[%s9180_s1 + $0x2a8] sm:$0xf0]  ;;  %v5831_v11 = vld [vmem:[%s9180_s1 + $0x504] sm:$0xf]  ;;  %v4422_v14 = vor.u32 %v5807_v6, %v4421_v5  ;;  %v4061_v15 = vld [vmem:[%s9180_s1 + $0x148] sm:$0xf] }
  0x22   :  { %1317 = vmatpush.bf16.msrb.mxu2 %v4378_v29  ;;  %v4535_v12 = vld [vmem:[%s9180_s1 + $0x528] sm:$0xf0]  ;;  %v4661_v16 = vld [vmem:[%s9180_s1 + $0x5f8] sm:$0xf]  ;;  %v5867_v17 = vld [vmem:[%s9180_s1 + $0x61c] sm:$0xf0]  ;;  %v4218_v24 = vor.u32 %v5751_v8, %v4215_v10 }
  0x23   :  { %1270 = vmatmul.bf16.vlgmr.msra.gmra.mxu0 %v6449_v54  ;;  %v5717_v18 = vld [vmem:[%s9180_s1 + $0x16c] sm:$0xf0]  ;;  %v4381_v19 = vld [vmem:[%s9180_s1 + $0x3c8] sm:$0xf]  ;;  %v4538_v21 = vor.u32 %v5831_v11, %v4535_v12  ;;  %v5742_v22 = vld [vmem:[%s9180_s1 + $0x23c] sm:$0xf]  ;;  %v4662_v25 = vor.u32 %v5867_v17, %v4661_v16 }
  0x24   :  { %1331 = vmatpush.bf16.msrb.mxu0 %v4658_v42  ;;  %1283 = vmatmul.bf16.vlgmr.msra.gmra.mxu1 %v6451_v55  ;;  %v5797_v20 = vld [vmem:[%s9180_s1 + $0x3ec] sm:$0xf0]  ;;  %v4183_v23 = vld [vmem:[%s9180_s1 + $0x260] sm:$0xf0]  ;;  %v4062_v26 = vor.u32 %v5717_v18, %v4061_v15  ;;  %v4021_v28 = vld [vmem:[%s9180_s1 + $0xf8] sm:$0xf] }
  0x25   :  { %1340 = vmatpush.bf16.msrb.mxu1 %v4182_v49  ;;  %1353 = vmatpush.bf16.msrb.mxu3 %v4502_v50  ;;  %v4382_v27 = vor.u32 %v5797_v20, %v4381_v19  ;;  %v4621_v29 = vld [vmem:[%s9180_s1 + $0x5a8] sm:$0xf]  ;;  %v5857_v30 = vld [vmem:[%s9180_s1 + $0x5cc] sm:$0xf0]  ;;  %v4186_v31 = vor.u32 %v5742_v22, %v4183_v23  ;;  %v5707_v32 = vld [vmem:[%s9180_s1 + $0x11c] sm:$0xf0] }
  0x26   :  { %1318 = vmatpush.bf16.msrb.mxu2 %v4338_v46  ;;  %1309 = vmatmul.bf16.vlgmr.msra.gmra.mxu3 %v6449_v54  ;;  %v4341_v33 = vld [vmem:[%s9180_s1 + $0x378] sm:$0xf]  ;;  %v5787_v34 = vld [vmem:[%s9180_s1 + $0x39c] sm:$0xf0]  ;;  %v5732_v35 = vld [vmem:[%s9180_s1 + $0x1ec] sm:$0xf]  ;;  %v4622_v37 = vor.u32 %v5857_v30, %v4621_v29  ;;  %v4022_v38 = vor.u32 %v5707_v32, %v4021_v28 }
  0x27   :  { %v4143_v36 = vld [vmem:[%s9180_s1 + $0x210] sm:$0xf0]  ;;  %v4342_v39 = vor.u32 %v5787_v34, %v4341_v33  ;;  %v3981_v40 = vld [vmem:[%s9180_s1 + $0xa8] sm:$0xf]  ;;  %v4581_v41 = vld [vmem:[%s9180_s1 + $0x558] sm:$0xf] }
  0x28   :  { %1332 = vmatpush.bf16.msrb.mxu0 %v4618_v59  ;;  %v5847_v42 = vld [vmem:[%s9180_s1 + $0x57c] sm:$0xf0]  ;;  %v4146_v43 = vor.u32 %v5732_v35, %v4143_v36  ;;  %v5697_v45 = vld [vmem:[%s9180_s1 + $0xcc] sm:$0xf0]  ;;  %v4301_v46 = vld [vmem:[%s9180_s1 + $0x328] sm:$0xf] }
  0x29   :  { %1341 = vmatpush.bf16.msrb.mxu1 %v4142_v63  ;;  %1354 = vmatpush.bf16.msrb.mxu3 %v4462_v0  ;;  %v5777_v47 = vld [vmem:[%s9180_s1 + $0x34c] sm:$0xf0]  ;;  %v5722_v48 = vld [vmem:[%s9180_s1 + $0x19c] sm:$0xf]  ;;  %v4103_v49 = vld [vmem:[%s9180_s1 + $0x1c0] sm:$0xf0]  ;;  %v4582_v50 = vor.u32 %v5847_v42, %v4581_v41  ;;  %v3982_v52 = vor.u32 %v5697_v45, %v3981_v40 }
  0x2a   :  { %1319 = vmatpush.bf16.msrb.mxu2 %v4298_v60  ;;  %v3941_v51 = vld [vmem:[%s9180_s1 + $0x58] sm:$0xf]  ;;  %v4302_v53 = vor.u32 %v5777_v47, %v4301_v46  ;;  %v5687_v56 = vld [vmem:[%s9180_s1 + $0x7c] sm:$0xf0]  ;;  %v4541_v57 = vld [vmem:[%s9180_s1 + $0x508] sm:$0xf]  ;;  %v4106_v59 = vor.u32 %v5722_v48, %v4103_v49 }
  0x2b   :  { %v5837_v58 = vld [vmem:[%s9180_s1 + $0x52c] sm:$0xf0]  ;;  %v4261_v60 = vld [vmem:[%s9180_s1 + $0x2d8] sm:$0xf]  ;;  %v5767_v61 = vld [vmem:[%s9180_s1 + $0x2fc] sm:$0xf0]  ;;  %v3942_v3 = vor.u32 %v5687_v56, %v3941_v51 }
  0x2c   :  { %1333 = vmatpush.bf16.msrb.mxu0 %v4578_v7  ;;  %v5712_v62 = vld [vmem:[%s9180_s1 + $0x14c] sm:$0xf]  ;;  %v4063_v63 = vld [vmem:[%s9180_s1 + $0x170] sm:$0xf0]  ;;  %v5822_v0 = vld [vmem:[%s9180_s1 + $0x4bc] sm:$0xf]  ;;  %v4542_v2 = vor.u32 %v5837_v58, %v4541_v57  ;;  %v4262_v4 = vor.u32 %v5767_v61, %v4261_v60 }
  0x2d   :  { %1342 = vmatpush.bf16.msrb.mxu1 %v4102_v13  ;;  %1355 = vmatpush.bf16.msrb.mxu3 %v4422_v14  ;;  %v4503_v1 = vld [vmem:[%s9180_s1 + $0x4e0] sm:$0xf0]  ;;  %v3901_v5 = vld [vmem:[%s9180_s1 + $0x8] sm:$0xf]  ;;  %v5677_v6 = vld [vmem:[%s9180_s1 + $0x2c] sm:$0xf0]  ;;  %v4066_v8 = vor.u32 %v5712_v62, %v4063_v63 }
  0x2e   :  { %1320 = vmatpush.bf16.msrb.mxu2 %v4258_v9  ;;  %v4221_v7 = vld [vmem:[%s9180_s1 + $0x288] sm:$0xf]  ;;  %v4506_v9 = vor.u32 %v5822_v0, %v4503_v1  ;;  %v5757_v10 = vld [vmem:[%s9180_s1 + $0x2ac] sm:$0xf0]  ;;  %v5702_v11 = vld [vmem:[%s9180_s1 + $0xfc] sm:$0xf]  ;;  %v3902_v19 = vor.u32 %v5677_v6, %v3901_v5 }
  0x2f   :  { %v4023_v12 = vld [vmem:[%s9180_s1 + $0x120] sm:$0xf0]  ;;  %v5862_v13 = vld [vmem:[%s9180_s1 + $0x5fc] sm:$0xf]  ;;  %v4189_v15 = vld [vmem:[%s9180_s1 + $0x240] sm:$0xf]  ;;  %v4222_v20 = vor.u32 %v5757_v10, %v4221_v7 }
  0x30   :  { %1334 = vmatpush.bf16.msrb.mxu0 %v4538_v21  ;;  %v4663_v14 = vld [vmem:[%s9180_s1 + $0x620] sm:$0xf0]  ;;  %v5748_v16 = vld [vmem:[%s9180_s1 + $0x264] sm:$0xf0]  ;;  %v5812_v17 = vld [vmem:[%s9180_s1 + $0x46c] sm:$0xf]  ;;  %v4026_v21 = vor.u32 %v5702_v11, %v4023_v12 }
  0x31   :  { %1343 = vmatpush.bf16.msrb.mxu1 %v4062_v26  ;;  %1356 = vmatpush.bf16.msrb.mxu3 %v4382_v27  ;;  %v4463_v18 = vld [vmem:[%s9180_s1 + $0x490] sm:$0xf0]  ;;  %v4666_v22 = vor.u32 %v5862_v13, %v4663_v14  ;;  %v5692_v23 = vld [vmem:[%s9180_s1 + $0xac] sm:$0xf]  ;;  %v4149_v29 = vld [vmem:[%s9180_s1 + $0x1f0] sm:$0xf] }
  0x32   :  { %1321 = vmatpush.bf16.msrb.mxu2 %v4218_v24  ;;  %v3983_v24 = vld [vmem:[%s9180_s1 + $0xd0] sm:$0xf0]  ;;  %v4466_v26 = vor.u32 %v5812_v17, %v4463_v18  ;;  %v5852_v27 = vld [vmem:[%s9180_s1 + $0x5ac] sm:$0xf]  ;;  %v5738_v30 = vld [vmem:[%s9180_s1 + $0x214] sm:$0xf0] }
  0x33   :  { %4692 = vmatmul.msk.bf16.vlgmr.msrb.gmra.mxu0 %vm1258_vm0, %v6433_v44  ;;  %v4623_v28 = vld [vmem:[%s9180_s1 + $0x5d0] sm:$0xf0]  ;;  %v4423_v32 = vld [vmem:[%s9180_s1 + $0x440] sm:$0xf0]  ;;  %v3986_v33 = vor.u32 %v5692_v23, %v3983_v24  ;;  %v5682_v35 = vld [vmem:[%s9180_s1 + $0x5c] sm:$0xf] }
  0x34   :  { %1370 = vmatpush.bf16.msra.mxu0 %v4662_v25  ;;  %v4190_v25 = vor.u32 %v5748_v16, %v4189_v15  ;;  %v4626_v34 = vor.u32 %v5852_v27, %v4623_v28  ;;  %v3943_v36 = vld [vmem:[%s9180_s1 + $0x80] sm:$0xf0]  ;;  %v4109_v41 = vld [vmem:[%s9180_s1 + $0x1a0] sm:$0xf]  ;;  %v5728_v42 = vld [vmem:[%s9180_s1 + $0x1c4] sm:$0xf0] }
  0x35   :  { %1322 = vmatmul.bf16.vlgmr.msrb.gmra.mxu2 %v6451_v55  ;;  %1344 = vmatpush.bf16.msrb.mxu1 %v4022_v38  ;;  %v4583_v40 = vld [vmem:[%s9180_s1 + $0x580] sm:$0xf0]  ;;  %v4383_v45 = vld [vmem:[%s9180_s1 + $0x3f0] sm:$0xf0]  ;;  %v3946_v46 = vor.u32 %v5682_v35, %v3943_v36  ;;  %v5672_v48 = vld [vmem:[%s9180_s1 + $0xc] sm:$0xf]  ;;  %v4110_v51 = vor.u32 %v5728_v42, %v4109_v41 }
  0x36   :  { %1379 = vmatpush.bf16.msra.mxu2 %v4186_v31  ;;  %1357 = vmatpush.bf16.msrb.mxu3 %v4342_v39  ;;  %v5802_v31 = vld [vmem:[%s9180_s1 + $0x41c] sm:$0xf]  ;;  %v3903_v49 = vld [vmem:[%s9180_s1 + $0x30] sm:$0xf0]  ;;  %v4069_v56 = vld [vmem:[%s9180_s1 + $0x150] sm:$0xf] }
  0x37   :  { %v4426_v38 = vor.u32 %v5802_v31, %v4423_v32  ;;  %v5842_v39 = vld [vmem:[%s9180_s1 + $0x55c] sm:$0xf]  ;;  %v5718_v57 = vld [vmem:[%s9180_s1 + $0x174] sm:$0xf0]  ;;  %v4509_v60 = vld [vmem:[%s9180_s1 + $0x4c0] sm:$0xf]  ;;  %v3906_v0 = vor.u32 %v5672_v48, %v3903_v49 }
  0x38   :  { %1371 = vmatpush.bf16.msra.mxu0 %v4622_v37  ;;  %v4150_v37 = vor.u32 %v5738_v30, %v4149_v29  ;;  %v4586_v47 = vor.u32 %v5842_v39, %v4583_v40  ;;  %v5782_v58 = vld [vmem:[%s9180_s1 + $0x37c] sm:$0xf]  ;;  %v5828_v61 = vld [vmem:[%s9180_s1 + $0x4e4] sm:$0xf0]  ;;  %v4669_v62 = vld [vmem:[%s9180_s1 + $0x600] sm:$0xf] }
  0x39   :  { %1345 = vmatpush.bf16.msrb.mxu1 %v3982_v52  ;;  %v5868_v63 = vld [vmem:[%s9180_s1 + $0x624] sm:$0xf0]  ;;  %v4510_v6 = vor.u32 %v5828_v61, %v4509_v60  ;;  %v4469_v10 = vld [vmem:[%s9180_s1 + $0x470] sm:$0xf]  ;;  %v5818_v11 = vld [vmem:[%s9180_s1 + $0x494] sm:$0xf0] }
  0x3a   :  { %1380 = vmatpush.bf16.msra.mxu2 %v4146_v43  ;;  %1358 = vmatpush.bf16.msrb.mxu3 %v4302_v53  ;;  %v5792_v43 = vld [vmem:[%s9180_s1 + $0x3cc] sm:$0xf]  ;;  %v4543_v53 = vld [vmem:[%s9180_s1 + $0x530] sm:$0xf0]  ;;  %v5708_v5 = vld [vmem:[%s9180_s1 + $0x124] sm:$0xf0]  ;;  %v4670_v7 = vor.u32 %v5868_v63, %v4669_v62  ;;  %v4470_v18 = vor.u32 %v5818_v11, %v4469_v10 }
  0x3b   :  { %v4386_v52 = vor.u32 %v5792_v43, %v4383_v45  ;;  %v4629_v12 = vld [vmem:[%s9180_s1 + $0x5b0] sm:$0xf]  ;;  %v5858_v13 = vld [vmem:[%s9180_s1 + $0x5d4] sm:$0xf0]  ;;  %v5808_v23 = vld [vmem:[%s9180_s1 + $0x444] sm:$0xf0] }
  0x3c   :  { %1372 = vmatpush.bf16.msra.mxu0 %v4582_v50  ;;  %v5832_v50 = vld [vmem:[%s9180_s1 + $0x50c] sm:$0xf]  ;;  %v3989_v16 = vld [vmem:[%s9180_s1 + $0xb0] sm:$0xf]  ;;  %v5698_v17 = vld [vmem:[%s9180_s1 + $0xd4] sm:$0xf0] }
  0x3d   :  { %1346 = vmatpush.bf16.msrb.mxu1 %v3942_v3  ;;  %v4546_v1 = vor.u32 %v5832_v50, %v4543_v53  ;;  %v4589_v24 = vld [vmem:[%s9180_s1 + $0x560] sm:$0xf]  ;;  %v5688_v29 = vld [vmem:[%s9180_s1 + $0x84] sm:$0xf0]  ;;  %v5752_v30 = vld [vmem:[%s9180_s1 + $0x28c] sm:$0xf] }
  0x3e   :  { %1381 = vmatpush.bf16.msra.mxu2 %v4106_v59  ;;  %1359 = vmatpush.bf16.msrb.mxu3 %v4262_v4  ;;  %v4343_v59 = vld [vmem:[%s9180_s1 + $0x3a0] sm:$0xf0]  ;;  %v4029_v4 = vld [vmem:[%s9180_s1 + $0x100] sm:$0xf]  ;;  %v5798_v35 = vld [vmem:[%s9180_s1 + $0x3f4] sm:$0xf0] }
  0x3f   :  { %v4346_v3 = vor.u32 %v5782_v58, %v4343_v59  ;;  %v4030_v14 = vor.u32 %v5708_v5, %v4029_v4  ;;  %v3949_v28 = vld [vmem:[%s9180_s1 + $0x60] sm:$0xf]  ;;  %v4549_v36 = vld [vmem:[%s9180_s1 + $0x510] sm:$0xf]  ;;  %v4191_v39 = vld [vmem:[%s9180_s1 + $0x268] sm:$0xf0] }
  0x40   :  { %1373 = vmatpush.bf16.msra.mxu0 %v4542_v2  ;;  %v4070_v2 = vor.u32 %v5718_v57, %v4069_v56  ;;  %v5823_v40 = vld [vmem:[%s9180_s1 + $0x4c4] sm:$0xf]  ;;  %v4511_v41 = vld [vmem:[%s9180_s1 + $0x4e8] sm:$0xf0]  ;;  %v3950_v42 = vor.u32 %v5688_v29, %v3949_v28  ;;  %v3909_v45 = vld [vmem:[%s9180_s1 + $0x10] sm:$0xf] }
  0x41   :  { %1347 = vmatpush.bf16.msrb.mxu1 %v3902_v19  ;;  %v4630_v19 = vor.u32 %v5858_v13, %v4629_v12  ;;  %v5678_v48 = vld [vmem:[%s9180_s1 + $0x34] sm:$0xf0]  ;;  %v4349_v49 = vld [vmem:[%s9180_s1 + $0x380] sm:$0xf]  ;;  %v5788_v50 = vld [vmem:[%s9180_s1 + $0x3a4] sm:$0xf0] }
  0x42   :  { %1382 = vmatpush.bf16.msra.mxu2 %v4066_v8  ;;  %1360 = vmatpush.bf16.msrb.mxu3 %v4222_v20  ;;  %v5772_v8 = vld [vmem:[%s9180_s1 + $0x32c] sm:$0xf]  ;;  %v5762_v20 = vld [vmem:[%s9180_s1 + $0x2dc] sm:$0xf]  ;;  %v5863_v53 = vld [vmem:[%s9180_s1 + $0x604] sm:$0xf]  ;;  %v3910_v61 = vor.u32 %v5678_v48, %v3909_v45  ;;  %v4350_v62 = vor.u32 %v5788_v50, %v4349_v49 }
  0x43   :  { %4693 = vmatmul.msk.bf16.vlgmr.msra.gmra.mxu0 %vm1258_vm0, %v6433_v44  ;;  %v4671_v56 = vld [vmem:[%s9180_s1 + $0x628] sm:$0xf0]  ;;  %v5733_v57 = vld [vmem:[%s9180_s1 + $0x1f4] sm:$0xf]  ;;  %v4151_v58 = vld [vmem:[%s9180_s1 + $0x218] sm:$0xf0] }
  0x44   :  { %1392 = vmatpush.bf16.msrb.mxu0 %v4506_v9  ;;  %1348 = vmatmul.bf16.vlgmr.msrb.gmra.mxu1 %v6449_v54  ;;  %v4303_v9 = vld [vmem:[%s9180_s1 + $0x350] sm:$0xf0]  ;;  %v4471_v60 = vld [vmem:[%s9180_s1 + $0x498] sm:$0xf0]  ;;  %v4674_v63 = vor.u32 %v5863_v53, %v4671_v56  ;;  %v4269_v12 = vld [vmem:[%s9180_s1 + $0x2e0] sm:$0xf] }
  0x45   :  { %1409 = vmatpush.bf16.msra.mxu1 %v4666_v22  ;;  %1361 = vmatmul.bf16.vlgmr.msrb.gmra.mxu3 %v6451_v55  ;;  %v4306_v15 = vor.u32 %v5772_v8, %v4303_v9  ;;  %v4429_v22 = vld [vmem:[%s9180_s1 + $0x420] sm:$0xf]  ;;  %v5813_v59 = vld [vmem:[%s9180_s1 + $0x474] sm:$0xf]  ;;  %v4631_v5 = vld [vmem:[%s9180_s1 + $0x5d8] sm:$0xf0] }
  0x46   :  { %1383 = vmatpush.bf16.msra.mxu2 %v4026_v21  ;;  %1418 = vmatpush.bf16.msra.mxu3 %v4190_v25  ;;  %v4263_v21 = vld [vmem:[%s9180_s1 + $0x300] sm:$0xf0]  ;;  %v5848_v25 = vld [vmem:[%s9180_s1 + $0x584] sm:$0xf0]  ;;  %v4430_v31 = vor.u32 %v5808_v23, %v4429_v22  ;;  %v5853_v4 = vld [vmem:[%s9180_s1 + $0x5b4] sm:$0xf] }
  0x47   :  { %v4266_v27 = vor.u32 %v5762_v20, %v4263_v21  ;;  %v4590_v32 = vor.u32 %v5848_v25, %v4589_v24  ;;  %v5803_v8 = vld [vmem:[%s9180_s1 + $0x424] sm:$0xf]  ;;  %v4431_v9 = vld [vmem:[%s9180_s1 + $0x448] sm:$0xf0]  ;;  %v4634_v11 = vor.u32 %v5853_v4, %v4631_v5  ;;  %v5768_v13 = vld [vmem:[%s9180_s1 + $0x304] sm:$0xf0] }
  0x48   :  { %1393 = vmatpush.bf16.msrb.mxu0 %v4466_v26  ;;  %v3990_v26 = vor.u32 %v5698_v17, %v3989_v16  ;;  %v4434_v16 = vor.u32 %v5803_v8, %v4431_v9  ;;  %v4591_v17 = vld [vmem:[%s9180_s1 + $0x588] sm:$0xf0] }
  0x49   :  { %1410 = vmatpush.bf16.msra.mxu1 %v4626_v34  ;;  %v4389_v34 = vld [vmem:[%s9180_s1 + $0x3d0] sm:$0xf] }
  0x4a   :  { %1384 = vmatpush.bf16.msra.mxu2 %v3986_v33  ;;  %1419 = vmatpush.bf16.msra.mxu3 %v4150_v37  ;;  %v4223_v33 = vld [vmem:[%s9180_s1 + $0x2b0] sm:$0xf0]  ;;  %v5838_v37 = vld [vmem:[%s9180_s1 + $0x534] sm:$0xf0] }
  0x4b   :  { %v4226_v43 = vor.u32 %v5752_v30, %v4223_v33 }
  0x4c   :  { %1394 = vmatpush.bf16.msrb.mxu0 %v4426_v38  ;;  %v5743_v38 = vld [vmem:[%s9180_s1 + $0x244] sm:$0xf] }
  0x4d   :  { %1411 = vmatpush.bf16.msra.mxu1 %v4586_v47  ;;  %v4550_v47 = vor.u32 %v5838_v37, %v4549_v36 }
  0x4e   :  { %1385 = vmatpush.bf16.msra.mxu2 %v3946_v46  ;;  %1420 = vmatpush.bf16.msra.mxu3 %v4110_v51  ;;  %v4390_v46 = vor.u32 %v5798_v35, %v4389_v34  ;;  %v4194_v51 = vor.u32 %v5743_v38, %v4191_v39 }
  0x50   :  { %1395 = vmatpush.bf16.msrb.mxu0 %v4386_v52  ;;  %v4514_v52 = vor.u32 %v5823_v40, %v4511_v41 }
  0x51   :  { %1412 = vmatpush.bf16.msra.mxu1 %v4546_v1  ;;  %v5778_v1 = vld [vmem:[%s9180_s1 + $0x354] sm:$0xf0] }
  0x52   :  { %1386 = vmatpush.bf16.msra.mxu2 %v3906_v0  ;;  %1421 = vmatpush.bf16.msra.mxu3 %v4070_v2  ;;  %v4309_v0 = vld [vmem:[%s9180_s1 + $0x330] sm:$0xf]  ;;  %v4154_v2 = vor.u32 %v5733_v57, %v4151_v58 }
  0x53   :  { %v4310_v10 = vor.u32 %v5778_v1, %v4309_v0 }
  0x54   :  { %1396 = vmatpush.bf16.msrb.mxu0 %v4346_v3  ;;  %4694 = vmatmul.msk.bf16.vlgmr.msra.gmra.mxu1 %vm1258_vm0, %v6433_v44  ;;  %v4474_v3 = vor.u32 %v5813_v59, %v4471_v60 }
  0x55   :  { %1431 = vmatpush.bf16.msrb.mxu1 %v4510_v6  ;;  %1387 = vmatmul.bf16.vlgmr.msra.gmra.mxu2 %v6449_v54  ;;  %v5723_v6 = vld [vmem:[%s9180_s1 + $0x1a4] sm:$0xf] }
  0x56   :  { %1448 = vmatpush.bf16.msrb.mxu2 %v4670_v7  ;;  %1422 = vmatpush.bf16.msra.mxu3 %v4030_v14  ;;  %v4111_v7 = vld [vmem:[%s9180_s1 + $0x1c8] sm:$0xf0]  ;;  %v5843_v14 = vld [vmem:[%s9180_s1 + $0x564] sm:$0xf] }
  0x58   :  { %1397 = vmatpush.bf16.msrb.mxu0 %v4306_v15  ;;  %v4114_v15 = vor.u32 %v5723_v6, %v4111_v7 }
  0x59   :  { %1432 = vmatpush.bf16.msrb.mxu1 %v4470_v18  ;;  %v5713_v18 = vld [vmem:[%s9180_s1 + $0x154] sm:$0xf] }
  0x5a   :  { %1449 = vmatpush.bf16.msrb.mxu2 %v4630_v19  ;;  %1423 = vmatpush.bf16.msra.mxu3 %v3990_v26 }
  0x5c   :  { %1398 = vmatpush.bf16.msrb.mxu0 %v4266_v27 }
  0x5d   :  { %1433 = vmatpush.bf16.msrb.mxu1 %v4430_v31 }
  0x5e   :  { %1450 = vmatpush.bf16.msrb.mxu2 %v4590_v32  ;;  %1424 = vmatpush.bf16.msra.mxu3 %v3950_v42 }
  0x60   :  { %1399 = vmatpush.bf16.msrb.mxu0 %v4226_v43 }
  0x61   :  { %1434 = vmatpush.bf16.msrb.mxu1 %v4390_v46 }
  0x62   :  { %1451 = vmatpush.bf16.msrb.mxu2 %v4550_v47  ;;  %1425 = vmatpush.bf16.msra.mxu3 %v3910_v61 }
  0x63   :  { %1400 = vmatmul.bf16.vlgmr.msrb.gmra.mxu0 %v6451_v55 }
  0x64   :  { %1457 = vmatpush.bf16.msra.mxu0 %v4194_v51 }
  0x65   :  { %1435 = vmatpush.bf16.msrb.mxu1 %v4350_v62 }
  0x66   :  { %1470 = vmatpush.bf16.msra.mxu2 %v4514_v52  ;;  %1487 = vmatpush.bf16.msrb.mxu3 %v4674_v63 }
  0x68   :  { %1458 = vmatpush.bf16.msra.mxu0 %v4154_v2 }
  0x6a   :  { %1471 = vmatpush.bf16.msra.mxu2 %v4474_v3 }
  0x6b   :  { %10 = vsyncpa [#allocation3], 0  ;;  %1426 = vmatmul.bf16.vlgmr.msra.gmra.mxu3 %v6449_v54  ;;  %v4071_v19 = vld [vmem:[%s9180_s1 + $0x178] sm:$0xf0]  ;;  %v5793_v20 = vld [vmem:[%s9180_s1 + $0x3d4] sm:$0xf]  ;;  %4695 = vmatmul.msk.bf16.vlgmr.msrb.gmra.mxu2 %vm1258_vm0, %v6433_v44  ;;  %v4270_v22 = vor.u32 %v5768_v13, %v4269_v12  ;;  %v4594_v23 = vor.u32 %v5843_v14, %v4591_v17 }
  0x6c   :  { %v4391_v21 = vld [vmem:[%s9180_s1 + $0x3f8] sm:$0xf0]  ;;  %1436 = vmatpush.bf16.msrb.mxu1 %v4310_v10  ;;  %1488 = vmatpush.bf16.msrb.mxu3 %v4634_v11  ;;  %v4229_v24 = vld [vmem:[%s9180_s1 + $0x290] sm:$0xf]  ;;  %v5758_v25 = vld [vmem:[%s9180_s1 + $0x2b4] sm:$0xf0]  ;;  %v4074_v27 = vor.u32 %v5713_v18, %v4071_v19 }
  0x6d   :  { %v5833_v26 = vld [vmem:[%s9180_s1 + $0x514] sm:$0xf]  ;;  %1459 = vmatpush.bf16.msra.mxu0 %v4114_v15  ;;  %v4394_v28 = vor.u32 %v5793_v20, %v4391_v21  ;;  %v4551_v29 = vld [vmem:[%s9180_s1 + $0x538] sm:$0xf0]  ;;  %v5703_v30 = vld [vmem:[%s9180_s1 + $0x104] sm:$0xf]  ;;  %v4230_v38 = vor.u32 %v5758_v25, %v4229_v24 }
  0x6e   :  { %1472 = vmatpush.bf16.msra.mxu2 %v4434_v16  ;;  %v4031_v31 = vld [vmem:[%s9180_s1 + $0x128] sm:$0xf0]  ;;  %v5783_v32 = vld [vmem:[%s9180_s1 + $0x384] sm:$0xf]  ;;  %v4197_v34 = vld [vmem:[%s9180_s1 + $0x248] sm:$0xf]  ;;  %v4554_v39 = vor.u32 %v5833_v26, %v4551_v29 }
  0x6f   :  { %v4351_v33 = vld [vmem:[%s9180_s1 + $0x3a8] sm:$0xf0]  ;;  %v5749_v35 = vld [vmem:[%s9180_s1 + $0x26c] sm:$0xf0]  ;;  %v4517_v36 = vld [vmem:[%s9180_s1 + $0x4c8] sm:$0xf]  ;;  %v4034_v40 = vor.u32 %v5703_v30, %v4031_v31 }
  0x70   :  { %v5829_v37 = vld [vmem:[%s9180_s1 + $0x4ec] sm:$0xf0]  ;;  %1437 = vmatpush.bf16.msrb.mxu1 %v4270_v22  ;;  %1489 = vmatpush.bf16.msrb.mxu3 %v4594_v23  ;;  %v4354_v41 = vor.u32 %v5783_v32, %v4351_v33  ;;  %v5693_v42 = vld [vmem:[%s9180_s1 + $0xb4] sm:$0xf]  ;;  %v3991_v43 = vld [vmem:[%s9180_s1 + $0xd8] sm:$0xf0]  ;;  %v4198_v45 = vor.u32 %v5749_v35, %v4197_v34 }
  0x71   :  { %1460 = vmatpush.bf16.msra.mxu0 %v4074_v27  ;;  %v4518_v46 = vor.u32 %v5829_v37, %v4517_v36  ;;  %v5773_v47 = vld [vmem:[%s9180_s1 + $0x334] sm:$0xf]  ;;  %v4311_v48 = vld [vmem:[%s9180_s1 + $0x358] sm:$0xf0]  ;;  %v4157_v49 = vld [vmem:[%s9180_s1 + $0x1f8] sm:$0xf]  ;;  %v3994_v53 = vor.u32 %v5693_v42, %v3991_v43 }
  0x72   :  { %1473 = vmatpush.bf16.msra.mxu2 %v4394_v28  ;;  %v5739_v50 = vld [vmem:[%s9180_s1 + $0x21c] sm:$0xf0]  ;;  %v4477_v51 = vld [vmem:[%s9180_s1 + $0x478] sm:$0xf]  ;;  %v4314_v56 = vor.u32 %v5773_v47, %v4311_v48  ;;  %v5683_v57 = vld [vmem:[%s9180_s1 + $0x64] sm:$0xf] }
  0x73   :  { %v5819_v52 = vld [vmem:[%s9180_s1 + $0x49c] sm:$0xf0]  ;;  %v3951_v58 = vld [vmem:[%s9180_s1 + $0x88] sm:$0xf0]  ;;  %v4158_v59 = vor.u32 %v5739_v50, %v4157_v49  ;;  %v5763_v61 = vld [vmem:[%s9180_s1 + $0x2e4] sm:$0xf] }
  0x74   :  { %1438 = vmatpush.bf16.msrb.mxu1 %v4230_v38  ;;  %1490 = vmatpush.bf16.msrb.mxu3 %v4554_v39  ;;  %v4478_v60 = vor.u32 %v5819_v52, %v4477_v51  ;;  %v4271_v62 = vld [vmem:[%s9180_s1 + $0x308] sm:$0xf0]  ;;  %v4117_v63 = vld [vmem:[%s9180_s1 + $0x1a8] sm:$0xf]  ;;  %v5729_v0 = vld [vmem:[%s9180_s1 + $0x1cc] sm:$0xf0]  ;;  %v3954_v3 = vor.u32 %v5683_v57, %v3951_v58 }
  0x75   :  { %1461 = vmatpush.bf16.msra.mxu0 %v4034_v40  ;;  %v4437_v1 = vld [vmem:[%s9180_s1 + $0x428] sm:$0xf]  ;;  %v5809_v2 = vld [vmem:[%s9180_s1 + $0x44c] sm:$0xf0]  ;;  %v4274_v4 = vor.u32 %v5763_v61, %v4271_v62  ;;  %v5673_v5 = vld [vmem:[%s9180_s1 + $0x14] sm:$0xf]  ;;  %v4118_v8 = vor.u32 %v5729_v0, %v4117_v63 }
  0x76   :  { %1474 = vmatpush.bf16.msra.mxu2 %v4354_v41  ;;  %v3911_v6 = vld [vmem:[%s9180_s1 + $0x38] sm:$0xf0]  ;;  %v5753_v7 = vld [vmem:[%s9180_s1 + $0x294] sm:$0xf]  ;;  %v4438_v9 = vor.u32 %v5809_v2, %v4437_v1  ;;  %v4077_v11 = vld [vmem:[%s9180_s1 + $0x158] sm:$0xf] }
  0x77   :  { %1439 = vmatmul.bf16.vlgmr.msrb.gmra.mxu1 %v6451_v55  ;;  %v4231_v10 = vld [vmem:[%s9180_s1 + $0x2b8] sm:$0xf0]  ;;  %v5719_v12 = vld [vmem:[%s9180_s1 + $0x17c] sm:$0xf0]  ;;  %v4397_v13 = vld [vmem:[%s9180_s1 + $0x3d8] sm:$0xf]  ;;  %v3914_v19 = vor.u32 %v5673_v5, %v3911_v6 }
  0x78   :  { %1496 = vmatpush.bf16.msra.mxu1 %v4198_v45  ;;  %1509 = vmatpush.bf16.msra.mxu3 %v4518_v46  ;;  %v5799_v14 = vld [vmem:[%s9180_s1 + $0x3fc] sm:$0xf0]  ;;  %v4677_v15 = vld [vmem:[%s9180_s1 + $0x608] sm:$0xf]  ;;  %v5869_v16 = vld [vmem:[%s9180_s1 + $0x62c] sm:$0xf0]  ;;  %v4234_v20 = vor.u32 %v5753_v7, %v4231_v10  ;;  %v4078_v21 = vor.u32 %v5719_v12, %v4077_v11 }
  0x79   :  { %1462 = vmatpush.bf16.msra.mxu0 %v3994_v53  ;;  %v5744_v17 = vld [vmem:[%s9180_s1 + $0x24c] sm:$0xf]  ;;  %v4199_v18 = vld [vmem:[%s9180_s1 + $0x270] sm:$0xf0]  ;;  %v4398_v22 = vor.u32 %v5799_v14, %v4397_v13  ;;  %v4037_v23 = vld [vmem:[%s9180_s1 + $0x108] sm:$0xf]  ;;  %v4678_v25 = vor.u32 %v5869_v16, %v4677_v15 }
  0x7a   :  { %1475 = vmatpush.bf16.msra.mxu2 %v4314_v56  ;;  %v5709_v24 = vld [vmem:[%s9180_s1 + $0x12c] sm:$0xf0]  ;;  %v4202_v26 = vor.u32 %v5744_v17, %v4199_v18  ;;  %v4357_v27 = vld [vmem:[%s9180_s1 + $0x388] sm:$0xf]  ;;  %v4637_v29 = vld [vmem:[%s9180_s1 + $0x5b8] sm:$0xf] }
  0x7b   :  { %4696 = vmatmul.msk.bf16.vlgmr.msrb.gmra.mxu3 %vm1258_vm0, %v6433_v44  ;;  %v5789_v28 = vld [vmem:[%s9180_s1 + $0x3ac] sm:$0xf0]  ;;  %v5859_v30 = vld [vmem:[%s9180_s1 + $0x5dc] sm:$0xf0]  ;;  %v5734_v31 = vld [vmem:[%s9180_s1 + $0x1fc] sm:$0xf]  ;;  %v4038_v33 = vor.u32 %v5709_v24, %v4037_v23 }
  0x7c   :  { %1497 = vmatpush.bf16.msra.mxu1 %v4158_v59  ;;  %1510 = vmatpush.bf16.msra.mxu3 %v4478_v60  ;;  %v4159_v32 = vld [vmem:[%s9180_s1 + $0x220] sm:$0xf0]  ;;  %v4358_v34 = vor.u32 %v5789_v28, %v4357_v27  ;;  %v3997_v35 = vld [vmem:[%s9180_s1 + $0xb8] sm:$0xf]  ;;  %v5699_v36 = vld [vmem:[%s9180_s1 + $0xdc] sm:$0xf0]  ;;  %v4638_v37 = vor.u32 %v5859_v30, %v4637_v29 }
  0x7d   :  { %1463 = vmatpush.bf16.msra.mxu0 %v3954_v3  ;;  %v4162_v38 = vor.u32 %v5734_v31, %v4159_v32  ;;  %v4317_v39 = vld [vmem:[%s9180_s1 + $0x338] sm:$0xf]  ;;  %v5779_v40 = vld [vmem:[%s9180_s1 + $0x35c] sm:$0xf0]  ;;  %v4597_v41 = vld [vmem:[%s9180_s1 + $0x568] sm:$0xf]  ;;  %v3998_v46 = vor.u32 %v5699_v36, %v3997_v35 }
  0x7e   :  { %1476 = vmatpush.bf16.msra.mxu2 %v4274_v4  ;;  %v5849_v42 = vld [vmem:[%s9180_s1 + $0x58c] sm:$0xf0]  ;;  %v5724_v43 = vld [vmem:[%s9180_s1 + $0x1ac] sm:$0xf]  ;;  %v4119_v45 = vld [vmem:[%s9180_s1 + $0x1d0] sm:$0xf0]  ;;  %v4318_v47 = vor.u32 %v5779_v40, %v4317_v39 }
  0x7f   :  { %v3957_v48 = vld [vmem:[%s9180_s1 + $0x68] sm:$0xf]  ;;  %v5689_v49 = vld [vmem:[%s9180_s1 + $0x8c] sm:$0xf0]  ;;  %v4598_v50 = vor.u32 %v5849_v42, %v4597_v41  ;;  %v4122_v51 = vor.u32 %v5724_v43, %v4119_v45  ;;  %v4557_v56 = vld [vmem:[%s9180_s1 + $0x518] sm:$0xf] }
  0x80   :  { %1498 = vmatpush.bf16.msra.mxu1 %v4118_v8  ;;  %1511 = vmatpush.bf16.msra.mxu3 %v4438_v9  ;;  %v4277_v52 = vld [vmem:[%s9180_s1 + $0x2e8] sm:$0xf]  ;;  %v5769_v53 = vld [vmem:[%s9180_s1 + $0x30c] sm:$0xf0]  ;;  %v5839_v57 = vld [vmem:[%s9180_s1 + $0x53c] sm:$0xf0]  ;;  %v3958_v62 = vor.u32 %v5689_v49, %v3957_v48 }
  0x81   :  { %1464 = vmatpush.bf16.msra.mxu0 %v3914_v19  ;;  %v5714_v58 = vld [vmem:[%s9180_s1 + $0x15c] sm:$0xf]  ;;  %v4079_v59 = vld [vmem:[%s9180_s1 + $0x180] sm:$0xf0]  ;;  %v5824_v60 = vld [vmem:[%s9180_s1 + $0x4cc] sm:$0xf]  ;;  %v4278_v63 = vor.u32 %v5769_v53, %v4277_v52  ;;  %v4558_v3 = vor.u32 %v5839_v57, %v4557_v56 }
  0x82   :  { %1477 = vmatpush.bf16.msra.mxu2 %v4234_v20  ;;  %v4519_v61 = vld [vmem:[%s9180_s1 + $0x4f0] sm:$0xf0]  ;;  %v3917_v0 = vld [vmem:[%s9180_s1 + $0x18] sm:$0xf]  ;;  %v5679_v1 = vld [vmem:[%s9180_s1 + $0x3c] sm:$0xf0]  ;;  %v4082_v4 = vor.u32 %v5714_v58, %v4079_v59 }
  0x83   :  { %v4237_v2 = vld [vmem:[%s9180_s1 + $0x298] sm:$0xf]  ;;  %v5759_v5 = vld [vmem:[%s9180_s1 + $0x2bc] sm:$0xf0]  ;;  %v5704_v6 = vld [vmem:[%s9180_s1 + $0x10c] sm:$0xf]  ;;  %v4522_v8 = vor.u32 %v5824_v60, %v4519_v61  ;;  %v3918_v15 = vor.u32 %v5679_v1, %v3917_v0 }
  0x84   :  { %1499 = vmatpush.bf16.msra.mxu1 %v4078_v21  ;;  %1512 = vmatpush.bf16.msra.mxu3 %v4398_v22  ;;  %v4039_v7 = vld [vmem:[%s9180_s1 + $0x130] sm:$0xf0]  ;;  %v5864_v9 = vld [vmem:[%s9180_s1 + $0x60c] sm:$0xf]  ;;  %v5814_v11 = vld [vmem:[%s9180_s1 + $0x47c] sm:$0xf]  ;;  %v4238_v16 = vor.u32 %v5759_v5, %v4237_v2 }
  0x85   :  { %1526 = vmatpush.bf16.msrb.mxu0 %v4678_v25  ;;  %1478 = vmatmul.bf16.vlgmr.msra.gmra.mxu2 %v6451_v55  ;;  %v4679_v10 = vld [vmem:[%s9180_s1 + $0x630] sm:$0xf0]  ;;  %v4479_v12 = vld [vmem:[%s9180_s1 + $0x4a0] sm:$0xf0]  ;;  %v4205_v13 = vld [vmem:[%s9180_s1 + $0x250] sm:$0xf]  ;;  %v4042_v17 = vor.u32 %v5704_v6, %v4039_v7 }
  0x86   :  { %1535 = vmatpush.bf16.msrb.mxu2 %v4202_v26  ;;  %1465 = vmatmul.bf16.vlgmr.msra.gmra.mxu0 %v6449_v54  ;;  %v5750_v14 = vld [vmem:[%s9180_s1 + $0x274] sm:$0xf0]  ;;  %v4682_v18 = vor.u32 %v5864_v9, %v4679_v10  ;;  %v5694_v19 = vld [vmem:[%s9180_s1 + $0xbc] sm:$0xf]  ;;  %v3999_v20 = vld [vmem:[%s9180_s1 + $0xe0] sm:$0xf0]  ;;  %v4482_v21 = vor.u32 %v5814_v11, %v4479_v12 }
  0x87   :  { %v5854_v22 = vld [vmem:[%s9180_s1 + $0x5bc] sm:$0xf]  ;;  %v4639_v23 = vld [vmem:[%s9180_s1 + $0x5e0] sm:$0xf0]  ;;  %v4206_v24 = vor.u32 %v5750_v14, %v4205_v13  ;;  %v5804_v25 = vld [vmem:[%s9180_s1 + $0x42c] sm:$0xf]  ;;  %v4002_v29 = vor.u32 %v5694_v19, %v3999_v20 }
  0x88   :  { %1500 = vmatpush.bf16.msra.mxu1 %v4038_v33  ;;  %1513 = vmatpush.bf16.msra.mxu3 %v4358_v34  ;;  %v4439_v26 = vld [vmem:[%s9180_s1 + $0x450] sm:$0xf0]  ;;  %v4165_v27 = vld [vmem:[%s9180_s1 + $0x200] sm:$0xf]  ;;  %v5740_v28 = vld [vmem:[%s9180_s1 + $0x224] sm:$0xf0]  ;;  %v4642_v30 = vor.u32 %v5854_v22, %v4639_v23 }
  0x89   :  { %1527 = vmatpush.bf16.msrb.mxu0 %v4638_v37  ;;  %v5684_v31 = vld [vmem:[%s9180_s1 + $0x6c] sm:$0xf]  ;;  %v3959_v32 = vld [vmem:[%s9180_s1 + $0x90] sm:$0xf0]  ;;  %v4442_v33 = vor.u32 %v5804_v25, %v4439_v26  ;;  %v4166_v36 = vor.u32 %v5740_v28, %v4165_v27  ;;  %v5794_v37 = vld [vmem:[%s9180_s1 + $0x3dc] sm:$0xf] }
  0x8a   :  { %1536 = vmatpush.bf16.msrb.mxu2 %v4162_v38  ;;  %v5844_v34 = vld [vmem:[%s9180_s1 + $0x56c] sm:$0xf]  ;;  %v4599_v35 = vld [vmem:[%s9180_s1 + $0x590] sm:$0xf0]  ;;  %v4399_v38 = vld [vmem:[%s9180_s1 + $0x400] sm:$0xf0]  ;;  %v3962_v41 = vor.u32 %v5684_v31, %v3959_v32 }
  0x8b   :  { %v4125_v39 = vld [vmem:[%s9180_s1 + $0x1b0] sm:$0xf]  ;;  %v5730_v40 = vld [vmem:[%s9180_s1 + $0x1d4] sm:$0xf0]  ;;  %v4602_v42 = vor.u32 %v5844_v34, %v4599_v35  ;;  %v5674_v43 = vld [vmem:[%s9180_s1 + $0x1c] sm:$0xf] }
  0x8c   :  { %1501 = vmatpush.bf16.msra.mxu1 %v3998_v46  ;;  %1514 = vmatpush.bf16.msra.mxu3 %v4318_v47  ;;  %v3919_v45 = vld [vmem:[%s9180_s1 + $0x40] sm:$0xf0]  ;;  %v5834_v46 = vld [vmem:[%s9180_s1 + $0x51c] sm:$0xf]  ;;  %v4402_v47 = vor.u32 %v5794_v37, %v4399_v38  ;;  %v4126_v49 = vor.u32 %v5730_v40, %v4125_v39  ;;  %v4525_v52 = vld [vmem:[%s9180_s1 + $0x4d0] sm:$0xf] }
  0x8d   :  { %1528 = vmatpush.bf16.msrb.mxu0 %v4598_v50  ;;  %v4559_v48 = vld [vmem:[%s9180_s1 + $0x540] sm:$0xf0]  ;;  %v5784_v50 = vld [vmem:[%s9180_s1 + $0x38c] sm:$0xf]  ;;  %v5830_v53 = vld [vmem:[%s9180_s1 + $0x4f4] sm:$0xf0]  ;;  %v3922_v60 = vor.u32 %v5674_v43, %v3919_v45 }
  0x8e   :  { %1537 = vmatpush.bf16.msrb.mxu2 %v4122_v51  ;;  %v4359_v51 = vld [vmem:[%s9180_s1 + $0x3b0] sm:$0xf0]  ;;  %v4685_v56 = vld [vmem:[%s9180_s1 + $0x610] sm:$0xf]  ;;  %v5870_v57 = vld [vmem:[%s9180_s1 + $0x634] sm:$0xf0]  ;;  %v4562_v61 = vor.u32 %v5834_v46, %v4559_v48 }
  0x8f   :  { %v4085_v58 = vld [vmem:[%s9180_s1 + $0x160] sm:$0xf]  ;;  %v5720_v59 = vld [vmem:[%s9180_s1 + $0x184] sm:$0xf0]  ;;  %v5774_v0 = vld [vmem:[%s9180_s1 + $0x33c] sm:$0xf]  ;;  %v4686_v2 = vor.u32 %v5870_v57, %v4685_v56 }
  0x90   :  { %1502 = vmatpush.bf16.msra.mxu1 %v3958_v62  ;;  %1515 = vmatpush.bf16.msra.mxu3 %v4278_v63  ;;  %v4362_v62 = vor.u32 %v5784_v50, %v4359_v51  ;;  %v4526_v63 = vor.u32 %v5830_v53, %v4525_v52  ;;  %v4319_v1 = vld [vmem:[%s9180_s1 + $0x360] sm:$0xf0]  ;;  %v5820_v5 = vld [vmem:[%s9180_s1 + $0x4a4] sm:$0xf0]  ;;  %v4645_v6 = vld [vmem:[%s9180_s1 + $0x5c0] sm:$0xf] }
  0x91   :  { %1529 = vmatpush.bf16.msrb.mxu0 %v4558_v3  ;;  %v4086_v3 = vor.u32 %v5720_v59, %v4085_v58  ;;  %v5860_v7 = vld [vmem:[%s9180_s1 + $0x5e4] sm:$0xf0]  ;;  %v5710_v9 = vld [vmem:[%s9180_s1 + $0x134] sm:$0xf0]  ;;  %v4322_v10 = vor.u32 %v5774_v0, %v4319_v1  ;;  %v5764_v12 = vld [vmem:[%s9180_s1 + $0x2ec] sm:$0xf] }
  0x92   :  { %1538 = vmatpush.bf16.msrb.mxu2 %v4082_v4  ;;  %v4485_v4 = vld [vmem:[%s9180_s1 + $0x480] sm:$0xf]  ;;  %v4279_v13 = vld [vmem:[%s9180_s1 + $0x310] sm:$0xf0]  ;;  %v4646_v14 = vor.u32 %v5860_v7, %v4645_v6  ;;  %v5850_v19 = vld [vmem:[%s9180_s1 + $0x594] sm:$0xf0] }
  0x93   :  { %v4486_v11 = vor.u32 %v5820_v5, %v4485_v4  ;;  %v4005_v20 = vld [vmem:[%s9180_s1 + $0xc0] sm:$0xf]  ;;  %v5754_v22 = vld [vmem:[%s9180_s1 + $0x29c] sm:$0xf]  ;;  %v4282_v23 = vor.u32 %v5764_v12, %v4279_v13  ;;  %v4239_v25 = vld [vmem:[%s9180_s1 + $0x2c0] sm:$0xf0] }
  0x94   :  { %1503 = vmatpush.bf16.msra.mxu1 %v3918_v15  ;;  %1516 = vmatpush.bf16.msra.mxu3 %v4238_v16  ;;  %v4445_v16 = vld [vmem:[%s9180_s1 + $0x430] sm:$0xf]  ;;  %v4405_v26 = vld [vmem:[%s9180_s1 + $0x3e0] sm:$0xf]  ;;  %v5800_v27 = vld [vmem:[%s9180_s1 + $0x404] sm:$0xf0]  ;;  %v4242_v39 = vor.u32 %v5754_v22, %v4239_v25 }
  0x95   :  { %1548 = vmatpush.bf16.msra.mxu0 %v4522_v8  ;;  %v4045_v8 = vld [vmem:[%s9180_s1 + $0x110] sm:$0xf]  ;;  %v5840_v31 = vld [vmem:[%s9180_s1 + $0x544] sm:$0xf0]  ;;  %v7296_v32 = vld [vmem:[%s9181_s2] sm:$0xff]  ;;  %v4406_v40 = vor.u32 %v5800_v27, %v4405_v26  ;;  %s3882_s25 = sshll.u32 %s9184_s5, 4  ;;  %s3883_s25 = int_to_ptr.hbm [resolvable:$true] %s3882_s25 }
  0x96   :  { %1539 = vmatpush.bf16.msrb.mxu2 %v4042_v17  ;;  %4697 = vmatmul.msk.bf16.vlgmr.msrb.gmra.mxu0 %vm1258_vm0, %v6433_v44  ;;  %v4046_v15 = vor.u32 %v5710_v9, %v4045_v8  ;;  %v5810_v17 = vld [vmem:[%s9180_s1 + $0x454] sm:$0xf0]  ;;  %v4207_v34 = vld [vmem:[%s9180_s1 + $0x278] sm:$0xf0]  ;;  %v5825_v35 = vld [vmem:[%s9180_s1 + $0x4d4] sm:$0xf] }
  0x97   :  { %1517 = vmatmul.bf16.vlgmr.msra.gmra.mxu3 %v6451_v55  ;;  %1504 = vmatmul.bf16.vlgmr.msra.gmra.mxu1 %v6449_v54  ;;  %v3965_v37 = vld [vmem:[%s9180_s1 + $0x70] sm:$0xf]  ;;  %v5690_v38 = vld [vmem:[%s9180_s1 + $0x94] sm:$0xf0]  ;;  %v4167_v50 = vld [vmem:[%s9180_s1 + $0x228] sm:$0xf0] }
  0x98   :  { %1565 = vmatpush.bf16.msrb.mxu1 %v4682_v18  ;;  %1574 = vmatpush.bf16.msrb.mxu3 %v4206_v24  ;;  %v4605_v18 = vld [vmem:[%s9180_s1 + $0x570] sm:$0xf]  ;;  %v4446_v24 = vor.u32 %v5810_v17, %v4445_v16  ;;  %v5790_v46 = vld [vmem:[%s9180_s1 + $0x3b4] sm:$0xf0]  ;;  %v3966_v48 = vor.u32 %v5690_v38, %v3965_v37  ;;  %v5815_v51 = vld [vmem:[%s9180_s1 + $0x484] sm:$0xf] }
  0x99   :  { %1549 = vmatpush.bf16.msra.mxu0 %v4482_v21  ;;  %v5700_v21 = vld [vmem:[%s9180_s1 + $0xe4] sm:$0xf0]  ;;  %v4606_v28 = vor.u32 %v5850_v19, %v4605_v18  ;;  %v4365_v45 = vld [vmem:[%s9180_s1 + $0x390] sm:$0xf]  ;;  %v4487_v56 = vld [vmem:[%s9180_s1 + $0x4a8] sm:$0xf0] }
  0x9a   :  { %1540 = vmatpush.bf16.msrb.mxu2 %v4002_v29  ;;  %v4006_v29 = vor.u32 %v5700_v21, %v4005_v20  ;;  %v3925_v57 = vld [vmem:[%s9180_s1 + $0x20] sm:$0xf]  ;;  %v5680_v58 = vld [vmem:[%s9180_s1 + $0x44] sm:$0xf0]  ;;  %v4490_v4 = vor.u32 %v5815_v51, %v4487_v56  ;;  %v5725_v6 = vld [vmem:[%s9180_s1 + $0x1b4] sm:$0xf] }
  0x9b   :  { %v4325_v1 = vld [vmem:[%s9180_s1 + $0x340] sm:$0xf]  ;;  %v3926_v5 = vor.u32 %v5680_v58, %v3925_v57  ;;  %v4127_v7 = vld [vmem:[%s9180_s1 + $0x1d8] sm:$0xf0]  ;;  %v5805_v8 = vld [vmem:[%s9180_s1 + $0x434] sm:$0xf] }
  0x9c   :  { %1566 = vmatpush.bf16.msrb.mxu1 %v4642_v30  ;;  %1575 = vmatpush.bf16.msrb.mxu3 %v4166_v36  ;;  %v4565_v30 = vld [vmem:[%s9180_s1 + $0x520] sm:$0xf]  ;;  %v4527_v36 = vld [vmem:[%s9180_s1 + $0x4f8] sm:$0xf0]  ;;  %v5855_v13 = vld [vmem:[%s9180_s1 + $0x5c4] sm:$0xf] }
  0x9d   :  { %1550 = vmatpush.bf16.msra.mxu0 %v4442_v33  ;;  %v5745_v33 = vld [vmem:[%s9180_s1 + $0x254] sm:$0xf]  ;;  %v4447_v9 = vld [vmem:[%s9180_s1 + $0x458] sm:$0xf0]  ;;  %v4285_v16 = vld [vmem:[%s9180_s1 + $0x2f0] sm:$0xf] }
  0x9e   :  { %1541 = vmatpush.bf16.msrb.mxu2 %v3962_v41  ;;  %v238_v41 = vperm.slane %v7296_v32, 0  ;;  %v4210_v43 = vor.u32 %v5745_v33, %v4207_v34  ;;  %v5770_v17 = vld [vmem:[%s9180_s1 + $0x314] sm:$0xf0]  ;;  %v4450_v19 = vor.u32 %v5805_v8, %v4447_v9  ;;  %v5715_v20 = vld [vmem:[%s9180_s1 + $0x164] sm:$0xf] }
  0x9f   :  { %v4087_v21 = vld [vmem:[%s9180_s1 + $0x188] sm:$0xf0]  ;;  %v4245_v34 = vld [vmem:[%s9180_s1 + $0x2a0] sm:$0xf]  ;;  %v4047_v38 = vld [vmem:[%s9180_s1 + $0x138] sm:$0xf0] }
  0xa0   :  { %1567 = vmatpush.bf16.msrb.mxu1 %v4602_v42  ;;  %1576 = vmatpush.bf16.msrb.mxu3 %v4126_v49  ;;  %v4566_v42 = vor.u32 %v5840_v31, %v4565_v30  ;;  %v5735_v49 = vld [vmem:[%s9180_s1 + $0x204] sm:$0xf]  ;;  %v1271_v52 = vpop.f32.mrf.mxu0  ;;  %v4607_v30 = vld [vmem:[%s9180_s1 + $0x598] sm:$0xf0]  ;;  %v4090_v33 = vor.u32 %v5715_v20, %v4087_v21  ;;  %v4007_v58 = vld [vmem:[%s9180_s1 + $0xe8] sm:$0xf0] }
  0xa1   :  { %1551 = vmatpush.bf16.msra.mxu0 %v4402_v47  ;;  %v4530_v47 = vor.u32 %v5825_v35, %v4527_v36  ;;  %v1284_v53 = vpop.f32.mrf.mxu1  ;;  %v1272_v59 = vadd.f32 %v1271_v52, %v238_v41  ;;  %v4170_v0 = vor.u32 %v5735_v49, %v4167_v50  ;;  %v5760_v35 = vld [vmem:[%s9180_s1 + $0x2c4] sm:$0xf0]  ;;  %v5705_v36 = vld [vmem:[%s9180_s1 + $0x114] sm:$0xf]  ;;  %v5695_v51 = vld [vmem:[%s9180_s1 + $0xc4] sm:$0xf] }
  0xa2   :  { %1542 = vmatpush.bf16.msrb.mxu2 %v3922_v60  ;;  %v4366_v60 = vor.u32 %v5790_v46, %v4365_v45  ;;  %v5785_v41 = vld [vmem:[%s9180_s1 + $0x394] sm:$0xf]  ;;  %v4246_v46 = vor.u32 %v5760_v35, %v4245_v34  ;;  %v4050_v49 = vor.u32 %v5705_v36, %v4047_v38  ;;  %v4893_v52 = vld [vmem:[%s9182_s3 + $0x168] sm:$0xf]  ;;  %v4881_v8 = vld [vmem:[%s9182_s3 + $0x150] sm:$0xf] }
  0xa3   :  { %v5914_v9 = vld [vmem:[%s9182_s3 + $0x158] sm:$0xf0]  ;;  %v3927_v20 = vld [vmem:[%s9180_s1 + $0x48] sm:$0xf0]  ;;  %v4989_v36 = vld [vmem:[%s9182_s3 + $0x228] sm:$0xf] }
  0xa4   :  { %1568 = vmatpush.bf16.msrb.mxu1 %v4562_v61  ;;  %1577 = vmatpush.bf16.msrb.mxu3 %v4086_v3  ;;  %v5865_v61 = vld [vmem:[%s9180_s1 + $0x614] sm:$0xf]  ;;  %v1285_v3 = vadd.f32 %v1284_v53, %v1272_v59  ;;  %v4785_v59 = vld [vmem:[%s9182_s3 + $0x90] sm:$0xf]  ;;  %v4882_v21 = vor.u32 %v5914_v9, %v4881_v8 }
  0xa5   :  { %1552 = vmatpush.bf16.msra.mxu0 %v4362_v62  ;;  %1543 = vmatmul.bf16.vlgmr.msrb.gmra.mxu2 %v6449_v54  ;;  %v4687_v62 = vld [vmem:[%s9180_s1 + $0x638] sm:$0xf0]  ;;  %v5917_v53 = vld [vmem:[%s9182_s3 + $0x170] sm:$0xf0] }
  0xa6   :  { %1604 = vmatpush.bf16.msra.mxu2 %v4686_v2  ;;  %v5780_v2 = vld [vmem:[%s9180_s1 + $0x364] sm:$0xf0] }
  0xa7   :  { %4698 = vmatmul.msk.bf16.vlgmr.msrb.gmra.mxu1 %vm1258_vm0, %v6433_v44  ;;  %v4326_v12 = vor.u32 %v5780_v2, %v4325_v1  ;;  %v4327_v1 = vld [vmem:[%s9180_s1 + $0x368] sm:$0xf0] }
  0xa8   :  { %1587 = vmatpush.bf16.msra.mxu1 %v4526_v63  ;;  %1578 = vmatpush.bf16.msrb.mxu3 %v4046_v15  ;;  %v1297_v63 = vpop.f32.mrf.mxu2  ;;  %v4130_v15 = vor.u32 %v5725_v6, %v4127_v7  ;;  %v1273_v25 = vpop.f32.mrf.mxu0  ;;  %v5685_v7 = vld [vmem:[%s9180_s1 + $0x74] sm:$0xf] }
  0xa9   :  { %1553 = vmatpush.bf16.msra.mxu0 %v4322_v10  ;;  %v4690_v10 = vor.u32 %v5865_v61, %v4687_v62  ;;  %v1310_v22 = vpop.f32.mrf.mxu3  ;;  %v1286_v27 = vpop.f32.mrf.mxu1  ;;  %v5755_v25 = vld [vmem:[%s9180_s1 + $0x2a4] sm:$0xf] }
  0xaa   :  { %1605 = vmatpush.bf16.msra.mxu2 %v4646_v14  ;;  %v4647_v14 = vld [vmem:[%s9180_s1 + $0x5e8] sm:$0xf0]  ;;  %v5911_v27 = vld [vmem:[%s9182_s3 + $0x140] sm:$0xf0] }
  0xab   :  { %v4650_v26 = vor.u32 %v5855_v13, %v4647_v14  ;;  %v3967_v13 = vld [vmem:[%s9180_s1 + $0x98] sm:$0xf0]  ;;  %v4773_v14 = vld [vmem:[%s9182_s3 + $0x78] sm:$0xf] }
  0xac   :  { %1588 = vmatpush.bf16.msra.mxu1 %v4486_v11  ;;  %1579 = vmatpush.bf16.msrb.mxu3 %v4006_v29  ;;  %v7368_v11 = vadd.f32 %v1297_v63, %v1285_v3  ;;  %v5845_v29 = vld [vmem:[%s9180_s1 + $0x574] sm:$0xf] }
  0xad   :  { %1554 = vmatpush.bf16.msra.mxu0 %v4282_v23  ;;  %v5795_v23 = vld [vmem:[%s9180_s1 + $0x3e4] sm:$0xf]  ;;  %v4610_v45 = vor.u32 %v5845_v29, %v4607_v30  ;;  %v4247_v29 = vld [vmem:[%s9180_s1 + $0x2c8] sm:$0xf0]  ;;  %v4761_v30 = vld [vmem:[%s9182_s3 + $0x60] sm:$0xf] }
  0xae   :  { %1606 = vmatpush.bf16.msra.mxu2 %v4606_v28  ;;  %v4701_v18 = vmul.f32 -1.442695, %v7368_v11  ;;  %v4286_v28 = vor.u32 %v5770_v17, %v4285_v16  ;;  %v5765_v17 = vld [vmem:[%s9180_s1 + $0x2f4] sm:$0xf] }
  0xb0   :  { %1589 = vmatpush.bf16.msra.mxu1 %v4446_v24  ;;  %1580 = vmatpush.bf16.msrb.mxu3 %v3966_v48  ;;  %v4407_v24 = vld [vmem:[%s9180_s1 + $0x408] sm:$0xf0]  ;;  %6112 = vpow2.f32 %v4701_v18  ;;  %v1299_v31 = vpop.f32.mrf.mxu2  ;;  %v1336_v2 = vpop.f32.mrf.mxu0  ;;  %v4287_v18 = vld [vmem:[%s9180_s1 + $0x318] sm:$0xf0] }
  0xb1   :  { %1555 = vmatpush.bf16.msra.mxu0 %v4242_v39  ;;  %v4410_v37 = vor.u32 %v5795_v23, %v4407_v24  ;;  %v4797_v39 = vld [vmem:[%s9182_s3 + $0xa8] sm:$0xf]  ;;  %v4567_v48 = vld [vmem:[%s9180_s1 + $0x548] sm:$0xf0]  ;;  %v1312_v61 = vpop.f32.mrf.mxu3  ;;  %v3970_v23 = vor.u32 %v5685_v7, %v3967_v13  ;;  %v5935_v7 = vld [vmem:[%s9182_s3 + $0x200] sm:$0xf0] }
  0xb2   :  { %1607 = vmatpush.bf16.msra.mxu2 %v4566_v42  ;;  %v4367_v42 = vld [vmem:[%s9180_s1 + $0x3b8] sm:$0xf0]  ;;  %v5884_v31 = vld [vmem:[%s9182_s3 + $0x68] sm:$0xf0]  ;;  %v5085_v61 = vld [vmem:[%s9182_s3 + $0x2e8] sm:$0xf] }
  0xb3   :  { %v4370_v57 = vor.u32 %v5785_v41, %v4367_v42  ;;  %v4762_v41 = vor.u32 %v5884_v31, %v4761_v30  ;;  %v4857_v42 = vld [vmem:[%s9182_s3 + $0x120] sm:$0xf] }
  0xb4   :  { %1590 = vmatpush.bf16.msra.mxu1 %v4406_v40  ;;  %1556 = vmatmul.bf16.vlgmr.msra.gmra.mxu0 %v6451_v55  ;;  %v5893_v40 = vld [vmem:[%s9182_s3 + $0xb0] sm:$0xf0] }
  0xb5   :  { %1613 = vmatpush.bf16.msrb.mxu0 %v4210_v43  ;;  %1581 = vmatpush.bf16.msrb.mxu3 %v3926_v5  ;;  %v239_v43 = vperm.slane %v7296_v32, 1  ;;  %v4798_v50 = vor.u32 %v5893_v40, %v4797_v39  ;;  %v4010_v5 = vor.u32 %v5695_v51, %v4007_v58  ;;  %v4977_v51 = vld [vmem:[%s9182_s3 + $0x210] sm:$0xf]  ;;  %v5905_v58 = vld [vmem:[%s9182_s3 + $0x110] sm:$0xf0] }
  0xb6   :  { %1626 = vmatpush.bf16.msrb.mxu2 %v4530_v47  ;;  %v5835_v47 = vld [vmem:[%s9180_s1 + $0x524] sm:$0xf]  ;;  %v6113_v56 = vpop.eup %6112 }
  0xb7   :  { %4699 = vmatmul.msk.bf16.vlgmr.msra.gmra.mxu2 %vm1258_vm0, %v6433_v44  ;;  %v7453_v62 = vadd.f32 1.0, %v6113_v56  ;;  %v1311_v63 = vadd.f32 %v1310_v22, %v239_v43  ;;  %v4570_v3 = vor.u32 %v5835_v47, %v4567_v48  ;;  %v5908_v43 = vld [vmem:[%s9182_s3 + $0x128] sm:$0xf0]  ;;  %v4749_v47 = vld [vmem:[%s9182_s3 + $0x48] sm:$0xf] }
  0xb8   :  { %1591 = vmatpush.bf16.msra.mxu1 %v4366_v60  ;;  %1582 = vmatmul.bf16.vlgmr.msrb.gmra.mxu3 %v6449_v54  ;;  %v5890_v60 = vld [vmem:[%s9182_s3 + $0x98] sm:$0xf0]  ;;  %v1338_v35 = vpop.f32.mrf.mxu0  ;;  %v5881_v48 = vld [vmem:[%s9182_s3 + $0x50] sm:$0xf0]  ;;  %v4858_v56 = vor.u32 %v5908_v43, %v4857_v42  ;;  %v4941_v43 = vld [vmem:[%s9182_s3 + $0x1c8] sm:$0xf] }
  0xb9   :  { %1614 = vmatpush.bf16.msrb.mxu0 %v4170_v0  ;;  %1643 = vmatpush.bf16.msra.mxu3 %v4690_v10  ;;  %v5775_v0 = vld [vmem:[%s9180_s1 + $0x344] sm:$0xf]  ;;  %6114 = vrcp.f32 %v7453_v62  ;;  %v4786_v6 = vor.u32 %v5890_v60, %v4785_v59  ;;  %v1323_v10 = vpop.f32.mrf.mxu2  ;;  %v4750_v59 = vor.u32 %v5881_v48, %v4749_v47  ;;  %vm1697_vm1 = vweird.f32 %v7453_v62 }
  0xba   :  { %1627 = vmatpush.bf16.msrb.mxu2 %v4490_v4  ;;  %v4894_v4 = vor.u32 %v5917_v53, %v4893_v52  ;;  %v1324_v16 = vadd.f32 %v1323_v10, %v1311_v63  ;;  %v5938_v52 = vld [vmem:[%s9182_s3 + $0x218] sm:$0xf0]  ;;  %v240_v53 = vperm.slane %v7296_v32, 2  ;;  %v4737_v63 = vld [vmem:[%s9182_s3 + $0x30] sm:$0xf] }
  0xbb   :  { %v1701_v10 = vand.u32 2147483647, %v7453_v62 }
  0xbc   :  { %1592 = vmatpush.bf16.msra.mxu1 %v4326_v12  ;;  %v4330_v12 = vor.u32 %v5775_v0, %v4327_v1  ;;  %v7493_v22 = vadd.f32 %v1336_v2, %v1324_v16  ;;  %v5878_v0 = vld [vmem:[%s9182_s3 + $0x38] sm:$0xf0]  ;;  %v4978_v1 = vor.u32 %v5938_v52, %v4977_v51  ;;  %v5965_v2 = vld [vmem:[%s9182_s3 + $0x2f0] sm:$0xf0] }
  0xbd   :  { %1615 = vmatpush.bf16.msrb.mxu0 %v4130_v15  ;;  %1644 = vmatpush.bf16.msra.mxu3 %v4650_v26  ;;  %v5887_v15 = vld [vmem:[%s9182_s3 + $0x80] sm:$0xf0]  ;;  %v4869_v26 = vld [vmem:[%s9182_s3 + $0x138] sm:$0xf]  ;;  %v5086_v8 = vor.u32 %v5965_v2, %v5085_v61  ;;  %v4738_v16 = vor.u32 %v5878_v0, %v4737_v63  ;;  %vm7615_vm4 = vcmp.eq.f32.partialorder %v1701_v10, 8.507059e+37 }
  0xbe   :  { %1628 = vmatpush.bf16.msrb.mxu2 %v4450_v19  ;;  %v5675_v19 = vld [vmem:[%s9180_s1 + $0x24] sm:$0xf]  ;;  %v4774_v24 = vor.u32 %v5887_v15, %v4773_v14  ;;  %v4702_v34 = vmul.f32 -1.442695, %v7493_v22  ;;  %v4870_v39 = vor.u32 %v5911_v27, %v4869_v26  ;;  %v4833_v14 = vld [vmem:[%s9182_s3 + $0xf0] sm:$0xf] }
  0xbf   :  { %v3930_v40 = vor.u32 %v5675_v19, %v3927_v20  ;;  %v5962_v20 = vld [vmem:[%s9182_s3 + $0x2d8] sm:$0xf0]  ;;  %v4929_v0 = vld [vmem:[%s9182_s3 + $0x1b0] sm:$0xf] }
  0xc0   :  { %1593 = vmatpush.bf16.msra.mxu1 %v4286_v28  ;;  %v4290_v28 = vor.u32 %v5765_v17, %v4287_v18  ;;  %6116 = vpow2.f32 %v4702_v34  ;;  %v1375_v17 = vpop.f32.mrf.mxu0  ;;  %v5073_v18 = vld [vmem:[%s9182_s3 + $0x2d0] sm:$0xf]  ;;  %v4713_v34 = vld [vmem:[%s9182_s3] sm:$0xf] }
  0xc1   :  { %1616 = vmatpush.bf16.msrb.mxu0 %v4090_v33  ;;  %1645 = vmatpush.bf16.msra.mxu3 %v4610_v45  ;;  %v7513_v33 = vpop.eup %6114  ;;  %v1349_v60 = vpop.f32.mrf.mxu1  ;;  %v5074_v26 = vor.u32 %v5962_v20, %v5073_v18 }
  0xc2   :  { %1629 = vmatpush.bf16.msrb.mxu2 %v4410_v37  ;;  %v5941_v37 = vld [vmem:[%s9182_s3 + $0x230] sm:$0xf0]  ;;  %v1693_v38 = vmul.f32 %v7513_v33, %v7453_v62  ;;  %vm1698_vm2 = vweird.f32 %v7513_v33  ;;  %v1350_v13 = vadd.f32 %v1349_v60, %v240_v53  ;;  %v5896_v53 = vld [vmem:[%s9182_s3 + $0xc8] sm:$0xf0] }
  0xc3   :  { %vm7585_vm3 = vmor %vm1697_vm1, %vm1698_vm2 }
  0xc4   :  { %1594 = vmatpush.bf16.msra.mxu1 %v4246_v46  ;;  %v1694_v45 = vsub.f32 1.0, %v1693_v38  ;;  %v4250_v46 = vor.u32 %v5755_v25, %v4247_v29  ;;  %v5932_v25 = vld [vmem:[%s9182_s3 + $0x1e8] sm:$0xf0] }
  0xc5   :  { %1617 = vmatpush.bf16.msrb.mxu0 %v4050_v49  ;;  %1646 = vmatpush.bf16.msra.mxu3 %v4570_v3  ;;  %v4990_v49 = vor.u32 %v5941_v37, %v4989_v36  ;;  %v4821_v36 = vld [vmem:[%s9182_s3 + $0xd8] sm:$0xf]  ;;  %v5872_v38 = vld [vmem:[%s9182_s3 + $0x8] sm:$0xf0] }
  0xc6   :  { %1630 = vmatpush.bf16.msrb.mxu2 %v4370_v57  ;;  %v4845_v57 = vld [vmem:[%s9182_s3 + $0x108] sm:$0xf]  ;;  %v6117_v3 = vpop.eup %6116  ;;  %v4714_v52 = vor.u32 %v5872_v38, %v4713_v34 }
  0xc7   :  { %1595 = vmatmul.bf16.vlgmr.msra.gmra.mxu1 %v6451_v55 }
  0xc8   :  { %3470 = vmatpush.bf16.msrb.mxu1 %v4798_v50  ;;  %4700 = vmatmul.msk.bf16.vlgmr.msra.gmra.mxu3 %vm1258_vm0, %v6433_v44  ;;  %v1325_v50 = vpop.f32.mrf.mxu2  ;;  %v1695_v44 = vmul.f32 %v7513_v33, %v1694_v45  ;;  %v5929_v45 = vld [vmem:[%s9182_s3 + $0x1d0] sm:$0xf0] }
  0xc9   :  { %3483 = vmatpush.bf16.msrb.mxu3 %v4894_v4  ;;  %1618 = vmatpush.bf16.msrb.mxu0 %v4010_v5  ;;  %v1703_v4 = vand.u32 2147483648, %v7453_v62  ;;  %v4846_v5 = vor.u32 %v5905_v58, %v4845_v57  ;;  %v4725_v62 = vld [vmem:[%s9182_s3 + $0x18] sm:$0xf]  ;;  %v1351_v35 = vpop.f32.mrf.mxu1  ;;  %v4809_v50 = vld [vmem:[%s9182_s3 + $0xc0] sm:$0xf] }
  0xca   :  { %1631 = vmatpush.bf16.msrb.mxu2 %v4330_v12  ;;  %v1696_v9 = vadd.f32 %v7513_v33, %v1695_v44  ;;  %v7575_v12 = vadd.f32 1.0, %v6117_v3  ;;  %v1377_v44 = vpop.f32.mrf.mxu0  ;;  %v5956_v57 = vld [vmem:[%s9182_s3 + $0x2a8] sm:$0xf0] }
  0xcb   :  { %v5944_v44 = vld [vmem:[%s9182_s3 + $0x248] sm:$0xf0] }
  0xcc   :  { %3471 = vmatpush.bf16.msrb.mxu1 %v4786_v6  ;;  %v4965_v6 = vld [vmem:[%s9182_s3 + $0x1f8] sm:$0xf]  ;;  %6118 = vrcp.f32 %v7575_v12  ;;  %v1700_v27 = vsel %vm7585_vm3, %v7513_v33, %v1696_v9  ;;  %v5899_v33 = vld [vmem:[%s9182_s3 + $0xe0] sm:$0xf0]  ;;  %v1716_v2 = vand.u32 2147483647, %v7575_v12  ;;  %vm1712_vm5 = vweird.f32 %v7575_v12 }
  0xcd   :  { %3484 = vmatpush.bf16.msrb.mxu3 %v4882_v21  ;;  %1619 = vmatpush.bf16.msrb.mxu0 %v3970_v23  ;;  %v4966_v19 = vor.u32 %v5935_v7, %v4965_v6  ;;  %v1704_v21 = vor.u32 1.1754944e-38, %v1703_v4  ;;  %v1362_v23 = vpop.f32.mrf.mxu3  ;;  %v1718_v3 = vand.u32 2147483648, %v7575_v12  ;;  %v5953_v6 = vld [vmem:[%s9182_s3 + $0x290] sm:$0xf0]  ;;  %v5181_v7 = vld [vmem:[%s9182_s3 + $0x3a8] sm:$0xf] }
  0xce   :  { %1632 = vmatpush.bf16.msrb.mxu2 %v4290_v28  ;;  %v1363_v29 = vadd.f32 %v1362_v23, %v1350_v13  ;;  %vm1717_vm8 = vcmp.eq.f32.partialorder %v1716_v2, 8.507059e+37  ;;  %v5025_v23 = vld [vmem:[%s9182_s3 + $0x270] sm:$0xf]  ;;  %v5986_v28 = vld [vmem:[%s9182_s3 + $0x398] sm:$0xf0] }
  0xcf   :  { %v1705_v42 = vsel %vm7615_vm4, %v1704_v21, %v1700_v27  ;;  %v5169_v27 = vld [vmem:[%s9182_s3 + $0x390] sm:$0xf] }
  0xd0   :  { %3472 = vmatpush.bf16.msrb.mxu1 %v4774_v24  ;;  %v4953_v24 = vld [vmem:[%s9182_s3 + $0x1e0] sm:$0xf]  ;;  %v7628_v37 = vadd.f32 %v1375_v17, %v1363_v29  ;;  %v1842_v58 = vmul.f32 %v1705_v42, %v7368_v11  ;;  %v4810_v11 = vor.u32 %v5896_v53, %v4809_v50  ;;  %v5923_v17 = vld [vmem:[%s9182_s3 + $0x1a0] sm:$0xf0]  ;;  %v5170_v35 = vor.u32 %v5986_v28, %v5169_v27 }
  0xd1   :  { %3485 = vmatpush.bf16.msrb.mxu3 %v4870_v39  ;;  %1620 = vmatpush.bf16.msrb.mxu0 %v3930_v40  ;;  %v4954_v39 = vor.u32 %v5932_v25, %v4953_v24  ;;  %v5061_v40 = vld [vmem:[%s9182_s3 + $0x2b8] sm:$0xf]  ;;  %v1414_v9 = vpop.f32.mrf.mxu1  ;;  %v5983_v42 = vld [vmem:[%s9182_s3 + $0x380] sm:$0xf0]  ;;  %v5145_v53 = vld [vmem:[%s9182_s3 + $0x360] sm:$0xf] }
  0xd2   :  { %1633 = vmatpush.bf16.msrb.mxu2 %v4250_v46  ;;  %v6119_v47 = vpop.eup %6118  ;;  %v4703_v48 = vmul.f32 -1.442695, %v7628_v37 }
  0xd3   :  { %v1708_v51 = vmul.f32 %v6119_v47, %v7575_v12  ;;  %vm1713_vm6 = vweird.f32 %v6119_v47  ;;  %v5950_v12 = vld [vmem:[%s9182_s3 + $0x278] sm:$0xf0] }
  0xd4   :  { %3473 = vmatpush.bf16.msrb.mxu1 %v4762_v41  ;;  %1621 = vmatmul.bf16.vlgmr.msrb.gmra.mxu0 %v6449_v54  ;;  %v5902_v54 = vld [vmem:[%s9182_s3 + $0xf8] sm:$0xf0]  ;;  %v5959_v41 = vld [vmem:[%s9182_s3 + $0x2c0] sm:$0xf0]  ;;  %6120 = vpow2.f32 %v4703_v48  ;;  %vm1714_vm7 = vmor %vm1712_vm5, %vm1713_vm6 }
  0xd5   :  { %3496 = vmatpush.bf16.msra.mxu0 %v4990_v49  ;;  %3486 = vmatpush.bf16.msrb.mxu3 %v4858_v56  ;;  %v4834_v30 = vor.u32 %v5902_v54, %v4833_v14  ;;  %v5062_v46 = vor.u32 %v5959_v41, %v5061_v40  ;;  %v4822_v49 = vor.u32 %v5899_v33, %v4821_v36  ;;  %v5049_v56 = vld [vmem:[%s9182_s3 + $0x2a0] sm:$0xf]  ;;  %v1709_v61 = vsub.f32 1.0, %v1708_v51  ;;  %v1364_v63 = vpop.f32.mrf.mxu3  ;;  %v5989_v14 = vld [vmem:[%s9182_s3 + $0x3b0] sm:$0xf0] }
  0xd6   :  { %1634 = vmatmul.bf16.vlgmr.msrb.gmra.mxu2 %v6451_v55  ;;  %v5875_v55 = vld [vmem:[%s9182_s3 + $0x20] sm:$0xf0]  ;;  %v5050_v60 = vor.u32 %v5956_v57, %v5049_v56  ;;  %v5182_v54 = vor.u32 %v5989_v14, %v5181_v7  ;;  %v5013_v33 = vld [vmem:[%s9182_s3 + $0x258] sm:$0xf] }
  0xd7   :  { %3509 = vmatpush.bf16.msra.mxu2 %v5086_v8  ;;  %v4726_v31 = vor.u32 %v5875_v55, %v4725_v62  ;;  %v1710_v4 = vmul.f32 %v6119_v47, %v1709_v61  ;;  %v7680_v8 = vpack.c.bf16 %v1842_v58, %v1842_v58  ;;  %v1719_v62 = vor.u32 1.1754944e-38, %v1718_v3  ;;  %v5157_v41 = vld [vmem:[%s9182_s3 + $0x378] sm:$0xf]  ;;  %v5980_v58 = vld [vmem:[%s9182_s3 + $0x368] sm:$0xf0] }
  0xd8   :  { %3474 = vmatpush.bf16.msrb.mxu1 %v4750_v59  ;;  %v4942_v59 = vor.u32 %v5929_v45, %v4941_v43  ;;  %v241_v55 = vperm.slane %v7296_v32, 3  ;;  %v5158_v45 = vor.u32 %v5983_v42, %v5157_v41  ;;  %v6025_v41 = vld [vmem:[%s9182_s3 + $0x4d0] sm:$0xf0] }
  0xd9   :  { %3497 = vmatpush.bf16.msra.mxu0 %v4978_v1  ;;  %3487 = vmatpush.bf16.msrb.mxu3 %v4846_v5  ;;  %v5926_v1 = vld [vmem:[%s9182_s3 + $0x1b8] sm:$0xf0]  ;;  %v5037_v5 = vld [vmem:[%s9182_s3 + $0x288] sm:$0xf]  ;;  %v1711_v15 = vadd.f32 %v6119_v47, %v1710_v4  ;;  %v1416_v38 = vpop.f32.mrf.mxu1 }
  0xda   :  { %v4930_v10 = vor.u32 %v5926_v1, %v4929_v0  ;;  %v5038_v13 = vor.u32 %v5953_v6, %v5037_v5  ;;  %v6121_v18 = vpop.eup %6120  ;;  %v5146_v0 = vor.u32 %v5980_v58, %v5145_v53  ;;  %v6034_v1 = vld [vmem:[%s9182_s3 + $0x518] sm:$0xf0]  ;;  %v5133_v4 = vld [vmem:[%s9182_s3 + $0x348] sm:$0xf]  ;;  %v5977_v5 = vld [vmem:[%s9182_s3 + $0x350] sm:$0xf0] }
  0xdb   :  { %3510 = vmatpush.bf16.msra.mxu2 %v5074_v26  ;;  %v1715_v20 = vsel %vm1714_vm7, %v6119_v47, %v1711_v15  ;;  %v7696_v21 = vadd.f32 1.0, %v6121_v18  ;;  %v5026_v26 = vor.u32 %v5950_v12, %v5025_v23  ;;  %v6037_v47 = vld [vmem:[%s9182_s3 + $0x530] sm:$0xf0]  ;;  %v5349_v6 = vld [vmem:[%s9182_s3 + $0x4f8] sm:$0xf]  ;;  %v5134_v15 = vor.u32 %v5977_v5, %v5133_v4 }
  0xdc   :  { %3475 = vmatpush.bf16.msrb.mxu1 %v4738_v16  ;;  %v4917_v16 = vld [vmem:[%s9182_s3 + $0x198] sm:$0xf]  ;;  %v1720_v24 = vsel %vm1717_vm8, %v1719_v62, %v1715_v20  ;;  %v5277_v18 = vld [vmem:[%s9182_s3 + $0x468] sm:$0xf]  ;;  %v6013_v62 = vld [vmem:[%s9182_s3 + $0x470] sm:$0xf0] }
  0xdd   :  { %3498 = vmatpush.bf16.msra.mxu0 %v4966_v19  ;;  %3488 = vmatpush.bf16.msrb.mxu3 %v4834_v30  ;;  %v1388_v19 = vpop.f32.mrf.mxu2  ;;  %v4918_v25 = vor.u32 %v5923_v17, %v4917_v16  ;;  %v1843_v29 = vmul.f32 %v1720_v24, %v7493_v22  ;;  %6122 = vrcp.f32 %v7696_v21  ;;  %v4905_v30 = vld [vmem:[%s9182_s3 + $0x180] sm:$0xf]  ;;  %v5947_v22 = vld [vmem:[%s9182_s3 + $0x260] sm:$0xf0]  ;;  %vm1727_vm9 = vweird.f32 %v7696_v21  ;;  %v5974_v23 = vld [vmem:[%s9182_s3 + $0x338] sm:$0xf0] }
  0xde   :  { %v1389_v34 = vadd.f32 %v1388_v19, %v241_v55  ;;  %v5014_v40 = vor.u32 %v5947_v22, %v5013_v33  ;;  %v1733_v61 = vand.u32 2147483648, %v7696_v21  ;;  %v5278_v20 = vor.u32 %v6013_v62, %v5277_v18  ;;  %v5337_v12 = vld [vmem:[%s9182_s3 + $0x4e0] sm:$0xf]  ;;  %v5109_v38 = vld [vmem:[%s9182_s3 + $0x318] sm:$0xf] }
  0xdf   :  { %3511 = vmatpush.bf16.msra.mxu2 %v5062_v46  ;;  %v7718_v36 = vpack.c.bf16 %v1843_v29, %v1843_v29  ;;  %v5373_v46 = vld [vmem:[%s9182_s3 + $0x528] sm:$0xf]  ;;  %v5313_v53 = vld [vmem:[%s9182_s3 + $0x4b0] sm:$0xf]  ;;  %v5301_v5 = vld [vmem:[%s9182_s3 + $0x498] sm:$0xf] }
  0xe0   :  { %3476 = vmatpush.bf16.msrb.mxu1 %v4726_v31  ;;  %v5920_v31 = vld [vmem:[%s9182_s3 + $0x188] sm:$0xf0]  ;;  %v1401_v43 = vpop.f32.mrf.mxu0  ;;  %v5374_v50 = vor.u32 %v6037_v47, %v5373_v46  ;;  %v5253_v46 = vld [vmem:[%s9182_s3 + $0x438] sm:$0xf]  ;;  %v6007_v47 = vld [vmem:[%s9182_s3 + $0x440] sm:$0xf0] }
  0xe1   :  { %3499 = vmatpush.bf16.msra.mxu0 %v4954_v39  ;;  %3489 = vmatpush.bf16.msrb.mxu3 %v4822_v49  ;;  %v4906_v39 = vor.u32 %v5920_v31, %v4905_v30  ;;  %v1402_v48 = vadd.f32 %v1401_v43, %v1389_v34  ;;  %v5265_v31 = vld [vmem:[%s9182_s3 + $0x450] sm:$0xf]  ;;  %v6010_v34 = vld [vmem:[%s9182_s3 + $0x458] sm:$0xf0]  ;;  %v5229_v18 = vld [vmem:[%s9182_s3 + $0x408] sm:$0xf] }
  0xe2   :  { %v5266_v22 = vor.u32 %v6010_v34, %v5265_v31  ;;  %v6001_v62 = vld [vmem:[%s9182_s3 + $0x410] sm:$0xf0]  ;;  %v5217_v34 = vld [vmem:[%s9182_s3 + $0x3f0] sm:$0xf] }
  0xe3   :  { %3512 = vmatpush.bf16.msra.mxu2 %v5050_v60  ;;  %v6123_v51 = vpop.eup %6122  ;;  %v7750_v57 = vadd.f32 %v1414_v9, %v1402_v48  ;;  %v1731_v60 = vand.u32 2147483647, %v7696_v21  ;;  %v6031_v9 = vld [vmem:[%s9182_s3 + $0x500] sm:$0xf0] }
  0xe4   :  { %3477 = vmatpush.bf16.msrb.mxu1 %v4714_v52  ;;  %v5001_v52 = vld [vmem:[%s9182_s3 + $0x240] sm:$0xf]  ;;  %v1723_v56 = vmul.f32 %v6123_v51, %v7696_v21  ;;  %vm1728_vm10 = vweird.f32 %v6123_v51  ;;  %v5350_v16 = vor.u32 %v6031_v9, %v5349_v6  ;;  %v5121_v21 = vld [vmem:[%s9182_s3 + $0x330] sm:$0xf]  ;;  %v6019_v6 = vld [vmem:[%s9182_s3 + $0x4a0] sm:$0xf0] }
  0xe5   :  { %3500 = vmatpush.bf16.msra.mxu0 %v4942_v59  ;;  %3490 = vmatpush.bf16.msrb.mxu3 %v4810_v11  ;;  %v1390_v49 = vpop.f32.mrf.mxu2  ;;  %v5361_v59 = vld [vmem:[%s9182_s3 + $0x510] sm:$0xf]  ;;  %v5002_v63 = vor.u32 %v5944_v44, %v5001_v52  ;;  %v4704_v3 = vmul.f32 -1.442695, %v7750_v57  ;;  %vm7778_vm11 = vmor %vm1727_vm9, %vm1728_vm10  ;;  %vm1732_vm12 = vcmp.eq.f32.partialorder %v1731_v60, 8.507059e+37  ;;  %v5122_v27 = vor.u32 %v5974_v23, %v5121_v21 }
  0xe6   :  { %v1724_v2 = vsub.f32 1.0, %v1723_v56  ;;  %v5362_v11 = vor.u32 %v6034_v1, %v5361_v59  ;;  %v5097_v52 = vld [vmem:[%s9182_s3 + $0x300] sm:$0xf]  ;;  %v5968_v44 = vld [vmem:[%s9182_s3 + $0x308] sm:$0xf0] }
  0xe7   :  { %3478 = vmatmul.bf16.vlgmr.msrb.gmra.mxu1 %v7680_v8  ;;  %3513 = vmatpush.bf16.msra.mxu2 %v5038_v13  ;;  %6124 = vpow2.f32 %v4704_v3  ;;  %v1734_v13 = vor.u32 1.1754944e-38, %v1733_v61  ;;  %v6022_v56 = vld [vmem:[%s9182_s3 + $0x4b8] sm:$0xf0]  ;;  %v5098_v59 = vor.u32 %v5968_v44, %v5097_v52  ;;  %v5469_v61 = vld [vmem:[%s9182_s3 + $0x5e8] sm:$0xf] }
  0xe8   :  { %3522 = vmatpush.bf16.msra.mxu1 %v5182_v54  ;;  %3491 = vmatmul.bf16.vlgmr.msrb.gmra.mxu3 %v7718_v36  ;;  %v1725_v7 = vmul.f32 %v6123_v51, %v1724_v2  ;;  %v1403_v14 = vpop.f32.mrf.mxu0  ;;  %v242_v54 = vperm.slane %v7296_v32, 4  ;;  %v5314_v60 = vor.u32 %v6022_v56, %v5313_v53  ;;  %v5241_v1 = vld [vmem:[%s9182_s3 + $0x420] sm:$0xf]  ;;  %v6004_v2 = vld [vmem:[%s9182_s3 + $0x428] sm:$0xf0] }
  0xe9   :  { %3501 = vmatpush.bf16.msra.mxu0 %v4930_v10  ;;  %3535 = vmatpush.bf16.msra.mxu3 %v5278_v20  ;;  %v5242_v4 = vor.u32 %v6004_v2, %v5241_v1  ;;  %v5457_v9 = vld [vmem:[%s9182_s3 + $0x5d0] sm:$0xf]  ;;  %v6058_v10 = vld [vmem:[%s9182_s3 + $0x5d8] sm:$0xf0]  ;;  %v5302_v14 = vor.u32 %v6019_v6, %v5301_v5  ;;  %v6016_v20 = vld [vmem:[%s9182_s3 + $0x488] sm:$0xf0] }
  0xea   :  { %v1726_v17 = vadd.f32 %v6123_v51, %v1725_v7  ;;  %v5445_v21 = vld [vmem:[%s9182_s3 + $0x5b8] sm:$0xf]  ;;  %v5995_v52 = vld [vmem:[%s9182_s3 + $0x3e0] sm:$0xf0]  ;;  %v5421_v53 = vld [vmem:[%s9182_s3 + $0x588] sm:$0xf] }
  0xeb   :  { %3514 = vmatpush.bf16.msra.mxu2 %v5026_v26  ;;  %v5886_v2 = vld [vmem:[%s9182_s3 + $0x7c] sm:$0xf]  ;;  %v5193_v5 = vld [vmem:[%s9182_s3 + $0x3c0] sm:$0xf]  ;;  %v5992_v6 = vld [vmem:[%s9182_s3 + $0x3c8] sm:$0xf0] }
  0xec   :  { %3523 = vmatpush.bf16.msra.mxu1 %v5170_v35  ;;  %v1730_v24 = vsel %vm7778_vm11, %v6123_v51, %v1726_v17  ;;  %v5254_v51 = vor.u32 %v6007_v47, %v5253_v46  ;;  %v4787_v46 = vld [vmem:[%s9182_s3 + $0x9c] sm:$0xf0] }
  0xed   :  { %3502 = vmatpush.bf16.msra.mxu0 %v4918_v25  ;;  %v6028_v25 = vld [vmem:[%s9182_s3 + $0x4e8] sm:$0xf0]  ;;  %v1735_v26 = vsel %vm1732_vm12, %v1734_v13, %v1730_v24  ;;  %v6125_v29 = vpop.eup %6124  ;;  %3536 = vmatpush.bf16.msra.mxu3 %v5266_v22  ;;  %v6055_v24 = vld [vmem:[%s9182_s3 + $0x5c0] sm:$0xf0] }
  0xee   :  { %v1427_v55 = vpop.f32.mrf.mxu3  ;;  %v1453_v19 = vpop.f32.mrf.mxu2  ;;  %v5338_v28 = vor.u32 %v6028_v25, %v5337_v12  ;;  %v1844_v30 = vmul.f32 %v1735_v26, %v7628_v37  ;;  %v7810_v35 = vadd.f32 1.0, %v6125_v29  ;;  %v5971_v37 = vld [vmem:[%s9182_s3 + $0x320] sm:$0xf0]  ;;  %v5892_v25 = vld [vmem:[%s9182_s3 + $0xac] sm:$0xf] }
  0xef   :  { %3515 = vmatpush.bf16.msra.mxu2 %v5014_v40  ;;  %v1428_v33 = vadd.f32 %v1427_v55, %v242_v54  ;;  %v5325_v40 = vld [vmem:[%s9182_s3 + $0x4c8] sm:$0xf]  ;;  %v5110_v42 = vor.u32 %v5971_v37, %v5109_v38  ;;  %v5230_v55 = vor.u32 %v6001_v62, %v5229_v18  ;;  %v4799_v26 = vld [vmem:[%s9182_s3 + $0xb4] sm:$0xf0]  ;;  %v5883_v18 = vld [vmem:[%s9182_s3 + $0x64] sm:$0xf] }
  0xf0   :  { %3524 = vmatpush.bf16.msra.mxu1 %v5158_v45  ;;  %6126 = vrcp.f32 %v7810_v35  ;;  %v5326_v45 = vor.u32 %v6025_v41, %v5325_v40  ;;  %v1746_v13 = vand.u32 2147483647, %v7810_v35  ;;  %v1748_v17 = vand.u32 2147483648, %v7810_v35  ;;  %v6052_v41 = vld [vmem:[%s9182_s3 + $0x5a8] sm:$0xf0] }
  0xf1   :  { %3503 = vmatpush.bf16.msra.mxu0 %v4906_v39  ;;  %v7818_v39 = vpack.c.bf16 %v1844_v30, %v1844_v30  ;;  %3537 = vmatpush.bf16.msra.mxu3 %v5254_v51  ;;  %vm1742_vm13 = vweird.f32 %v7810_v35  ;;  %v243_v30 = vperm.slane %v7296_v32, 5  ;;  %v4802_v31 = vor.u32 %v5892_v25, %v4799_v26  ;;  %v5433_v32 = vld [vmem:[%s9182_s3 + $0x5a0] sm:$0xf]  ;;  %v5205_v51 = vld [vmem:[%s9182_s3 + $0x3d8] sm:$0xf] }
  0xf2   :  { %v1749_v38 = vor.u32 1.1754944e-38, %v1748_v17  ;;  %vm1747_vm0 = vcmp.eq.f32.partialorder %v1746_v13, 8.507059e+37  ;;  %v5206_v44 = vor.u32 %v5995_v52, %v5205_v51  ;;  %v6046_v13 = vld [vmem:[%s9182_s3 + $0x578] sm:$0xf0]  ;;  %v5397_v25 = vld [vmem:[%s9182_s3 + $0x558] sm:$0xf] }
  0xf3   :  { %3516 = vmatpush.bf16.msra.mxu2 %v5002_v63  ;;  %v6061_v63 = vld [vmem:[%s9182_s3 + $0x5f0] sm:$0xf0]  ;;  %v6043_v26 = vld [vmem:[%s9182_s3 + $0x560] sm:$0xf0]  ;;  %v4739_v51 = vld [vmem:[%s9182_s3 + $0x3c] sm:$0xf0] }
  0xf4   :  { %3525 = vmatpush.bf16.msra.mxu1 %v5146_v0  ;;  %v1440_v43 = vpop.f32.mrf.mxu1  ;;  %3504 = vmatmul.bf16.vlgmr.msra.gmra.mxu0 %v7818_v39  ;;  %v5470_v0 = vor.u32 %v6061_v63, %v5469_v61  ;;  %v5565_v61 = vld [vmem:[%s9182_s3 + $0x6a8] sm:$0xf]  ;;  %v6085_v63 = vld [vmem:[%s9182_s3 + $0x6b0] sm:$0xf0] }
  0xf5   :  { %3548 = vmatpush.bf16.msrb.mxu0 %v5374_v50  ;;  %v1441_v48 = vadd.f32 %v1440_v43, %v1428_v33  ;;  %3538 = vmatpush.bf16.msra.mxu3 %v5242_v4  ;;  %v5998_v33 = vld [vmem:[%s9182_s3 + $0x3f8] sm:$0xf0]  ;;  %v5566_v1 = vor.u32 %v6085_v63, %v5565_v61 }
  0xf6   :  { %v1429_v49 = vpop.f32.mrf.mxu3  ;;  %v1455_v50 = vpop.f32.mrf.mxu2  ;;  %v5218_v40 = vor.u32 %v5998_v33, %v5217_v34 }
  0xf7   :  { %v7846_v58 = vadd.f32 %v1453_v19, %v1441_v48  ;;  %v6127_v3 = vpop.eup %6126  ;;  %3561 = vmatpush.bf16.msrb.mxu2 %v5470_v0  ;;  %v5289_v19 = vld [vmem:[%s9182_s3 + $0x480] sm:$0xf] }
  0xf8   :  { %3526 = vmatpush.bf16.msra.mxu1 %v5134_v15  ;;  %v1738_v7 = vmul.f32 %v6127_v3, %v7810_v35  ;;  %v5458_v15 = vor.u32 %v6058_v10, %v5457_v9  ;;  %vm1743_vm14 = vweird.f32 %v6127_v3  ;;  %v5889_v35 = vld [vmem:[%s9182_s3 + $0x94] sm:$0xf]  ;;  %v5194_v9 = vor.u32 %v5992_v6, %v5193_v5  ;;  %v5409_v10 = vld [vmem:[%s9182_s3 + $0x570] sm:$0xf]  ;;  %v5874_v6 = vld [vmem:[%s9182_s3 + $0x1c] sm:$0xf] }
  0xf9   :  { %3549 = vmatpush.bf16.msrb.mxu0 %v5362_v11  ;;  %v4705_v11 = vmul.f32 -1.442695, %v7846_v58  ;;  %3539 = vmatpush.bf16.msra.mxu3 %v5230_v55  ;;  %vm1744_vm15 = vmor %vm1742_vm13, %vm1743_vm14  ;;  %v4790_v50 = vor.u32 %v5889_v35, %v4787_v46  ;;  %v5410_v17 = vor.u32 %v6046_v13, %v5409_v10  ;;  %v6040_v35 = vld [vmem:[%s9182_s3 + $0x548] sm:$0xf0]  ;;  %v5529_v46 = vld [vmem:[%s9182_s3 + $0x660] sm:$0xf] }
  0xfa   :  { %v4883_v10 = vld [vmem:[%s9182_s3 + $0x15c] sm:$0xf0] }
  0xfb   :  { %6128 = vpow2.f32 %v4705_v11  ;;  %3562 = vmatpush.bf16.msrb.mxu2 %v5458_v15 }
  0xfc   :  { %3527 = vmatpush.bf16.msra.mxu1 %v5122_v27  ;;  %v1442_v54 = vpop.f32.mrf.mxu1  ;;  %v5290_v27 = vor.u32 %v6016_v20, %v5289_v19  ;;  %v4763_v19 = vld [vmem:[%s9182_s3 + $0x6c] sm:$0xf0] }
  0xfd   :  { %3550 = vmatpush.bf16.msrb.mxu0 %v5350_v16  ;;  %v1739_v16 = vsub.f32 1.0, %v1738_v7  ;;  %3540 = vmatpush.bf16.msra.mxu3 %v5218_v40  ;;  %v6082_v54 = vld [vmem:[%s9182_s3 + $0x698] sm:$0xf0] }
  0xfe   :  { %v7892_v12 = vpop.f32.mrf.mxu3 }
  0xff   :  { %v1740_v23 = vmul.f32 %v6127_v3, %v1739_v16 }
 0x100   :  { %3528 = vmatpush.bf16.msra.mxu1 %v5110_v42 }
 0x101   :  { %3551 = vmatpush.bf16.msrb.mxu0 %v5338_v28  ;;  %v5446_v28 = vor.u32 %v6055_v24, %v5445_v21  ;;  %v1741_v29 = vadd.f32 %v6127_v3, %v1740_v23  ;;  %v6129_v22 = vpop.eup %6128  ;;  %3541 = vmatpush.bf16.msra.mxu3 %v5206_v44 }
 0x102   :  { %v7919_v43 = vadd.f32 1.0, %v6129_v22  ;;  %v4751_v22 = vld [vmem:[%s9182_s3 + $0x54] sm:$0xf0] }
 0x103   :  { %v1466_v37 = vpop.f32.mrf.mxu0  ;;  %v1745_v42 = vsel %vm1744_vm15, %v6127_v3, %v1741_v29  ;;  %3563 = vmatpush.bf16.msrb.mxu2 %v5446_v28  ;;  %v4775_v3 = vld [vmem:[%s9182_s3 + $0x84] sm:$0xf0]  ;;  %v5541_v28 = vld [vmem:[%s9182_s3 + $0x678] sm:$0xf]  ;;  %v6079_v29 = vld [vmem:[%s9182_s3 + $0x680] sm:$0xf0] }
 0x104   :  { %3529 = vmatpush.bf16.msra.mxu1 %v5098_v59  ;;  %v1750_v47 = vsel %vm1747_vm0, %v1749_v38, %v1745_v42  ;;  %6130 = vrcp.f32 %v7919_v43  ;;  %v1467_v49 = vadd.f32 %v1466_v37, %v243_v30  ;;  %v4778_v4 = vor.u32 %v5886_v2, %v4775_v3  ;;  %v5880_v30 = vld [vmem:[%s9182_s3 + $0x4c] sm:$0xf] }
 0x105   :  { %3552 = vmatpush.bf16.msrb.mxu0 %v5326_v45  ;;  %v5434_v45 = vor.u32 %v6052_v41, %v5433_v32  ;;  %v1845_v48 = vmul.f32 %v1750_v47, %v7750_v57  ;;  %v6049_v57 = vld [vmem:[%s9182_s3 + $0x590] sm:$0xf0]  ;;  %v1761_v20 = vand.u32 2147483647, %v7919_v43  ;;  %v1763_v21 = vand.u32 2147483648, %v7919_v43  ;;  %3542 = vmatpush.bf16.msra.mxu3 %v5194_v9  ;;  %v8020_v32 = vld [vmem:[%s9181_s2] sm:$0xff] }
 0x106   :  { %v1494_v59 = vpop.f32.mrf.mxu3  ;;  %vm1757_vm1 = vweird.f32 %v7919_v43  ;;  %v5542_v33 = vor.u32 %v6079_v29, %v5541_v28  ;;  %v244_v41 = vperm.slane %v8020_v32, 6  ;;  %v4754_v42 = vor.u32 %v5880_v30, %v4751_v22  ;;  %v5649_v30 = vld [vmem:[%s9182_s3 + $0x750] sm:$0xf]  ;;  %v5493_v22 = vld [vmem:[%s9182_s3 + $0x618] sm:$0xf] }
 0x107   :  { %v7941_v56 = vpack.c.bf16 %v1845_v48, %v1845_v48  ;;  %3564 = vmatpush.bf16.msrb.mxu2 %v5434_v45  ;;  %vm8013_vm4 = vcmp.eq.f32.partialorder %v1761_v20, 8.507059e+37  ;;  %v1764_v40 = vor.u32 1.1754944e-38, %v1763_v21  ;;  %v4895_v59 = vld [vmem:[%s9182_s3 + $0x174] sm:$0xf0]  ;;  %v6070_v20 = vld [vmem:[%s9182_s3 + $0x638] sm:$0xf0] }
 0x108   :  { %v1479_v0 = vpop.f32.mrf.mxu2  ;;  %3574 = vmatpush.bf16.msrb.mxu1 %v5566_v1  ;;  %v5871_v21 = vld [vmem:[%s9182_s3 + $0x4] sm:$0xf] }
 0x109   :  { %3553 = vmatpush.bf16.msrb.mxu0 %v5314_v60  ;;  %v5422_v60 = vor.u32 %v6049_v57, %v5421_v53  ;;  %v1480_v11 = vadd.f32 %v1479_v0, %v1467_v49  ;;  %3517 = vmatmul.bf16.vlgmr.msra.gmra.mxu2 %v7941_v56  ;;  %v6076_v49 = vld [vmem:[%s9182_s3 + $0x668] sm:$0xf0] }
 0x10a   :  { %v6131_v15 = vpop.eup %6130  ;;  %v5530_v53 = vor.u32 %v6076_v49, %v5529_v46  ;;  %v5916_v57 = vld [vmem:[%s9182_s3 + $0x16c] sm:$0xf]  ;;  %v6103_v49 = vld [vmem:[%s9182_s3 + $0x740] sm:$0xf0] }
 0x10b   :  { %v1468_v7 = vpop.f32.mrf.mxu0  ;;  %v7972_v16 = vadd.f32 %v7892_v12, %v1480_v11  ;;  %3565 = vmatpush.bf16.msrb.mxu2 %v5422_v60  ;;  %v1753_v62 = vmul.f32 %v6131_v15, %v7919_v43  ;;  %v4766_v12 = vor.u32 %v5883_v18, %v4763_v19  ;;  %vm1758_vm2 = vweird.f32 %v6131_v15  ;;  %v5385_v43 = vld [vmem:[%s9182_s3 + $0x540] sm:$0xf]  ;;  %v5517_v11 = vld [vmem:[%s9182_s3 + $0x648] sm:$0xf] }
 0x10c   :  { %vm8009_vm3 = vmor %vm1757_vm1, %vm1758_vm2  ;;  %v5386_v48 = vor.u32 %v6040_v35, %v5385_v43  ;;  %v4898_v0 = vor.u32 %v5916_v57, %v4895_v59  ;;  %v5913_v7 = vld [vmem:[%s9182_s3 + $0x154] sm:$0xf]  ;;  %v5904_v59 = vld [vmem:[%s9182_s3 + $0x10c] sm:$0xf] }
 0x10d   :  { %3554 = vmatpush.bf16.msrb.mxu0 %v5302_v14  ;;  %v5553_v14 = vld [vmem:[%s9182_s3 + $0x690] sm:$0xf]  ;;  %v4706_v23 = vmul.f32 -1.442695, %v7972_v16  ;;  %v1754_v24 = vsub.f32 1.0, %v1753_v62 }
 0x10e   :  { %v5554_v55 = vor.u32 %v6082_v54, %v5553_v14  ;;  %v6109_v54 = vld [vmem:[%s9182_s3 + $0x770] sm:$0xf0] }
 0x10f   :  { %6132 = vpow2.f32 %v4706_v23  ;;  %3566 = vmatpush.bf16.msrb.mxu2 %v5410_v17  ;;  %v5661_v17 = vld [vmem:[%s9182_s3 + $0x768] sm:$0xf] }
 0x110   :  { %3575 = vmatpush.bf16.msrb.mxu1 %v5554_v55  ;;  %v1481_v34 = vpop.f32.mrf.mxu2  ;;  %v5662_v62 = vor.u32 %v6109_v54, %v5661_v17  ;;  %v5505_v55 = vld [vmem:[%s9182_s3 + $0x630] sm:$0xf]  ;;  %v5901_v17 = vld [vmem:[%s9182_s3 + $0xf4] sm:$0xf]  ;;  %v4835_v54 = vld [vmem:[%s9182_s3 + $0xfc] sm:$0xf0] }
 0x111   :  { %3555 = vmatpush.bf16.msrb.mxu0 %v5290_v27  ;;  %v5398_v27 = vor.u32 %v6043_v26, %v5397_v25  ;;  %v4715_v25 = vld [vmem:[%s9182_s3 + $0xc] sm:$0xf0]  ;;  %v5910_v26 = vld [vmem:[%s9182_s3 + $0x13c] sm:$0xf] }
 0x112   :  { %3587 = vmatpush.bf16.msrb.mxu3 %v5662_v62  ;;  %v4718_v28 = vor.u32 %v5871_v21, %v4715_v25  ;;  %v4979_v62 = vld [vmem:[%s9182_s3 + $0x21c] sm:$0xf0] }
 0x113   :  { %3567 = vmatpush.bf16.msrb.mxu2 %v5398_v27  ;;  %v1531_v44 = vpop.f32.mrf.mxu0  ;;  %v4871_v27 = vld [vmem:[%s9182_s3 + $0x144] sm:$0xf0] }
 0x114   :  { %3576 = vmatpush.bf16.msrb.mxu1 %v5542_v33  ;;  %v1505_v47 = vpop.f32.mrf.mxu1  ;;  %v4874_v29 = vor.u32 %v5910_v26, %v4871_v27  ;;  %v6106_v33 = vld [vmem:[%s9182_s3 + $0x758] sm:$0xf0]  ;;  %v4823_v26 = vld [vmem:[%s9182_s3 + $0xe4] sm:$0xf0] }
 0x115   :  { %3600 = vmatpush.bf16.msra.mxu0 %v4802_v31  ;;  %v1755_v31 = vmul.f32 %v6131_v15, %v1754_v24  ;;  %v6133_v60 = vpop.eup %6132  ;;  %v1506_v3 = vadd.f32 %v1505_v47, %v244_v41  ;;  %v5506_v24 = vor.u32 %v6070_v20, %v5505_v55  ;;  %v5650_v37 = vor.u32 %v6106_v33, %v5649_v30  ;;  %v5907_v41 = vld [vmem:[%s9182_s3 + $0x124] sm:$0xf]  ;;  %v4967_v30 = vld [vmem:[%s9182_s3 + $0x204] sm:$0xf0]  ;;  %v5601_v33 = vld [vmem:[%s9182_s3 + $0x6f0] sm:$0xf] }
 0x116   :  { %v8052_v2 = vadd.f32 1.0, %v6133_v60  ;;  %v4847_v60 = vld [vmem:[%s9182_s3 + $0x114] sm:$0xf0] }
 0x117   :  { %v1756_v45 = vadd.f32 %v6131_v15, %v1755_v31  ;;  %3568 = vmatpush.bf16.msrb.mxu2 %v5386_v48  ;;  %3588 = vmatpush.bf16.msrb.mxu3 %v5650_v37  ;;  %v5637_v48 = vld [vmem:[%s9182_s3 + $0x738] sm:$0xf]  ;;  %v6094_v37 = vld [vmem:[%s9182_s3 + $0x6f8] sm:$0xf0] }
 0x118   :  { %3577 = vmatpush.bf16.msrb.mxu1 %v5530_v53  ;;  %6134 = vrcp.f32 %v8052_v2  ;;  %vm1772_vm5 = vweird.f32 %v8052_v2 }
 0x119   :  { %3601 = vmatpush.bf16.msra.mxu0 %v4790_v50  ;;  %v5877_v50 = vld [vmem:[%s9182_s3 + $0x34] sm:$0xf]  ;;  %v1760_v52 = vsel %vm8009_vm3, %v6131_v15, %v1756_v45  ;;  %v4886_v15 = vor.u32 %v5913_v7, %v4883_v10  ;;  %v1778_v45 = vand.u32 2147483648, %v8052_v2  ;;  %v245_v7 = vperm.slane %v8020_v32, 7 }
 0x11a   :  { %v1765_v61 = vsel %vm8013_vm4, %v1764_v40, %v1760_v52  ;;  %v4742_v63 = vor.u32 %v5877_v50, %v4739_v51  ;;  %v1518_v13 = vpop.f32.mrf.mxu3  ;;  %v6067_v40 = vld [vmem:[%s9182_s3 + $0x620] sm:$0xf0]  ;;  %v1776_v50 = vand.u32 2147483647, %v8052_v2  ;;  %v5638_v51 = vor.u32 %v6103_v49, %v5637_v48  ;;  %v5481_v52 = vld [vmem:[%s9182_s3 + $0x600] sm:$0xf] }
 0x11b   :  { %v1846_v1 = vmul.f32 %v1765_v61, %v7846_v58  ;;  %v4727_v58 = vld [vmem:[%s9182_s3 + $0x24] sm:$0xf0]  ;;  %3613 = vmatpush.bf16.msra.mxu2 %v4898_v0  ;;  %v1519_v18 = vadd.f32 %v1518_v13, %v1506_v3  ;;  %v5494_v43 = vor.u32 %v6067_v40, %v5493_v22  ;;  %v5940_v61 = vld [vmem:[%s9182_s3 + $0x22c] sm:$0xf]  ;;  %v4991_v3 = vld [vmem:[%s9182_s3 + $0x234] sm:$0xf0] }
 0x11c   :  { %v4730_v14 = vor.u32 %v5874_v6, %v4727_v58  ;;  %v1507_v19 = vpop.f32.mrf.mxu1  ;;  %3589 = vmatpush.bf16.msrb.mxu3 %v5638_v51  ;;  %v6100_v6 = vld [vmem:[%s9182_s3 + $0x728] sm:$0xf0]  ;;  %vm1777_vm8 = vcmp.eq.f32.partialorder %v1776_v50, 8.507059e+37  ;;  %v5937_v32 = vld [vmem:[%s9182_s3 + $0x214] sm:$0xf] }
 0x11d   :  { %3602 = vmatpush.bf16.msra.mxu0 %v4778_v4  ;;  %v6073_v4 = vld [vmem:[%s9182_s3 + $0x650] sm:$0xf0]  ;;  %v8069_v9 = vpack.c.bf16 %v1846_v1, %v1846_v1  ;;  %v8091_v23 = vadd.f32 %v1531_v44, %v1519_v18  ;;  %v6064_v44 = vld [vmem:[%s9182_s3 + $0x608] sm:$0xf0]  ;;  %v4850_v1 = vor.u32 %v5904_v59, %v4847_v60  ;;  %v5613_v19 = vld [vmem:[%s9182_s3 + $0x708] sm:$0xf]  ;;  %v4982_v21 = vor.u32 %v5937_v32, %v4979_v62 }
 0x11e   :  { %v5518_v5 = vor.u32 %v6073_v4, %v5517_v11  ;;  %v6135_v31 = vpop.eup %6134  ;;  %v5482_v57 = vor.u32 %v6064_v44, %v5481_v52  ;;  %v4994_v4 = vor.u32 %v5940_v61, %v4991_v3  ;;  %v4955_v48 = vld [vmem:[%s9182_s3 + $0x1ec] sm:$0xf0]  ;;  %v8222_v51 = vld [vmem:[%s9181_s2 + $0x8] sm:$0x3]  ;;  %v6091_v59 = vld [vmem:[%s9182_s3 + $0x6e0] sm:$0xf0] }
 0x11f   :  { %3530 = vmatmul.bf16.vlgmr.msra.gmra.mxu1 %v8069_v9  ;;  %3614 = vmatpush.bf16.msra.mxu2 %v4886_v15  ;;  %v4707_v34 = vmul.f32 -1.442695, %v8091_v23  ;;  %v1768_v38 = vmul.f32 %v6135_v31, %v8052_v2  ;;  %vm1773_vm6 = vweird.f32 %v6135_v31  ;;  %v4838_v2 = vor.u32 %v5901_v17, %v4835_v54  ;;  %v5928_v60 = vld [vmem:[%s9182_s3 + $0x1cc] sm:$0xf]  ;;  %v4943_v61 = vld [vmem:[%s9182_s3 + $0x1d4] sm:$0xf0] }
 0x120   :  { %3578 = vmatpush.bf16.msrb.mxu1 %v5518_v5  ;;  %v5625_v5 = vld [vmem:[%s9182_s3 + $0x720] sm:$0xf]  ;;  %vm1774_vm7 = vmor %vm1772_vm5, %vm1773_vm6  ;;  %v5925_v54 = vld [vmem:[%s9182_s3 + $0x1b4] sm:$0xf] }
 0x121   :  { %3603 = vmatpush.bf16.msra.mxu0 %v4766_v12  ;;  %v1533_v12 = vpop.f32.mrf.mxu0  ;;  %6136 = vpow2.f32 %v4707_v34  ;;  %v1769_v46 = vsub.f32 1.0, %v1768_v38  ;;  %v5626_v13 = vor.u32 %v6100_v6, %v5625_v5  ;;  %v5577_v5 = vld [vmem:[%s9182_s3 + $0x6c0] sm:$0xf]  ;;  %v6088_v6 = vld [vmem:[%s9182_s3 + $0x6c8] sm:$0xf0] }
 0x122   :  { %v1520_v47 = vpop.f32.mrf.mxu3  ;;  %v6097_v12 = vld [vmem:[%s9182_s3 + $0x710] sm:$0xf0]  ;;  %v5988_v32 = vld [vmem:[%s9182_s3 + $0x3ac] sm:$0xf]  ;;  %v5183_v62 = vld [vmem:[%s9182_s3 + $0x3b4] sm:$0xf0] }
 0x123   :  { %3615 = vmatpush.bf16.msra.mxu2 %v4874_v29  ;;  %v1770_v53 = vmul.f32 %v6135_v31, %v1769_v46  ;;  %3590 = vmatpush.bf16.msrb.mxu3 %v5626_v13  ;;  %v5614_v25 = vor.u32 %v6097_v12, %v5613_v19  ;;  %v5934_v29 = vld [vmem:[%s9182_s3 + $0x1fc] sm:$0xf]  ;;  %v5964_v13 = vld [vmem:[%s9182_s3 + $0x2ec] sm:$0xf]  ;;  %v5147_v3 = vld [vmem:[%s9182_s3 + $0x36c] sm:$0xf0] }
 0x124   :  { %3579 = vmatpush.bf16.msrb.mxu1 %v5506_v24  ;;  %v1570_v0 = vpop.f32.mrf.mxu1  ;;  %v4970_v34 = vor.u32 %v5934_v29, %v4967_v30  ;;  %v5922_v29 = vld [vmem:[%s9182_s3 + $0x19c] sm:$0xf] }
 0x125   :  { %3604 = vmatpush.bf16.msra.mxu0 %v4754_v42  ;;  %v4859_v42 = vld [vmem:[%s9182_s3 + $0x12c] sm:$0xf0]  ;;  %v1771_v11 = vadd.f32 %v6135_v31, %v1770_v53 }
 0x126   :  { %v4862_v35 = vor.u32 %v5907_v41, %v4859_v42  ;;  %v5602_v41 = vor.u32 %v6094_v37, %v5601_v33  ;;  %v5895_v42 = vld [vmem:[%s9182_s3 + $0xc4] sm:$0xf]  ;;  %v4919_v33 = vld [vmem:[%s9182_s3 + $0x1a4] sm:$0xf0] }
 0x127   :  { %v6137_v58 = vpop.eup %6136  ;;  %3591 = vmatpush.bf16.msrb.mxu3 %v5614_v25  ;;  %v4922_v37 = vor.u32 %v5922_v29, %v4919_v33 }
 0x128   :  { %3580 = vmatpush.bf16.msrb.mxu1 %v5494_v43  ;;  %3616 = vmatpush.bf16.msra.mxu2 %v4862_v35  ;;  %v1544_v10 = vpop.f32.mrf.mxu2  ;;  %v8159_v15 = vadd.f32 1.0, %v6137_v58  ;;  %v5931_v43 = vld [vmem:[%s9182_s3 + $0x1e4] sm:$0xf] }
 0x129   :  { %3605 = vmatpush.bf16.msra.mxu0 %v4742_v63  ;;  %v1779_v63 = vor.u32 1.1754944e-38, %v1778_v45  ;;  %v1545_v20 = vadd.f32 %v1544_v10, %v245_v7  ;;  %v4811_v45 = vld [vmem:[%s9182_s3 + $0xcc] sm:$0xf0]  ;;  %v4958_v52 = vor.u32 %v5931_v43, %v4955_v48  ;;  %v246_v7 = vperm.slane %v8222_v51, 0 }
 0x12a   :  { %6138 = vrcp.f32 %v8159_v15  ;;  %v4814_v47 = vor.u32 %v5895_v42, %v4811_v45  ;;  %v1791_v49 = vand.u32 2147483647, %v8159_v15  ;;  %v1793_v50 = vand.u32 2147483648, %v8159_v15 }
 0x12b   :  { %vm1787_vm9 = vweird.f32 %v8159_v15  ;;  %3592 = vmatpush.bf16.msrb.mxu3 %v5602_v41  ;;  %v5578_v10 = vor.u32 %v6088_v6, %v5577_v5  ;;  %v5063_v41 = vld [vmem:[%s9182_s3 + $0x2c4] sm:$0xf0]  ;;  %v5952_v5 = vld [vmem:[%s9182_s3 + $0x28c] sm:$0xf] }
 0x12c   :  { %3581 = vmatpush.bf16.msrb.mxu1 %v5482_v57  ;;  %3617 = vmatpush.bf16.msra.mxu2 %v4850_v1  ;;  %v1572_v27 = vpop.f32.mrf.mxu1  ;;  %v5589_v57 = vld [vmem:[%s9182_s3 + $0x6d8] sm:$0xf]  ;;  %v4946_v1 = vor.u32 %v5928_v60, %v4943_v61  ;;  %vm1792_vm12 = vcmp.eq.f32.partialorder %v1791_v49, 8.507059e+37  ;;  %v5982_v49 = vld [vmem:[%s9182_s3 + $0x37c] sm:$0xf] }
 0x12d   :  { %3606 = vmatpush.bf16.msra.mxu0 %v4730_v14  ;;  %v1775_v14 = vsel %vm1774_vm7, %v6135_v31, %v1771_v11  ;;  %v1794_v11 = vor.u32 1.1754944e-38, %v1793_v50  ;;  %v5186_v27 = vor.u32 %v5988_v32, %v5183_v62  ;;  %v5159_v50 = vld [vmem:[%s9182_s3 + $0x384] sm:$0xf0] }
 0x12e   :  { %v1780_v18 = vsel %vm1777_vm8, %v1779_v63, %v1775_v14  ;;  %v5087_v14 = vld [vmem:[%s9182_s3 + $0x2f4] sm:$0xf0]  ;;  %v5162_v61 = vor.u32 %v5982_v49, %v5159_v50  ;;  %v5967_v50 = vld [vmem:[%s9182_s3 + $0x304] sm:$0xf] }
 0x12f   :  { %v1847_v55 = vmul.f32 %v1780_v18, %v7972_v16  ;;  %v5898_v16 = vld [vmem:[%s9182_s3 + $0xdc] sm:$0xf]  ;;  %v5090_v17 = vor.u32 %v5964_v13, %v5087_v14  ;;  %v4931_v18 = vld [vmem:[%s9182_s3 + $0x1bc] sm:$0xf0]  ;;  %v5976_v14 = vld [vmem:[%s9182_s3 + $0x34c] sm:$0xf] }
 0x130   :  { %3626 = vmatpush.bf16.msra.mxu1 %v4994_v4  ;;  %3618 = vmatpush.bf16.msra.mxu2 %v4838_v2  ;;  %v1546_v38 = vpop.f32.mrf.mxu2  ;;  %v6139_v40 = vpop.eup %6138 }
 0x131   :  { %3607 = vmatpush.bf16.msra.mxu0 %v4718_v28  ;;  %v8181_v24 = vpack.c.bf16 %v1847_v55, %v1847_v55  ;;  %v4826_v28 = vor.u32 %v5898_v16, %v4823_v26  ;;  %v1557_v31 = vpop.f32.mrf.mxu0  ;;  %v1783_v35 = vmul.f32 %v6139_v40, %v8159_v15  ;;  %vm1788_vm10 = vweird.f32 %v6139_v40  ;;  %v5961_v16 = vld [vmem:[%s9182_s3 + $0x2d4] sm:$0xf] }
 0x132   :  { %v1558_v22 = vadd.f32 %v1557_v31, %v1545_v20  ;;  %vm8238_vm11 = vmor %vm1787_vm9, %vm1788_vm10  ;;  %v4934_v55 = vor.u32 %v5925_v54, %v4931_v18  ;;  %v5171_v31 = vld [vmem:[%s9182_s3 + $0x39c] sm:$0xf0]  ;;  %vm3865_vm9 = vcmask 1041408   ;;  %vm3870_vm10 = vcmask 1043458  }
 0x133   :  { %3543 = vmatmul.bf16.vlgmr.msra.gmra.mxu3 %v8181_v24  ;;  %v1784_v44 = vsub.f32 1.0, %v1783_v35  ;;  %v5919_v35 = vld [vmem:[%s9182_s3 + $0x184] sm:$0xf] }
 0x134   :  { %3627 = vmatpush.bf16.msra.mxu1 %v4982_v21  ;;  %v8212_v46 = vadd.f32 %v1570_v0, %v1558_v22  ;;  %3619 = vmatpush.bf16.msra.mxu2 %v4826_v28  ;;  %v5590_v0 = vor.u32 %v6091_v59, %v5589_v57  ;;  %v5075_v28 = vld [vmem:[%s9182_s3 + $0x2dc] sm:$0xf0]  ;;  %v5955_v57 = vld [vmem:[%s9182_s3 + $0x2a4] sm:$0xf]  ;;  %v5051_v59 = vld [vmem:[%s9182_s3 + $0x2ac] sm:$0xf0] }
 0x135   :  { %v1785_v63 = vmul.f32 %v6139_v40, %v1784_v44 }
 0x136   :  { %v4708_v53 = vmul.f32 -1.442695, %v8212_v46  ;;  %3593 = vmatpush.bf16.msrb.mxu3 %v5590_v0 }
 0x137   :  { %v1786_v58 = vadd.f32 %v6139_v40, %v1785_v63  ;;  %v5054_v63 = vor.u32 %v5955_v57, %v5051_v59  ;;  %v5099_v59 = vld [vmem:[%s9182_s3 + $0x30c] sm:$0xf0] }
 0x138   :  { %3628 = vmatpush.bf16.msra.mxu1 %v4970_v34  ;;  %6140 = vpow2.f32 %v4708_v53  ;;  %3620 = vmatpush.bf16.msra.mxu2 %v4814_v47  ;;  %v5078_v34 = vor.u32 %v5961_v16, %v5075_v28  ;;  %v4907_v47 = vld [vmem:[%s9182_s3 + $0x18c] sm:$0xf0]  ;;  %v5279_v28 = vld [vmem:[%s9182_s3 + $0x474] sm:$0xf0] }
 0x139   :  { %v1559_v4 = vpop.f32.mrf.mxu0  ;;  %v1790_v2 = vsel %vm8238_vm11, %v6139_v40, %v1786_v58  ;;  %v5958_v40 = vld [vmem:[%s9182_s3 + $0x2bc] sm:$0xf]  ;;  %vm3871_vm11 = vmor %vm3870_vm10, %vm3865_vm9 }
 0x13a   :  { %v1609_v15 = vpop.f32.mrf.mxu2  ;;  %v1795_v19 = vsel %vm1792_vm12, %v1794_v11, %v1790_v2  ;;  %3594 = vmatpush.bf16.msrb.mxu3 %v5578_v10  ;;  %v5066_v43 = vor.u32 %v5958_v40, %v5063_v41  ;;  %v247_v2 = vperm.slane %v8222_v51, 1  ;;  %v5973_v51 = vld [vmem:[%s9182_s3 + $0x334] sm:$0xf]  ;;  %v5267_v41 = vld [vmem:[%s9182_s3 + $0x45c] sm:$0xf0]  ;;  %vm3872_vm12 = vcmask 521220  }
 0x13b   :  { %v1583_v20 = vpop.f32.mrf.mxu3  ;;  %v1848_v12 = vmul.f32 %v1795_v19, %v8091_v23  ;;  %v5985_v23 = vld [vmem:[%s9182_s3 + $0x394] sm:$0xf]  ;;  %v5027_v19 = vld [vmem:[%s9182_s3 + $0x27c] sm:$0xf0] }
 0x13c   :  { %3629 = vmatpush.bf16.msra.mxu1 %v4958_v52  ;;  %v1584_v25 = vadd.f32 %v1583_v20, %v246_v7  ;;  %v5174_v45 = vor.u32 %v5985_v23, %v5171_v31  ;;  %v4910_v52 = vor.u32 %v5919_v35, %v4907_v47  ;;  %v5039_v7 = vld [vmem:[%s9182_s3 + $0x294] sm:$0xf0]  ;;  %v6009_v40 = vld [vmem:[%s9182_s3 + $0x454] sm:$0xf] }
 0x13d   :  { %v8281_v30 = vpack.c.bf16 %v1848_v12, %v1848_v12  ;;  %v5270_v57 = vor.u32 %v6009_v40, %v5267_v41  ;;  %v5219_v41 = vld [vmem:[%s9182_s3 + $0x3fc] sm:$0xf0] }
 0x13e   :  { %v6141_v21 = vpop.eup %6140  ;;  %3639 = vmatpush.bf16.msra.mxu3 %v5090_v17  ;;  %v5042_v17 = vor.u32 %v5952_v5, %v5039_v7  ;;  %v5102_v7 = vor.u32 %v5967_v50, %v5099_v59  ;;  %v6030_v59 = vld [vmem:[%s9182_s3 + $0x4fc] sm:$0xf] }
 0x13f   :  { %v8273_v26 = vadd.f32 1.0, %v6141_v21  ;;  %3556 = vmatmul.bf16.vlgmr.msrb.gmra.mxu0 %v8281_v30 }
 0x140   :  { %3630 = vmatpush.bf16.msra.mxu1 %v4946_v1  ;;  %3652 = vmatpush.bf16.msrb.mxu0 %v5186_v27  ;;  %v5979_v1 = vld [vmem:[%s9182_s3 + $0x364] sm:$0xf]  ;;  %v6012_v27 = vld [vmem:[%s9182_s3 + $0x46c] sm:$0xf] }
 0x141   :  { %6142 = vrcp.f32 %v8273_v26  ;;  %v1808_v6 = vand.u32 2147483648, %v8273_v26  ;;  %v5150_v58 = vor.u32 %v5979_v1, %v5147_v3  ;;  %v1806_v13 = vand.u32 2147483647, %v8273_v26  ;;  %v5255_v1 = vld [vmem:[%s9182_s3 + $0x444] sm:$0xf0] }
 0x142   :  { %v1611_v42 = vpop.f32.mrf.mxu2  ;;  %3640 = vmatpush.bf16.msra.mxu3 %v5078_v34  ;;  %vm1802_vm14 = vweird.f32 %v8273_v26  ;;  %v5282_v33 = vor.u32 %v6012_v27, %v5279_v28  ;;  %v6084_v3 = vld [vmem:[%s9182_s3 + $0x6ac] sm:$0xf]  ;;  %v6078_v28 = vld [vmem:[%s9182_s3 + $0x67c] sm:$0xf] }
 0x143   :  { %v1585_v44 = vpop.f32.mrf.mxu3  ;;  %v1809_v20 = vor.u32 1.1754944e-38, %v1808_v6  ;;  %vm1807_vm0 = vcmp.eq.f32.partialorder %v1806_v13, 8.507059e+37  ;;  %v5015_v42 = vld [vmem:[%s9182_s3 + $0x264] sm:$0xf0] }
 0x144   :  { %3631 = vmatpush.bf16.msra.mxu1 %v4934_v55  ;;  %v1596_v22 = vpop.f32.mrf.mxu1  ;;  %3653 = vmatpush.bf16.msrb.mxu0 %v5174_v45  ;;  %v5949_v55 = vld [vmem:[%s9182_s3 + $0x274] sm:$0xf] }
 0x145   :  { %v1597_v38 = vadd.f32 %v1596_v22, %v1584_v25  ;;  %v5123_v25 = vld [vmem:[%s9182_s3 + $0x33c] sm:$0xf0]  ;;  %v5030_v16 = vor.u32 %v5949_v55, %v5027_v19  ;;  %v5970_v22 = vld [vmem:[%s9182_s3 + $0x31c] sm:$0xf] }
 0x146   :  { %3641 = vmatpush.bf16.msra.mxu3 %v5066_v43  ;;  %v5126_v34 = vor.u32 %v5973_v51, %v5123_v25  ;;  %v5231_v51 = vld [vmem:[%s9182_s3 + $0x414] sm:$0xf0] }
 0x147   :  { %v8306_v48 = vadd.f32 %v1609_v15, %v1597_v38  ;;  %v6143_v60 = vpop.eup %6142  ;;  %v5135_v15 = vld [vmem:[%s9182_s3 + $0x354] sm:$0xf0]  ;;  %v5111_v38 = vld [vmem:[%s9182_s3 + $0x324] sm:$0xf0] }
 0x148   :  { %3632 = vmatpush.bf16.msra.mxu1 %v4922_v37  ;;  %v1798_v0 = vmul.f32 %v6143_v60, %v8273_v26  ;;  %3654 = vmatpush.bf16.msrb.mxu0 %v5162_v61  ;;  %vm1803_vm13 = vweird.f32 %v6143_v60  ;;  %v5138_v12 = vor.u32 %v5976_v14, %v5135_v15  ;;  %v5946_v37 = vld [vmem:[%s9182_s3 + $0x25c] sm:$0xf]  ;;  %v5003_v61 = vld [vmem:[%s9182_s3 + $0x24c] sm:$0xf0] }
 0x149   :  { %v4709_v53 = vmul.f32 -1.442695, %v8306_v48  ;;  %vm1804_vm15 = vmor %vm1802_vm14, %vm1803_vm13  ;;  %v5018_v43 = vor.u32 %v5946_v37, %v5015_v42  ;;  %v5997_v37 = vld [vmem:[%s9182_s3 + $0x3f4] sm:$0xf]  ;;  %vm3867_vm13 = vcmask 1043456  }
 0x14a   :  { %v1799_v4 = vsub.f32 1.0, %v1798_v0  ;;  %3642 = vmatpush.bf16.msra.mxu3 %v5054_v63  ;;  %v6033_v42 = vld [vmem:[%s9182_s3 + $0x514] sm:$0xf]  ;;  %v5222_v50 = vor.u32 %v5997_v37, %v5219_v41  ;;  %v5471_v41 = vld [vmem:[%s9182_s3 + $0x5f4] sm:$0xf0]  ;;  %vm3873_vm14 = vmor %vm3872_vm12, %vm3871_vm11 }
 0x14b   :  { %6144 = vpow2.f32 %v4709_v53  ;;  %v1648_v62 = vpop.f32.mrf.mxu3  ;;  %v5114_v53 = vor.u32 %v5970_v22, %v5111_v38 }
 0x14c   :  { %3633 = vmatpush.bf16.msra.mxu1 %v4910_v52  ;;  %v1598_v11 = vpop.f32.mrf.mxu1  ;;  %v1800_v10 = vmul.f32 %v6143_v60, %v1799_v4  ;;  %3655 = vmatpush.bf16.msrb.mxu0 %v5150_v58  ;;  %v5943_v52 = vld [vmem:[%s9182_s3 + $0x244] sm:$0xf] }
 0x14d   :  { %v5567_v11 = vld [vmem:[%s9182_s3 + $0x6b4] sm:$0xf0]  ;;  %v5006_v4 = vor.u32 %v5943_v52, %v5003_v61  ;;  %v6072_v61 = vld [vmem:[%s9182_s3 + $0x64c] sm:$0xf] }
 0x14e   :  { %v1801_v18 = vadd.f32 %v6143_v60, %v1800_v10  ;;  %3643 = vmatpush.bf16.msra.mxu3 %v5042_v17  ;;  %v5570_v13 = vor.u32 %v6084_v3, %v5567_v11  ;;  %v6003_v17 = vld [vmem:[%s9182_s3 + $0x424] sm:$0xf] }
 0x14f   :  { %3608 = vmatmul.bf16.vlgmr.msra.gmra.mxu0 %v7680_v8 }
 0x150   :  { %v1805_v26 = vsel %vm1804_vm15, %v6143_v60, %v1801_v18  ;;  %3656 = vmatpush.bf16.msrb.mxu0 %v5138_v12  ;;  %v6006_v60 = vld [vmem:[%s9182_s3 + $0x43c] sm:$0xf]  ;;  %v6000_v12 = vld [vmem:[%s9182_s3 + $0x40c] sm:$0xf] }
 0x151   :  { %v6145_v54 = vpop.eup %6144  ;;  %v1622_v32 = vpop.f32.mrf.mxu0  ;;  %v1810_v29 = vsel %vm1807_vm0, %v1809_v20, %v1805_v26  ;;  %v5258_v10 = vor.u32 %v6006_v60, %v5255_v1  ;;  %v5375_v26 = vld [vmem:[%s9182_s3 + $0x534] sm:$0xf0]  ;;  %v5234_v22 = vor.u32 %v6000_v12, %v5231_v51  ;;  %v5351_v60 = vld [vmem:[%s9182_s3 + $0x504] sm:$0xf0]  ;;  %v6024_v12 = vld [vmem:[%s9182_s3 + $0x4cc] sm:$0xf] }
 0x152   :  { %v8350_v21 = vadd.f32 1.0, %v6145_v54  ;;  %v1849_v23 = vmul.f32 %v1810_v29, %v8212_v46  ;;  %v1623_v31 = vadd.f32 %v1622_v32, %v247_v2  ;;  %3644 = vmatpush.bf16.msra.mxu3 %v5030_v16  ;;  %v5243_v54 = vld [vmem:[%s9182_s3 + $0x42c] sm:$0xf0]  ;;  %v6081_v2 = vld [vmem:[%s9182_s3 + $0x694] sm:$0xf] }
 0x153   :  { %v1650_v49 = vpop.f32.mrf.mxu3  ;;  %v5555_v32 = vld [vmem:[%s9182_s3 + $0x69c] sm:$0xf0]  ;;  %v5246_v20 = vor.u32 %v6003_v17, %v5243_v54  ;;  %v5543_v29 = vld [vmem:[%s9182_s3 + $0x684] sm:$0xf0]  ;;  %v6069_v17 = vld [vmem:[%s9182_s3 + $0x634] sm:$0xf] }
 0x154   :  { %6146 = vrcp.f32 %v8350_v21  ;;  %v8376_v46 = vpack.c.bf16 %v1849_v23, %v1849_v23  ;;  %3657 = vmatpush.bf16.msrb.mxu0 %v5126_v34  ;;  %v1823_v58 = vand.u32 2147483648, %v8350_v21  ;;  %v1821_v15 = vand.u32 2147483647, %v8350_v21  ;;  %v5507_v54 = vld [vmem:[%s9182_s3 + $0x63c] sm:$0xf0] }
 0x155   :  { %vm1817_vm2 = vweird.f32 %v8350_v21  ;;  %v5558_v16 = vor.u32 %v6081_v2, %v5555_v32  ;;  %v5663_v2 = vld [vmem:[%s9182_s3 + $0x774] sm:$0xf0] }
 0x156   :  { %3569 = vmatmul.bf16.vlgmr.msrb.gmra.mxu2 %v8376_v46  ;;  %3645 = vmatpush.bf16.msra.mxu3 %v5018_v43  ;;  %v1824_v19 = vor.u32 1.1754944e-38, %v1823_v58  ;;  %vm1822_vm4 = vcmp.eq.f32.partialorder %v1821_v15, 8.507059e+37  ;;  %v6075_v43 = vld [vmem:[%s9182_s3 + $0x664] sm:$0xf]  ;;  %v5195_v58 = vld [vmem:[%s9182_s3 + $0x3cc] sm:$0xf0] }
 0x157   :  { %3665 = vmatpush.bf16.msrb.mxu2 %v5282_v33  ;;  %v8456_v33 = vld [vmem:[%s9183_s4] sm:$0x7]  ;;  %v5339_v15 = vld [vmem:[%s9182_s3 + $0x4ec] sm:$0xf0] }
 0x158   :  { %3658 = vmatpush.bf16.msrb.mxu0 %v5114_v53 }
 0x159   :  { %v1635_v45 = vpop.f32.mrf.mxu2  ;;  %v1624_v47 = vpop.f32.mrf.mxu0 }
 0x15a   :  { %v1636_v35 = vadd.f32 %v1635_v45, %v1623_v31  ;;  %v6147_v44 = vpop.eup %6146  ;;  %3646 = vmatpush.bf16.msra.mxu3 %v5006_v4  ;;  %v5363_v45 = vld [vmem:[%s9182_s3 + $0x51c] sm:$0xf0]  ;;  %v2184_v47 = vperm.slane %v8456_v33, 0 }
 0x15b   :  { %v1813_v63 = vmul.f32 %v6147_v44, %v8350_v21  ;;  %3666 = vmatpush.bf16.msrb.mxu2 %v5270_v57  ;;  %vm1818_vm1 = vweird.f32 %v6147_v44  ;;  %v6036_v21 = vld [vmem:[%s9182_s3 + $0x52c] sm:$0xf]  ;;  %v5366_v52 = vor.u32 %v6033_v42, %v5363_v45  ;;  %v5207_v57 = vld [vmem:[%s9182_s3 + $0x3e4] sm:$0xf0] }
 0x15c   :  { %v8404_v0 = vadd.f32 %v1648_v62, %v1636_v35  ;;  %vm1819_vm3 = vmor %vm1817_vm2, %vm1818_vm1  ;;  %3659 = vmatpush.bf16.msrb.mxu0 %v5102_v7  ;;  %v5378_v38 = vor.u32 %v6036_v21, %v5375_v26  ;;  %v5531_v35 = vld [vmem:[%s9182_s3 + $0x66c] sm:$0xf0]  ;;  %v6027_v7 = vld [vmem:[%s9182_s3 + $0x4e4] sm:$0xf] }
 0x15d   :  { %v1814_v5 = vsub.f32 1.0, %v1813_v63  ;;  %v5534_v53 = vor.u32 %v6075_v43, %v5531_v35  ;;  %v5519_v63 = vld [vmem:[%s9182_s3 + $0x654] sm:$0xf0]  ;;  %v6066_v26 = vld [vmem:[%s9182_s3 + $0x61c] sm:$0xf] }
 0x15e   :  { %v4710_v6 = vmul.f32 -1.442695, %v8404_v0  ;;  %v5327_v21 = vld [vmem:[%s9182_s3 + $0x4d4] sm:$0xf0]  ;;  %v5315_v35 = vld [vmem:[%s9182_s3 + $0x4bc] sm:$0xf0] }
 0x15f   :  { %v1815_v14 = vmul.f32 %v6147_v44, %v1814_v5  ;;  %3667 = vmatpush.bf16.msrb.mxu2 %v5258_v10  ;;  %3660 = vmatmul.bf16.vlgmr.msrb.gmra.mxu0 %v8069_v9  ;;  %v5354_v5 = vor.u32 %v6030_v59, %v5351_v60  ;;  %v4997_v59 = vld [vmem:[%s9182_s3 + $0x230] sm:$0xf]  ;;  %v5942_v60 = vld [vmem:[%s9182_s3 + $0x238] sm:$0xf0] }
 0x160   :  { %6148 = vpow2.f32 %v4710_v6  ;;  %3704 = vmatpush.bf16.msra.mxu0 %v5570_v13  ;;  %v5991_v6 = vld [vmem:[%s9182_s3 + $0x3c4] sm:$0xf] }
 0x161   :  { %v1637_v18 = vpop.f32.mrf.mxu2  ;;  %v1816_v62 = vadd.f32 %v6147_v44, %v1815_v14  ;;  %v5522_v14 = vor.u32 %v6072_v61, %v5519_v63 }
 0x162   :  { %v6108_v18 = vld [vmem:[%s9182_s3 + $0x76c] sm:$0xf] }
 0x163   :  { %v1820_v25 = vsel %vm1819_vm3, %v6147_v44, %v1816_v62  ;;  %3668 = vmatpush.bf16.msrb.mxu2 %v5246_v20  ;;  %v5994_v44 = vld [vmem:[%s9182_s3 + $0x3dc] sm:$0xf]  ;;  %v5510_v20 = vor.u32 %v6069_v17, %v5507_v54 }
 0x164   :  { %v3479_v55 = vpop.f32.mrf.mxu1  ;;  %v1825_v27 = vsel %vm1822_vm4, %v1824_v19, %v1820_v25  ;;  %3705 = vmatpush.bf16.msra.mxu0 %v5558_v16  ;;  %v5210_v4 = vor.u32 %v5994_v44, %v5207_v57  ;;  %v5342_v19 = vor.u32 %v6027_v7, %v5339_v15  ;;  %v5666_v16 = vor.u32 %v6108_v18, %v5663_v2  ;;  %v5639_v44 = vld [vmem:[%s9182_s3 + $0x744] sm:$0xf0]  ;;  %v5939_v15 = vld [vmem:[%s9182_s3 + $0x220] sm:$0xf0]  ;;  %v6054_v18 = vld [vmem:[%s9182_s3 + $0x5bc] sm:$0xf] }
 0x165   :  { %v1850_v31 = vmul.f32 %v1825_v27, %v8306_v48  ;;  %v5546_v48 = vor.u32 %v6078_v28, %v5543_v29  ;;  %v3480_v1 = vadd.f32 %v3479_v55, %v2184_v47  ;;  %v5198_v55 = vor.u32 %v5991_v6, %v5195_v58  ;;  %v5495_v27 = vld [vmem:[%s9182_s3 + $0x624] sm:$0xf0]  ;;  %v6105_v28 = vld [vmem:[%s9182_s3 + $0x754] sm:$0xf]  ;;  %v5651_v29 = vld [vmem:[%s9182_s3 + $0x75c] sm:$0xf0] }
 0x166   :  { %v6149_v23 = vpop.eup %6148  ;;  %3621 = vmatmul.bf16.vlgmr.msra.gmra.mxu2 %v7718_v36  ;;  %v5498_v45 = vor.u32 %v6066_v26, %v5495_v27  ;;  %v5654_v43 = vor.u32 %v6105_v28, %v5651_v29  ;;  %v6063_v47 = vld [vmem:[%s9182_s3 + $0x604] sm:$0xf]  ;;  %v6018_v6 = vld [vmem:[%s9182_s3 + $0x49c] sm:$0xf]  ;;  %v5303_v58 = vld [vmem:[%s9182_s3 + $0x4a4] sm:$0xf0]  ;;  %v4998_v7 = vor.u32 %v5942_v60, %v4997_v59 }
 0x167   :  { %v8451_v34 = vadd.f32 1.0, %v6149_v23  ;;  %v8461_v40 = vpack.c.bf16 %v1850_v31, %v1850_v31  ;;  %3669 = vmatpush.bf16.msrb.mxu2 %v5234_v22  ;;  %v6060_v31 = vld [vmem:[%s9182_s3 + $0x5ec] sm:$0xf]  ;;  %v5306_v54 = vor.u32 %v6018_v6, %v5303_v58  ;;  %v5447_v2 = vld [vmem:[%s9182_s3 + $0x5c4] sm:$0xf0] }
 0x168   :  { %3706 = vmatpush.bf16.msra.mxu0 %v5546_v48  ;;  %v5330_v48 = vor.u32 %v6024_v12, %v5327_v21  ;;  %v5474_v63 = vor.u32 %v6060_v31, %v5471_v41  ;;  %v5615_v12 = vld [vmem:[%s9182_s3 + $0x714] sm:$0xf0]  ;;  %v4973_v21 = vld [vmem:[%s9182_s3 + $0x200] sm:$0xf]  ;;  %v5936_v26 = vld [vmem:[%s9182_s3 + $0x208] sm:$0xf0]  ;;  %v5450_v27 = vor.u32 %v6054_v18, %v5447_v2 }
 0x169   :  { %6150 = vrcp.f32 %v8451_v34  ;;  %3582 = vmatmul.bf16.vlgmr.msrb.gmra.mxu1 %v8461_v40  ;;  %v1838_v62 = vand.u32 2147483648, %v8451_v34  ;;  %v1836_v25 = vand.u32 2147483647, %v8451_v34  ;;  %vm1832_vm6 = vweird.f32 %v8451_v34  ;;  %v6051_v31 = vld [vmem:[%s9182_s3 + $0x5a4] sm:$0xf] }
 0x16a   :  { %3678 = vmatpush.bf16.msrb.mxu1 %v5378_v38  ;;  %v5435_v22 = vld [vmem:[%s9182_s3 + $0x5ac] sm:$0xf0]  ;;  %v4793_v41 = vld [vmem:[%s9182_s3 + $0x98] sm:$0xf]  ;;  %v5888_v59 = vld [vmem:[%s9182_s3 + $0x88] sm:$0xf0] }
 0x16b   :  { %3670 = vmatpush.bf16.msrb.mxu2 %v5222_v50  ;;  %v3492_v11 = vpop.f32.mrf.mxu3  ;;  %v1839_v38 = vor.u32 1.1754944e-38, %v1838_v62  ;;  %vm1837_vm8 = vcmp.eq.f32.partialorder %v1836_v25, 8.507059e+37  ;;  %v5483_v50 = vld [vmem:[%s9182_s3 + $0x60c] sm:$0xf0]  ;;  %v6015_v62 = vld [vmem:[%s9182_s3 + $0x484] sm:$0xf] }
 0x16c   :  { %v3481_v49 = vpop.f32.mrf.mxu1  ;;  %3707 = vmatpush.bf16.msra.mxu0 %v5534_v53  ;;  %v3493_v13 = vadd.f32 %v3492_v11, %v3480_v1  ;;  %v5486_v11 = vor.u32 %v6063_v47, %v5483_v50  ;;  %v5894_v25 = vld [vmem:[%s9182_s3 + $0xb8] sm:$0xf0]  ;;  %v5423_v50 = vld [vmem:[%s9182_s3 + $0x594] sm:$0xf0]  ;;  %v4949_v60 = vld [vmem:[%s9182_s3 + $0x1d0] sm:$0xf] }
 0x16d   :  { %v6087_v6 = vld [vmem:[%s9182_s3 + $0x6c4] sm:$0xf]  ;;  %v5579_v58 = vld [vmem:[%s9182_s3 + $0x6cc] sm:$0xf0] }
 0x16e   :  { %3679 = vmatpush.bf16.msrb.mxu1 %v5366_v52  ;;  %v6102_v52 = vld [vmem:[%s9182_s3 + $0x73c] sm:$0xf]  ;;  %v5582_v2 = vor.u32 %v6087_v6, %v5579_v58  ;;  %v6035_v6 = vld [vmem:[%s9182_s3 + $0x520] sm:$0xf0] }
 0x16f   :  { %v6151_v3 = vpop.eup %6150  ;;  %3671 = vmatpush.bf16.msrb.mxu2 %v5210_v4  ;;  %v5642_v4 = vor.u32 %v6102_v52, %v5639_v44  ;;  %v6090_v52 = vld [vmem:[%s9182_s3 + $0x6dc] sm:$0xf] }
 0x170   :  { %v1828_v10 = vmul.f32 %v6151_v3, %v8451_v34  ;;  %vm1833_vm5 = vweird.f32 %v6151_v3  ;;  %3708 = vmatpush.bf16.msra.mxu0 %v5522_v14  ;;  %v6021_v34 = vld [vmem:[%s9182_s3 + $0x4b4] sm:$0xf]  ;;  %v4985_v14 = vld [vmem:[%s9182_s3 + $0x218] sm:$0xf] }
 0x171   :  { %vm8549_vm7 = vmor %vm1832_vm6, %vm1833_vm5  ;;  %v3505_v57 = vpop.f32.mrf.mxu0  ;;  %v5318_v1 = vor.u32 %v6021_v34, %v5315_v35  ;;  %v5891_v34 = vld [vmem:[%s9182_s3 + $0xa0] sm:$0xf0] }
 0x172   :  { %v1829_v32 = vsub.f32 1.0, %v1828_v10  ;;  %3680 = vmatpush.bf16.msrb.mxu1 %v5354_v5  ;;  %v8585_v61 = vadd.f32 %v3505_v57, %v3493_v13  ;;  %v5459_v5 = vld [vmem:[%s9182_s3 + $0x5dc] sm:$0xf0]  ;;  %v6099_v10 = vld [vmem:[%s9182_s3 + $0x724] sm:$0xf]  ;;  %v4794_v47 = vor.u32 %v5891_v34, %v4793_v41 }
 0x173   :  { %3672 = vmatpush.bf16.msrb.mxu2 %v5198_v55  ;;  %v3494_v37 = vpop.f32.mrf.mxu3  ;;  %v5627_v13 = vld [vmem:[%s9182_s3 + $0x72c] sm:$0xf0]  ;;  %v4781_v57 = vld [vmem:[%s9182_s3 + $0x80] sm:$0xf]  ;;  %v4745_v34 = vld [vmem:[%s9182_s3 + $0x38] sm:$0xf] }
 0x174   :  { %v1830_v51 = vmul.f32 %v6151_v3, %v1829_v32  ;;  %3709 = vmatpush.bf16.msra.mxu0 %v5510_v20  ;;  %v5630_v32 = vor.u32 %v6099_v10, %v5627_v13  ;;  %v5291_v55 = vld [vmem:[%s9182_s3 + $0x48c] sm:$0xf0]  ;;  %v4986_v20 = vor.u32 %v5939_v15, %v4985_v14  ;;  %v4974_v37 = vor.u32 %v5936_v26, %v4973_v21  ;;  %v4769_v10 = vld [vmem:[%s9182_s3 + $0x68] sm:$0xf]  ;;  %v5885_v13 = vld [vmem:[%s9182_s3 + $0x70] sm:$0xf0] }
 0x175   :  { %v5294_v28 = vor.u32 %v6015_v62, %v5291_v55  ;;  %v4937_v14 = vld [vmem:[%s9182_s3 + $0x1b8] sm:$0xf]  ;;  %v5927_v15 = vld [vmem:[%s9182_s3 + $0x1c0] sm:$0xf0]  ;;  %v6042_v62 = vld [vmem:[%s9182_s3 + $0x55c] sm:$0xf] }
 0x176   :  { %v1831_v23 = vadd.f32 %v6151_v3, %v1830_v51  ;;  %3681 = vmatpush.bf16.msrb.mxu1 %v5342_v19  ;;  %3673 = vmatmul.bf16.vlgmr.msrb.gmra.mxu2 %v8181_v24  ;;  %v6096_v19 = vld [vmem:[%s9182_s3 + $0x70c] sm:$0xf]  ;;  %v4805_v51 = vld [vmem:[%s9182_s3 + $0xb0] sm:$0xf]  ;;  %v5399_v55 = vld [vmem:[%s9182_s3 + $0x564] sm:$0xf0] }
 0x177   :  { %3717 = vmatpush.bf16.msra.mxu2 %v5666_v16  ;;  %v5618_v29 = vor.u32 %v6096_v19, %v5615_v12  ;;  %v4938_v19 = vor.u32 %v5927_v15, %v4937_v14  ;;  %v4757_v12 = vld [vmem:[%s9182_s3 + $0x50] sm:$0xf]  ;;  %v5081_v21 = vld [vmem:[%s9182_s3 + $0x2d8] sm:$0xf]  ;;  %v5963_v26 = vld [vmem:[%s9182_s3 + $0x2e0] sm:$0xf0] }
 0x178   :  { %v1835_v42 = vsel %vm8549_vm7, %v6151_v3, %v1831_v23  ;;  %3710 = vmatpush.bf16.msra.mxu0 %v5498_v45  ;;  %v4806_v23 = vor.u32 %v5894_v25, %v4805_v51  ;;  %v5933_v45 = vld [vmem:[%s9182_s3 + $0x1f0] sm:$0xf0]  ;;  %v5882_v51 = vld [vmem:[%s9182_s3 + $0x58] sm:$0xf0]  ;;  %v4925_v25 = vld [vmem:[%s9182_s3 + $0x1a0] sm:$0xf]  ;;  %v5082_v41 = vor.u32 %v5963_v26, %v5081_v21 }
 0x179   :  { %v1840_v49 = vsel %vm1837_vm8, %v1839_v38, %v1835_v42  ;;  %3634 = vmatmul.bf16.vlgmr.msra.gmra.mxu1 %v7818_v39  ;;  %v3507_v16 = vpop.f32.mrf.mxu0  ;;  %v6093_v38 = vld [vmem:[%s9182_s3 + $0x6f4] sm:$0xf]  ;;  %v4961_v42 = vld [vmem:[%s9182_s3 + $0x1e8] sm:$0xf]  ;;  %v5912_v14 = vld [vmem:[%s9182_s3 + $0x148] sm:$0xf0] }
 0x17a   :  { %v1851_v53 = vmul.f32 %v1840_v49, %v8404_v0  ;;  %3682 = vmatpush.bf16.msrb.mxu1 %v5330_v48  ;;  %v6057_v0 = vld [vmem:[%s9182_s3 + $0x5d4] sm:$0xf]  ;;  %v5603_v48 = vld [vmem:[%s9182_s3 + $0x6fc] sm:$0xf0]  ;;  %v6048_v49 = vld [vmem:[%s9182_s3 + $0x58c] sm:$0xf]  ;;  %v4962_v44 = vor.u32 %v5933_v45, %v4961_v42 }
 0x17b   :  { %3718 = vmatpush.bf16.msra.mxu2 %v5654_v43  ;;  %v5462_v17 = vor.u32 %v6057_v0, %v5459_v5  ;;  %v5438_v43 = vor.u32 %v6051_v31, %v5435_v22  ;;  %v5606_v35 = vor.u32 %v6093_v38, %v5603_v48  ;;  %v6045_v0 = vld [vmem:[%s9182_s3 + $0x574] sm:$0xf]  ;;  %v5411_v5 = vld [vmem:[%s9182_s3 + $0x57c] sm:$0xf0]  ;;  %v5924_v16 = vld [vmem:[%s9182_s3 + $0x1a8] sm:$0xf0] }
 0x17c   :  { %v8590_v3 = vpack.c.bf16 %v1851_v53, %v1851_v53  ;;  %3711 = vmatpush.bf16.msra.mxu0 %v5486_v11  ;;  %v5591_v53 = vld [vmem:[%s9182_s3 + $0x6e4] sm:$0xf0]  ;;  %v5414_v18 = vor.u32 %v6045_v0, %v5411_v5  ;;  %v5387_v31 = vld [vmem:[%s9182_s3 + $0x54c] sm:$0xf0]  ;;  %v5918_v38 = vld [vmem:[%s9182_s3 + $0x178] sm:$0xf0]  ;;  %v4926_v48 = vor.u32 %v5924_v16, %v4925_v25 }
 0x17d   :  { %v5594_v11 = vor.u32 %v6090_v52, %v5591_v53  ;;  %v4901_v22 = vld [vmem:[%s9182_s3 + $0x170] sm:$0xf]  ;;  %v5879_v42 = vld [vmem:[%s9182_s3 + $0x40] sm:$0xf0]  ;;  %v4913_v45 = vld [vmem:[%s9182_s3 + $0x188] sm:$0xf] }
 0x17e   :  { %3595 = vmatmul.bf16.vlgmr.msrb.gmra.mxu3 %v8590_v3  ;;  %3683 = vmatpush.bf16.msrb.mxu1 %v5318_v1  ;;  %v5426_v1 = vor.u32 %v6048_v49, %v5423_v50  ;;  %v5381_v49 = vld [vmem:[%s9182_s3 + $0x530] sm:$0xf]  ;;  %v6038_v50 = vld [vmem:[%s9182_s3 + $0x538] sm:$0xf0]  ;;  %v4902_v52 = vor.u32 %v5918_v38, %v4901_v22  ;;  %v4889_v53 = vld [vmem:[%s9182_s3 + $0x158] sm:$0xf] }
 0x17f   :  { %3691 = vmatpush.bf16.msrb.mxu3 %v5474_v63  ;;  %3719 = vmatpush.bf16.msra.mxu2 %v5642_v4  ;;  %v5930_v63 = vld [vmem:[%s9182_s3 + $0x1d8] sm:$0xf0]  ;;  %v4782_v4 = vor.u32 %v5888_v59, %v4781_v57  ;;  %v5382_v0 = vor.u32 %v6038_v50, %v5381_v49  ;;  %v5369_v5 = vld [vmem:[%s9182_s3 + $0x518] sm:$0xf]  ;;  %v5987_v22 = vld [vmem:[%s9182_s3 + $0x3a0] sm:$0xf0] }
 0x180   :  { %3756 = vmatpush.bf16.msrb.mxu0 %v4998_v7  ;;  %v4950_v7 = vor.u32 %v5930_v63, %v4949_v60  ;;  %v5915_v60 = vld [vmem:[%s9182_s3 + $0x160] sm:$0xf0]  ;;  %v4733_v63 = vld [vmem:[%s9182_s3 + $0x20] sm:$0xf]  ;;  %v5345_v38 = vld [vmem:[%s9182_s3 + $0x4e8] sm:$0xf] }
 0x181   :  { %3712 = vmatmul.bf16.vlgmr.msra.gmra.mxu0 %v8461_v40  ;;  %v5984_v49 = vld [vmem:[%s9182_s3 + $0x388] sm:$0xf0] }
 0x182   :  { %3684 = vmatpush.bf16.msrb.mxu1 %v5306_v54  ;;  %v5966_v54 = vld [vmem:[%s9182_s3 + $0x2f8] sm:$0xf0] }
 0x183   :  { %3692 = vmatpush.bf16.msrb.mxu3 %v5462_v17  ;;  %3720 = vmatpush.bf16.msra.mxu2 %v5630_v32  ;;  %v5093_v17 = vld [vmem:[%s9182_s3 + $0x2f0] sm:$0xf]  ;;  %v4770_v32 = vor.u32 %v5885_v13, %v4769_v10  ;;  %v4877_v13 = vld [vmem:[%s9182_s3 + $0x140] sm:$0xf] }
 0x184   :  { %3757 = vmatpush.bf16.msrb.mxu0 %v4986_v20  ;;  %v5094_v20 = vor.u32 %v5966_v54, %v5093_v17  ;;  %v4721_v17 = vld [vmem:[%s9182_s3 + $0x8] sm:$0xf]  ;;  %v5873_v54 = vld [vmem:[%s9182_s3 + $0x10] sm:$0xf0]  ;;  %v4878_v25 = vor.u32 %v5912_v14, %v4877_v13 }
 0x185   :  { %v4722_v16 = vor.u32 %v5873_v54, %v4721_v17  ;;  %v5900_v17 = vld [vmem:[%s9182_s3 + $0xe8] sm:$0xf0] }
 0x186   :  { %3685 = vmatpush.bf16.msrb.mxu1 %v5294_v28  ;;  %v6039_v28 = vld [vmem:[%s9182_s3 + $0x544] sm:$0xf] }
 0x187   :  { %3693 = vmatpush.bf16.msrb.mxu3 %v5450_v27  ;;  %3721 = vmatpush.bf16.msra.mxu2 %v5618_v29  ;;  %v5402_v27 = vor.u32 %v6042_v62, %v5399_v55  ;;  %v5189_v62 = vld [vmem:[%s9182_s3 + $0x3b0] sm:$0xf]  ;;  %v5990_v55 = vld [vmem:[%s9182_s3 + $0x3b8] sm:$0xf0] }
 0x188   :  { %3758 = vmatpush.bf16.msrb.mxu0 %v4974_v37  ;;  %v5190_v26 = vor.u32 %v5990_v55, %v5189_v62  ;;  %v5309_v62 = vld [vmem:[%s9182_s3 + $0x4a0] sm:$0xf]  ;;  %v6020_v55 = vld [vmem:[%s9182_s3 + $0x4a8] sm:$0xf0] }
 0x189   :  { %3686 = vmatmul.bf16.vlgmr.msrb.gmra.mxu1 %v8281_v30 }
 0x18a   :  { %3730 = vmatpush.bf16.msra.mxu1 %v4806_v23  ;;  %v4758_v23 = vor.u32 %v5882_v51, %v4757_v12  ;;  %v6032_v12 = vld [vmem:[%s9182_s3 + $0x508] sm:$0xf0] }
 0x18b   :  { %3694 = vmatpush.bf16.msrb.mxu3 %v5438_v43  ;;  %3722 = vmatpush.bf16.msra.mxu2 %v5606_v35  ;;  %v5921_v43 = vld [vmem:[%s9182_s3 + $0x190] sm:$0xf0]  ;;  %v5960_v35 = vld [vmem:[%s9182_s3 + $0x2c8] sm:$0xf0] }
 0x18c   :  { %3759 = vmatpush.bf16.msrb.mxu0 %v4962_v44  ;;  %v3518_v29 = vpop.f32.mrf.mxu2  ;;  %v4746_v44 = vor.u32 %v5879_v42, %v4745_v34  ;;  %v4914_v57 = vor.u32 %v5921_v43, %v4913_v45  ;;  %v4853_v42 = vld [vmem:[%s9182_s3 + $0x110] sm:$0xf]  ;;  %v5906_v45 = vld [vmem:[%s9182_s3 + $0x118] sm:$0xf0]  ;;  %v5021_v43 = vld [vmem:[%s9182_s3 + $0x260] sm:$0xf] }
 0x18d   :  { %v3519_v37 = vadd.f32 %v3518_v29, %v8585_v61  ;;  %v5069_v61 = vld [vmem:[%s9182_s3 + $0x2c0] sm:$0xf]  ;;  %v5033_v29 = vld [vmem:[%s9182_s3 + $0x278] sm:$0xf] }
 0x18e   :  { %3731 = vmatpush.bf16.msra.mxu1 %v4794_v47  ;;  %3647 = vmatmul.bf16.vlgmr.msra.gmra.mxu3 %v7941_v56  ;;  %v5390_v47 = vor.u32 %v6039_v28, %v5387_v31  ;;  %v5070_v59 = vor.u32 %v5960_v35, %v5069_v61  ;;  %v5909_v28 = vld [vmem:[%s9182_s3 + $0x130] sm:$0xf0]  ;;  %v5177_v31 = vld [vmem:[%s9182_s3 + $0x398] sm:$0xf]  ;;  %v5948_v35 = vld [vmem:[%s9182_s3 + $0x268] sm:$0xf0] }
 0x18f   :  { %3695 = vmatpush.bf16.msrb.mxu3 %v5426_v1  ;;  %3723 = vmatpush.bf16.msra.mxu2 %v5594_v11  ;;  %v5876_v1 = vld [vmem:[%s9182_s3 + $0x28] sm:$0xf0]  ;;  %v5057_v11 = vld [vmem:[%s9182_s3 + $0x2a8] sm:$0xf]  ;;  %v5178_v34 = vor.u32 %v5987_v22, %v5177_v31  ;;  %v6017_v22 = vld [vmem:[%s9182_s3 + $0x490] sm:$0xf0] }
 0x190   :  { %3760 = vmatpush.bf16.msrb.mxu0 %v4950_v7  ;;  %v4890_v7 = vor.u32 %v5915_v60, %v4889_v53  ;;  %v4734_v10 = vor.u32 %v5876_v1, %v4733_v63  ;;  %v4854_v53 = vor.u32 %v5906_v45, %v4853_v42  ;;  %v5009_v63 = vld [vmem:[%s9182_s3 + $0x248] sm:$0xf]  ;;  %v5945_v1 = vld [vmem:[%s9182_s3 + $0x250] sm:$0xf0]  ;;  %v5273_v42 = vld [vmem:[%s9182_s3 + $0x458] sm:$0xf] }
 0x191   :  { %v5010_v13 = vor.u32 %v5945_v1, %v5009_v63  ;;  %v5297_v31 = vld [vmem:[%s9182_s3 + $0x488] sm:$0xf]  ;;  %v5429_v63 = vld [vmem:[%s9182_s3 + $0x590] sm:$0xf]  ;;  %v6050_v1 = vld [vmem:[%s9182_s3 + $0x598] sm:$0xf0] }
 0x192   :  { %3732 = vmatpush.bf16.msra.mxu1 %v4782_v4  ;;  %v5957_v4 = vld [vmem:[%s9182_s3 + $0x2b0] sm:$0xf0]  ;;  %v5298_v45 = vor.u32 %v6017_v22, %v5297_v31 }
 0x193   :  { %3696 = vmatpush.bf16.msrb.mxu3 %v5414_v18  ;;  %3724 = vmatpush.bf16.msra.mxu2 %v5582_v2  ;;  %v5058_v15 = vor.u32 %v5957_v4, %v5057_v11  ;;  %v5045_v18 = vld [vmem:[%s9182_s3 + $0x290] sm:$0xf]  ;;  %v5370_v2 = vor.u32 %v6035_v6, %v5369_v5  ;;  %v5153_v11 = vld [vmem:[%s9182_s3 + $0x368] sm:$0xf]  ;;  %v5981_v4 = vld [vmem:[%s9182_s3 + $0x370] sm:$0xf0] }
 0x194   :  { %3761 = vmatpush.bf16.msrb.mxu0 %v4938_v19  ;;  %v3520_v58 = vpop.f32.mrf.mxu2  ;;  %v5321_v5 = vld [vmem:[%s9182_s3 + $0x4b8] sm:$0xf]  ;;  %v6023_v6 = vld [vmem:[%s9182_s3 + $0x4c0] sm:$0xf0]  ;;  %v5154_v14 = vor.u32 %v5981_v4, %v5153_v11  ;;  %v6086_v11 = vld [vmem:[%s9182_s3 + $0x6b8] sm:$0xf0] }
 0x195   :  { %v5477_v58 = vld [vmem:[%s9182_s3 + $0x5f0] sm:$0xf]  ;;  %v5322_v54 = vor.u32 %v6023_v6, %v5321_v5 }
 0x196   :  { %3733 = vmatpush.bf16.msra.mxu1 %v4770_v32  ;;  %3725 = vmatmul.bf16.vlgmr.msra.gmra.mxu2 %v8590_v3  ;;  %v5954_v32 = vld [vmem:[%s9182_s3 + $0x298] sm:$0xf0] }
 0x197   :  { %3769 = vmatpush.bf16.msrb.mxu2 %v5094_v20  ;;  %3697 = vmatpush.bf16.msrb.mxu3 %v5402_v27  ;;  %v5357_v20 = vld [vmem:[%s9182_s3 + $0x500] sm:$0xf]  ;;  %v5046_v21 = vor.u32 %v5954_v32, %v5045_v18  ;;  %v4865_v27 = vld [vmem:[%s9182_s3 + $0x128] sm:$0xf]  ;;  %v5978_v32 = vld [vmem:[%s9182_s3 + $0x358] sm:$0xf0] }
 0x198   :  { %3762 = vmatpush.bf16.msrb.mxu0 %v4926_v48  ;;  %v4866_v48 = vor.u32 %v5909_v28, %v4865_v27  ;;  %v6014_v27 = vld [vmem:[%s9182_s3 + $0x478] sm:$0xf0]  ;;  %v5310_v28 = vor.u32 %v6020_v55, %v5309_v62  ;;  %v5405_v62 = vld [vmem:[%s9182_s3 + $0x560] sm:$0xf] }
 0x19a   :  { %3734 = vmatpush.bf16.msra.mxu1 %v4758_v23  ;;  %v5358_v23 = vor.u32 %v6032_v12, %v5357_v20  ;;  %v6059_v20 = vld [vmem:[%s9182_s3 + $0x5e0] sm:$0xf0] }
 0x19b   :  { %3770 = vmatpush.bf16.msrb.mxu2 %v5082_v41  ;;  %3698 = vmatpush.bf16.msrb.mxu3 %v5390_v47  ;;  %v5165_v47 = vld [vmem:[%s9182_s3 + $0x380] sm:$0xf] }
 0x19c   :  { %3763 = vmatpush.bf16.msrb.mxu0 %v4914_v57  ;;  %v3531_v19 = vpop.f32.mrf.mxu1  ;;  %v4841_v57 = vld [vmem:[%s9182_s3 + $0xf8] sm:$0xf]  ;;  %v5166_v60 = vor.u32 %v5984_v49, %v5165_v47  ;;  %v5441_v47 = vld [vmem:[%s9182_s3 + $0x5a8] sm:$0xf]  ;;  %v6053_v49 = vld [vmem:[%s9182_s3 + $0x5b0] sm:$0xf0] }
 0x19d   :  { %v8842_v51 = vadd.f32 %v3531_v19, %v3519_v37  ;;  %v6029_v37 = vld [vmem:[%s9182_s3 + $0x4f0] sm:$0xf0]  ;;  %v5465_v19 = vld [vmem:[%s9182_s3 + $0x5d8] sm:$0xf] }
 0x19e   :  { %3735 = vmatpush.bf16.msra.mxu1 %v4746_v44  ;;  %3699 = vmatmul.bf16.vlgmr.msrb.gmra.mxu3 %v8376_v46  ;;  %v5346_v61 = vor.u32 %v6029_v37, %v5345_v38  ;;  %v6026_v44 = vld [vmem:[%s9182_s3 + $0x4d8] sm:$0xf0]  ;;  %v5453_v38 = vld [vmem:[%s9182_s3 + $0x5c0] sm:$0xf]  ;;  %v6056_v37 = vld [vmem:[%s9182_s3 + $0x5c8] sm:$0xf0] }
 0x19f   :  { %3743 = vmatpush.bf16.msra.mxu3 %v4902_v52  ;;  %3771 = vmatpush.bf16.msrb.mxu2 %v5070_v59  ;;  %v5333_v52 = vld [vmem:[%s9182_s3 + $0x4d0] sm:$0xf]  ;;  %v5022_v59 = vor.u32 %v5948_v35, %v5021_v43  ;;  %v5454_v43 = vor.u32 %v6056_v37, %v5453_v38  ;;  %v5972_v35 = vld [vmem:[%s9182_s3 + $0x328] sm:$0xf0]  ;;  %v5213_v37 = vld [vmem:[%s9182_s3 + $0x3e0] sm:$0xf] }
 0x1a0   :  { %3808 = vmatpush.bf16.msra.mxu0 %v5382_v0  ;;  %v5334_v0 = vor.u32 %v6026_v44, %v5333_v52 }
 0x1a1   :  { %3764 = vmatmul.bf16.vlgmr.msrb.gmra.mxu0 %v7818_v39  ;;  %v5951_v39 = vld [vmem:[%s9182_s3 + $0x280] sm:$0xf0] }
 0x1a2   :  { %3736 = vmatpush.bf16.msra.mxu1 %v4734_v10  ;;  %v5034_v41 = vor.u32 %v5951_v39, %v5033_v29  ;;  %v5466_v29 = vor.u32 %v6059_v20, %v5465_v19  ;;  %v5975_v39 = vld [vmem:[%s9182_s3 + $0x340] sm:$0xf0]  ;;  %v6044_v19 = vld [vmem:[%s9182_s3 + $0x568] sm:$0xf0]  ;;  %v5549_v20 = vld [vmem:[%s9182_s3 + $0x680] sm:$0xf] }
 0x1a3   :  { %3744 = vmatpush.bf16.msra.mxu3 %v4890_v7  ;;  %3772 = vmatpush.bf16.msrb.mxu2 %v5058_v15  ;;  %v6062_v7 = vld [vmem:[%s9182_s3 + $0x5f8] sm:$0xf0]  ;;  %v4829_v15 = vld [vmem:[%s9182_s3 + $0xe0] sm:$0xf] }
 0x1a4   :  { %3809 = vmatpush.bf16.msra.mxu0 %v5370_v2  ;;  %v3533_v50 = vpop.f32.mrf.mxu1  ;;  %v5478_v18 = vor.u32 %v6062_v7, %v5477_v58  ;;  %v5141_v2 = vld [vmem:[%s9182_s3 + $0x350] sm:$0xf]  ;;  %v4830_v12 = vor.u32 %v5900_v17, %v4829_v15  ;;  %v5249_v58 = vld [vmem:[%s9182_s3 + $0x428] sm:$0xf]  ;;  %v6005_v7 = vld [vmem:[%s9182_s3 + $0x430] sm:$0xf0] }
 0x1a5   :  { %v5250_v17 = vor.u32 %v6005_v7, %v5249_v58  ;;  %v5633_v58 = vld [vmem:[%s9182_s3 + $0x728] sm:$0xf]  ;;  %v6101_v7 = vld [vmem:[%s9182_s3 + $0x730] sm:$0xf0] }
 0x1a6   :  { %3737 = vmatpush.bf16.msra.mxu1 %v4722_v16  ;;  %v5142_v16 = vor.u32 %v5978_v32, %v5141_v2  ;;  %v5237_v2 = vld [vmem:[%s9182_s3 + $0x410] sm:$0xf]  ;;  %v6002_v32 = vld [vmem:[%s9182_s3 + $0x418] sm:$0xf0] }
 0x1a7   :  { %3745 = vmatpush.bf16.msra.mxu3 %v4878_v25  ;;  %3773 = vmatpush.bf16.msrb.mxu2 %v5046_v21  ;;  %v4817_v25 = vld [vmem:[%s9182_s3 + $0xc8] sm:$0xf]  ;;  %v5897_v21 = vld [vmem:[%s9182_s3 + $0xd0] sm:$0xf0] }
 0x1a8   :  { %3810 = vmatpush.bf16.msra.mxu0 %v5358_v23  ;;  %v5129_v23 = vld [vmem:[%s9182_s3 + $0x338] sm:$0xf] }
 0x1a9   :  { %3738 = vmatmul.bf16.vlgmr.msra.gmra.mxu1 %v7680_v8  ;;  %v5903_v8 = vld [vmem:[%s9182_s3 + $0x100] sm:$0xf0] }
 0x1aa   :  { %3782 = vmatpush.bf16.msrb.mxu1 %v5190_v26  ;;  %v4842_v10 = vor.u32 %v5903_v8, %v4841_v57  ;;  %v5285_v26 = vld [vmem:[%s9182_s3 + $0x470] sm:$0xf]  ;;  %v5261_v57 = vld [vmem:[%s9182_s3 + $0x440] sm:$0xf]  ;;  %v5105_v8 = vld [vmem:[%s9182_s3 + $0x308] sm:$0xf] }
 0x1ab   :  { %3746 = vmatpush.bf16.msra.mxu3 %v4866_v48  ;;  %3774 = vmatpush.bf16.msrb.mxu2 %v5034_v41  ;;  %v4818_v48 = vor.u32 %v5897_v21, %v4817_v25  ;;  %v5286_v41 = vor.u32 %v6014_v27, %v5285_v26  ;;  %v5406_v21 = vor.u32 %v6044_v19, %v5405_v62  ;;  %v5225_v27 = vld [vmem:[%s9182_s3 + $0x3f8] sm:$0xf]  ;;  %v2185_v19 = vperm.slane %v8456_v33, 1 }
 0x1ac   :  { %3811 = vmatpush.bf16.msra.mxu0 %v5346_v61  ;;  %v6011_v61 = vld [vmem:[%s9182_s3 + $0x460] sm:$0xf0] }
 0x1ad   :  { %v5274_v44 = vor.u32 %v6011_v61, %v5273_v42  ;;  %v6074_v42 = vld [vmem:[%s9182_s3 + $0x658] sm:$0xf0]  ;;  %v5201_v61 = vld [vmem:[%s9182_s3 + $0x3c8] sm:$0xf] }
 0x1ae   :  { %3783 = vmatpush.bf16.msrb.mxu1 %v5178_v34  ;;  %v5130_v34 = vor.u32 %v5975_v39, %v5129_v23  ;;  %v5537_v23 = vld [vmem:[%s9182_s3 + $0x668] sm:$0xf]  ;;  %v6077_v39 = vld [vmem:[%s9182_s3 + $0x670] sm:$0xf0] }
 0x1af   :  { %3747 = vmatpush.bf16.msra.mxu3 %v4854_v53  ;;  %3775 = vmatpush.bf16.msrb.mxu2 %v5022_v59  ;;  %v6008_v59 = vld [vmem:[%s9182_s3 + $0x448] sm:$0xf0]  ;;  %v5538_v38 = vor.u32 %v6077_v39, %v5537_v23 }
 0x1b0   :  { %3812 = vmatpush.bf16.msra.mxu0 %v5334_v0  ;;  %v5573_v0 = vld [vmem:[%s9182_s3 + $0x6b0] sm:$0xf]  ;;  %v5262_v4 = vor.u32 %v6008_v59, %v5261_v57  ;;  %v5657_v57 = vld [vmem:[%s9182_s3 + $0x758] sm:$0xf] }
 0x1b1   :  { %v5574_v6 = vor.u32 %v6086_v11, %v5573_v0  ;;  %v6104_v0 = vld [vmem:[%s9182_s3 + $0x748] sm:$0xf0]  ;;  %v5489_v11 = vld [vmem:[%s9182_s3 + $0x608] sm:$0xf] }
 0x1b2   :  { %3784 = vmatpush.bf16.msrb.mxu1 %v5166_v60  ;;  %v5442_v60 = vor.u32 %v6053_v49, %v5441_v47  ;;  %v6110_v47 = vld [vmem:[%s9182_s3 + $0x778] sm:$0xf0]  ;;  %v5513_v49 = vld [vmem:[%s9182_s3 + $0x638] sm:$0xf] }
 0x1b3   :  { %3748 = vmatpush.bf16.msra.mxu3 %v4842_v10  ;;  %3776 = vmatpush.bf16.msrb.mxu2 %v5010_v13  ;;  %v5417_v10 = vld [vmem:[%s9182_s3 + $0x578] sm:$0xf]  ;;  %v6047_v13 = vld [vmem:[%s9182_s3 + $0x580] sm:$0xf0] }
 0x1b4   :  { %3813 = vmatpush.bf16.msra.mxu0 %v5322_v54  ;;  %v5418_v54 = vor.u32 %v6047_v13, %v5417_v10 }
 0x1b6   :  { %3785 = vmatpush.bf16.msrb.mxu1 %v5154_v14  ;;  %3777 = vmatmul.bf16.vlgmr.msrb.gmra.mxu2 %v7941_v56  ;;  %v5117_v56 = vld [vmem:[%s9182_s3 + $0x320] sm:$0xf]  ;;  %v3544_v50 = vpop.f32.mrf.mxu3  ;;  %v6083_v14 = vld [vmem:[%s9182_s3 + $0x6a0] sm:$0xf0] }
 0x1b7   :  { %3821 = vmatpush.bf16.msra.mxu2 %v5478_v18  ;;  %3749 = vmatpush.bf16.msra.mxu3 %v4830_v12  ;;  %v3545_v52 = vadd.f32 %v3544_v50, %v8842_v51  ;;  %v5118_v53 = vor.u32 %v5972_v35, %v5117_v56  ;;  %v5969_v51 = vld [vmem:[%s9182_s3 + $0x310] sm:$0xf0]  ;;  %v6080_v12 = vld [vmem:[%s9182_s3 + $0x688] sm:$0xf0]  ;;  %v5669_v35 = vld [vmem:[%s9182_s3 + $0x770] sm:$0xf] }
 0x1b8   :  { %3814 = vmatpush.bf16.msra.mxu0 %v5310_v28  ;;  %v5106_v5 = vor.u32 %v5969_v51, %v5105_v8  ;;  %v5550_v26 = vor.u32 %v6080_v12, %v5549_v20  ;;  %v5999_v28 = vld [vmem:[%s9182_s3 + $0x400] sm:$0xf0]  ;;  %v5993_v56 = vld [vmem:[%s9182_s3 + $0x3d0] sm:$0xf0]  ;;  %v5501_v8 = vld [vmem:[%s9182_s3 + $0x620] sm:$0xf] }
 0x1b9   :  { %v5226_v31 = vor.u32 %v5999_v28, %v5225_v27  ;;  %v6071_v50 = vld [vmem:[%s9182_s3 + $0x640] sm:$0xf0] }
 0x1ba   :  { %3786 = vmatpush.bf16.msrb.mxu1 %v5142_v16  ;;  %v5238_v16 = vor.u32 %v6002_v32, %v5237_v2 }
 0x1bb   :  { %3822 = vmatpush.bf16.msra.mxu2 %v5466_v29  ;;  %3750 = vmatpush.bf16.msra.mxu3 %v4818_v48  ;;  %v5393_v29 = vld [vmem:[%s9182_s3 + $0x548] sm:$0xf]  ;;  %v5996_v48 = vld [vmem:[%s9182_s3 + $0x3e8] sm:$0xf0] }
 0x1bc   :  { %3815 = vmatpush.bf16.msra.mxu0 %v5298_v45  ;;  %v3557_v55 = vpop.f32.mrf.mxu0  ;;  %v5214_v45 = vor.u32 %v5996_v48, %v5213_v37 }
 0x1bd   :  { %v9060_v25 = vadd.f32 %v3557_v55, %v3545_v52  ;;  %v5202_v52 = vor.u32 %v5993_v56, %v5201_v61  ;;  %v5597_v55 = vld [vmem:[%s9182_s3 + $0x6e0] sm:$0xf] }
 0x1be   :  { %3787 = vmatpush.bf16.msrb.mxu1 %v5130_v34  ;;  %3751 = vmatmul.bf16.vlgmr.msra.gmra.mxu3 %v7718_v36  ;;  %v5430_v36 = vor.u32 %v6050_v1, %v5429_v63  ;;  %v3546_v15 = vpop.f32.mrf.mxu3  ;;  %v5525_v34 = vld [vmem:[%s9182_s3 + $0x650] sm:$0xf]  ;;  %v5645_v1 = vld [vmem:[%s9182_s3 + $0x740] sm:$0xf] }
 0x1bf   :  { %3795 = vmatpush.bf16.msrb.mxu3 %v5286_v41  ;;  %3823 = vmatpush.bf16.msra.mxu2 %v5454_v43  ;;  %v5526_v43 = vor.u32 %v6074_v42, %v5525_v34 }
 0x1c0   :  { %3816 = vmatmul.bf16.vlgmr.msra.gmra.mxu0 %v8281_v30  ;;  %v5561_v30 = vld [vmem:[%s9182_s3 + $0x698] sm:$0xf] }
 0x1c1   :  { %v5562_v18 = vor.u32 %v6083_v14, %v5561_v30  ;;  %v5634_v30 = vor.u32 %v6101_v7, %v5633_v58  ;;  %v6098_v14 = vld [vmem:[%s9182_s3 + $0x718] sm:$0xf0] }
 0x1c2   :  { %3788 = vmatpush.bf16.msrb.mxu1 %v5118_v53  ;;  %v5514_v53 = vor.u32 %v6071_v50, %v5513_v49 }
 0x1c3   :  { %3796 = vmatpush.bf16.msrb.mxu3 %v5274_v44  ;;  %3824 = vmatpush.bf16.msra.mxu2 %v5442_v60  ;;  %v5670_v44 = vor.u32 %v6110_v47, %v5669_v35  ;;  %v6107_v60 = vld [vmem:[%s9182_s3 + $0x760] sm:$0xf0] }
 0x1c4   :  { %v3559_v41 = vpop.f32.mrf.mxu0  ;;  %v5658_v51 = vor.u32 %v6107_v60, %v5657_v57 }
 0x1c6   :  { %3789 = vmatpush.bf16.msrb.mxu1 %v5106_v5  ;;  %v5646_v5 = vor.u32 %v6104_v0, %v5645_v1 }
 0x1c7   :  { %3797 = vmatpush.bf16.msrb.mxu3 %v5262_v4  ;;  %3825 = vmatpush.bf16.msra.mxu2 %v5430_v36  ;;  %v6065_v4 = vld [vmem:[%s9182_s3 + $0x610] sm:$0xf0] }
 0x1c8   :  { %v5490_v36 = vor.u32 %v6065_v4, %v5489_v11  ;;  %v6153_v4 = vld [vmem:[%s9183_s4] sm:$0x7]  ;;  %s6180_s4 = smov [#allocation2]  }
 0x1c9   :  { %3790 = vmatmul.bf16.vlgmr.msrb.gmra.mxu1 %v8069_v9  ;;  %v6041_v9 = vld [vmem:[%s9182_s3 + $0x550] sm:$0xf0]  ;;  %s3880_s22 = sshll.u32 %s6180_s4, 4  ;;  %s3881_s22 = int_to_ptr.vmem [resolvable:$true] %s3880_s22 }
 0x1ca   :  { %3834 = vmatpush.bf16.msra.mxu1 %v5574_v6  ;;  %v5394_v22 = vor.u32 %v6041_v9, %v5393_v29 }
 0x1cb   :  { %3798 = vmatpush.bf16.msrb.mxu3 %v5250_v17  ;;  %3826 = vmatpush.bf16.msra.mxu2 %v5418_v54  ;;  %v5609_v54 = vld [vmem:[%s9182_s3 + $0x6f8] sm:$0xf] }
 0x1cc   :  { %v3609_v59 = vpop.f32.mrf.mxu0 }
 0x1ce   :  { %3835 = vmatpush.bf16.msra.mxu1 %v5562_v18  ;;  %v6095_v18 = vld [vmem:[%s9182_s3 + $0x700] sm:$0xf0] }
 0x1cf   :  { %3799 = vmatpush.bf16.msrb.mxu3 %v5238_v16  ;;  %3827 = vmatpush.bf16.msra.mxu2 %v5406_v21  ;;  %v5610_v32 = vor.u32 %v6095_v18, %v5609_v54  ;;  %v5585_v16 = vld [vmem:[%s9182_s3 + $0x6c8] sm:$0xf]  ;;  %v6089_v21 = vld [vmem:[%s9182_s3 + $0x6d0] sm:$0xf0] }
 0x1d0   :  { %v5586_v29 = vor.u32 %v6089_v21, %v5585_v16 }
 0x1d2   :  { %3836 = vmatpush.bf16.msra.mxu1 %v5550_v26  ;;  %v3610_v26 = vadd.f32 %v3609_v59, %v2185_v19 }
 0x1d3   :  { %3800 = vmatpush.bf16.msrb.mxu3 %v5226_v31  ;;  %3828 = vmatpush.bf16.msra.mxu2 %v5394_v22 }
 0x1d4   :  { %v3611_v6 = vpop.f32.mrf.mxu0 }
 0x1d6   :  { %3837 = vmatpush.bf16.msra.mxu1 %v5538_v38  ;;  %3829 = vmatmul.bf16.vlgmr.msra.gmra.mxu2 %v8376_v46  ;;  %v6068_v46 = vld [vmem:[%s9182_s3 + $0x628] sm:$0xf0] }
 0x1d7   :  { %3801 = vmatpush.bf16.msrb.mxu3 %v5214_v45  ;;  %v5502_v63 = vor.u32 %v6068_v46, %v5501_v8 }
 0x1d9   :  { %v3570_v10 = vpop.f32.mrf.mxu2 }
 0x1da   :  { %3838 = vmatpush.bf16.msra.mxu1 %v5526_v43  ;;  %v3571_v13 = vadd.f32 %v3570_v10, %v9060_v25 }
 0x1db   :  { %3802 = vmatpush.bf16.msrb.mxu3 %v5202_v52 }
 0x1dc   :  { %v3661_v17 = vpop.f32.mrf.mxu0 }
 0x1de   :  { %3839 = vmatpush.bf16.msra.mxu1 %v5514_v53  ;;  %3803 = vmatmul.bf16.vlgmr.msrb.gmra.mxu3 %v8181_v24  ;;  %v5621_v24 = vld [vmem:[%s9182_s3 + $0x710] sm:$0xf] }
 0x1df   :  { %3847 = vmatpush.bf16.msra.mxu3 %v5670_v44  ;;  %v5622_v15 = vor.u32 %v6098_v14, %v5621_v24 }
 0x1e1   :  { %v3572_v2 = vpop.f32.mrf.mxu2 }
 0x1e2   :  { %3840 = vmatpush.bf16.msra.mxu1 %v5502_v63 }
 0x1e3   :  { %3848 = vmatpush.bf16.msra.mxu3 %v5658_v51 }
 0x1e4   :  { %v3663_v25 = vpop.f32.mrf.mxu0 }
 0x1e6   :  { %3841 = vmatpush.bf16.msra.mxu1 %v5490_v36  ;;  %v3583_v62 = vpop.f32.mrf.mxu1 }
 0x1e7   :  { %3849 = vmatpush.bf16.msra.mxu3 %v5646_v5  ;;  %v3584_v20 = vadd.f32 %v3583_v62, %v3571_v13  ;;  %v2186_v5 = vperm.slane %v6153_v4, 2 }
 0x1e9   :  { %3842 = vmatmul.bf16.vlgmr.msra.gmra.mxu1 %v8461_v40  ;;  %v6092_v40 = vld [vmem:[%s9182_s3 + $0x6e8] sm:$0xf0]  ;;  %v3622_v27 = vpop.f32.mrf.mxu2 }
 0x1ea   :  { %v5598_v12 = vor.u32 %v6092_v40, %v5597_v55  ;;  %v3623_v28 = vadd.f32 %v3622_v27, %v3610_v26 }
 0x1eb   :  { %3850 = vmatpush.bf16.msra.mxu3 %v5634_v30 }
 0x1ee   :  { %v3585_v9 = vpop.f32.mrf.mxu1 }
 0x1ef   :  { %3851 = vmatpush.bf16.msra.mxu3 %v5622_v15 }
 0x1f1   :  { %v3624_v33 = vpop.f32.mrf.mxu2 }
 0x1f3   :  { %3852 = vmatpush.bf16.msra.mxu3 %v5610_v32 }
 0x1f6   :  { %v3635_v23 = vpop.f32.mrf.mxu1 }
 0x1f7   :  { %3853 = vmatpush.bf16.msra.mxu3 %v5598_v12  ;;  %v3636_v39 = vadd.f32 %v3635_v23, %v3623_v28 }
 0x1f9   :  { %v3674_v31 = vpop.f32.mrf.mxu2 }
 0x1fb   :  { %3854 = vmatpush.bf16.msra.mxu3 %v5586_v29 }
 0x1fe   :  { %3855 = vmatmul.bf16.vlgmr.msra.gmra.mxu3 %v8590_v3  ;;  %v3637_v22 = vpop.f32.mrf.mxu1  ;;  %v3713_v38 = vpop.f32.mrf.mxu0 }
 0x201   :  { %v3596_v37 = vpop.f32.mrf.mxu3  ;;  %v3676_v41 = vpop.f32.mrf.mxu2 }
 0x202   :  { %v3597_v48 = vadd.f32 %v3596_v37, %v3584_v20 }
 0x206   :  { %v3687_v34 = vpop.f32.mrf.mxu1  ;;  %v3715_v42 = vpop.f32.mrf.mxu0 }
 0x209   :  { %v3598_v45 = vpop.f32.mrf.mxu3 }
 0x20e   :  { %v3689_v43 = vpop.f32.mrf.mxu1 }
 0x211   :  { %v3648_v61 = vpop.f32.mrf.mxu3 }
 0x212   :  { %v3649_v56 = vadd.f32 %v3648_v61, %v3636_v39 }
 0x214   :  { %v3662_v35 = vadd.f32 %v3661_v17, %v3649_v56 }
 0x216   :  { %v3675_v47 = vadd.f32 %v3674_v31, %v3662_v35 }
 0x218   :  { %v3688_v49 = vadd.f32 %v3687_v34, %v3675_v47 }
 0x219   :  { %v3650_v50 = vpop.f32.mrf.mxu3  ;;  %v3726_v3 = vpop.f32.mrf.mxu2 }
 0x21e   :  { %v3765_v52 = vpop.f32.mrf.mxu0 }
 0x221   :  { %v3700_v44 = vpop.f32.mrf.mxu3  ;;  %v3728_v57 = vpop.f32.mrf.mxu2 }
 0x222   :  { %v3701_v53 = vadd.f32 %v3700_v44, %v3688_v49 }
 0x224   :  { %v3714_v59 = vadd.f32 %v3713_v38, %v3701_v53 }
 0x226   :  { %v3739_v60 = vpop.f32.mrf.mxu1  ;;  %v3727_v8 = vadd.f32 %v3726_v3, %v3714_v59  ;;  %v3767_v46 = vpop.f32.mrf.mxu0 }
 0x227   :  { %v3740_v6 = vadd.f32 %v3739_v60, %v2186_v5 }
 0x228   :  { %v3863_v51 = vrot.slane %v3727_v8, 6 }
 0x229   :  { %v3702_v63 = vpop.f32.mrf.mxu3 }
 0x22a   :  { %v3866_v1 = vsel %vm3865_vm9, %v3597_v48, %v3863_v51 }
 0x22e   :  { %v3741_v0 = vpop.f32.mrf.mxu1 }
 0x239   :  { %v3778_v11 = vpop.f32.mrf.mxu2 }
 0x23d   :  { %v3817_v36 = vpop.f32.mrf.mxu0 }
 0x241   :  { %v3752_v58 = vpop.f32.mrf.mxu3  ;;  %v3780_v10 = vpop.f32.mrf.mxu2 }
 0x242   :  { %v3753_v7 = vadd.f32 %v3752_v58, %v3740_v6 }
 0x244   :  { %v3766_v13 = vadd.f32 %v3765_v52, %v3753_v7 }
 0x245   :  { %v3819_v24 = vpop.f32.mrf.mxu0 }
 0x246   :  { %v3791_v30 = vpop.f32.mrf.mxu1  ;;  %v3779_v62 = vadd.f32 %v3778_v11, %v3766_v13 }
 0x248   :  { %v3792_v40 = vadd.f32 %v3791_v30, %v3779_v62 }
 0x249   :  { %v3754_v14 = vpop.f32.mrf.mxu3 }
 0x24e   :  { %v3793_v15 = vpop.f32.mrf.mxu1 }
 0x259   :  { %v3830_v17 = vpop.f32.mrf.mxu2 }
 0x261   :  { %v3804_v54 = vpop.f32.mrf.mxu3  ;;  %v3832_v18 = vpop.f32.mrf.mxu2 }
 0x262   :  { %v3805_v19 = vadd.f32 %v3804_v54, %v3792_v40 }
 0x264   :  { %v3818_v20 = vadd.f32 %v3817_v36, %v3805_v19 }
 0x266   :  { %v3843_v2 = vpop.f32.mrf.mxu1  ;;  %v3831_v12 = vadd.f32 %v3830_v17, %v3818_v20 }
 0x268   :  { %v3844_v25 = vadd.f32 %v3843_v2, %v3831_v12 }
 0x269   :  { %v3806_v32 = vpop.f32.mrf.mxu3 }
 0x26e   :  { %v3845_v55 = vpop.f32.mrf.mxu1 }
 0x281   :  { %v3856_v16 = vpop.f32.mrf.mxu3 }
 0x282   :  { %v3857_v21 = vadd.f32 %v3856_v16, %v3844_v25 }
 0x284   :  { %v3864_v26 = vrot.slane %v3857_v21, 4 }
 0x286   :  { %v3868_v27 = vsel %vm3867_vm13, %v3866_v1, %v3864_v26 }
 0x287   :  { %3874 = vst.msk [vmem:[#allocation2] sm:$0x3f] %vm3873_vm14, %v3868_v27 }
 0x288   :  { %3885 = dma.vmem_to_hbm [thread:$0]  %s3881_s22, 96, %s3883_s25, [#allocation3]  }
 0x289   :  { %v3858_v28 = vpop.f32.mrf.mxu3 }
 0x28a   :  { %6178 = dma.done.wait [#allocation3], 96  }
 0x28b   :  { %6179 = vsyncadd [#allocation3], 4294967200 }
 0x28c   :  { %3890 = vsyncpa [#allocation3], 1 }

</bundles_post_ra>
